<compile_context>
chip_gen: v7x
topology: tpu7x:2x2x1
jax: 0.10.0
libtpu: 0.0.40
codegen_flags: <defaults>
</compile_context>

<pallas_src>
import functools

import jax
import jax.numpy as jnp
from jax import lax
from jax.experimental import pallas as pl
from jax.experimental.pallas import tpu as pltpu


def _round_up(n, m):
    return ((n + m - 1) // m) * m


def _pick_tile(b_pad, batch_tile):
    """Largest 128-multiple tile that divides b_pad, is <= batch_tile, and
    (when possible) leaves a grid of >= 2 steps so megacore can split it."""
    units_total = b_pad // 128
    max_units = max(1, batch_tile // 128)
    for u in range(min(units_total, max_units), 0, -1):
        if units_total % u == 0 and units_total // u >= 2:
            return u * 128
    return 128  # tiny batch: single 128-wide step covers everything


def _mlp_kernel(x_ref,
                w1_ref, b1_ref,
                w2_ref, b2_ref,
                w21_ref, b21_ref,
                w22_ref, b22_ref,
                w3_ref, b3_ref,
                w4c_ref, b4_ref,
                o_ref, *, apply_sigmoid=False):
    """Fused forward for one batch tile; batch ends up on the lane axis.

    x_ref:   (TB, input_dim) bf16   -- un-transposed batch tile
    w*_ref:  (out, in) bf16 PyTorch layout, resident in VMEM
    b*_ref:  (out, 1) f32 column biases (broadcast across lanes)
    w4c_ref: (32, 1) f32 last-layer weight column (VPU path)
    o_ref:   (1, TB) f32 lane-dense output row
    """
    x = x_ref[...]                                   # (TB, in) bf16

    # Layer 1: contract the feature dims of W (out,in) and x (TB,in) so the
    # result is (512, TB) -- batch lands on lanes and stays there.
    y = lax.dot_general(w1_ref[...], x,
                        dimension_numbers=(((1,), (1,)), ((), ())),
                        preferred_element_type=jnp.float32)
    h = jnp.maximum(y + b1_ref[...], 0.0).astype(jnp.bfloat16)

    def dense_relu(h, w_ref, b_ref):
        y = jnp.dot(w_ref[...], h, preferred_element_type=jnp.float32)
        return jnp.maximum(y + b_ref[...], 0.0)      # f32 epilogue

    h = dense_relu(h, w2_ref, b2_ref).astype(jnp.bfloat16)    # (512, TB)
    h = dense_relu(h, w21_ref, b21_ref).astype(jnp.bfloat16)  # (128, TB)
    h = dense_relu(h, w22_ref, b22_ref).astype(jnp.bfloat16)  # (128, TB)
    h = dense_relu(h, w3_ref, b3_ref)                         # (32,  TB) f32

    # Final 32 -> 1 layer on the VPU + sublane reduce: avoids a 1-row MXU
    # matmul and writes a lane-dense (1, TB) row directly.
    y = jnp.sum(h * w4c_ref[...], axis=0, keepdims=True) + b4_ref[...]
    if apply_sigmoid:
        y = jax.nn.sigmoid(y)                        # EUP slot is idle: free
    o_ref[...] = y.astype(o_ref.dtype)


def photon_classifier_forward(x, params, *, batch_tile=512,
                              apply_sigmoid=False):
    """x: (B, input_dim) float32.
    params: list of (W, b) in PyTorch layout: W = (out, in), b = (out,).
    Returns (B, 1) f32 logits (apply_sigmoid=True matches .predict())."""
    B, input_dim = x.shape

    batch_tile = max(128, _round_up(batch_tile, 128))
    B_pad = _round_up(B, 128)                        # waste always < 128 rows
    tile = _pick_tile(B_pad, batch_tile)
    grid = B_pad // tile

    # bf16 activations for the MXU; pad (if needed) only to the next 128.
    x_bf = x.astype(jnp.bfloat16)
    if B_pad != B:
        x_bf = jnp.pad(x_bf, ((0, B_pad - B), (0, 0)))

    (w1, b1), (w2, b2), (w21, b21), (w22, b22), (w3, b3), (w4, b4) = params

    def col(b):
        return b.reshape(-1, 1).astype(jnp.float32)

    # Weights stay PyTorch (out, in) but cast to bf16 (native MXU dtype);
    # biases become f32 (out, 1) columns; the last-layer (1, 32) weight
    # becomes an f32 (32, 1) column for the VPU path.
    kernel_args = [
        w1.astype(jnp.bfloat16), col(b1),
        w2.astype(jnp.bfloat16), col(b2),
        w21.astype(jnp.bfloat16), col(b21),
        w22.astype(jnp.bfloat16), col(b22),
        w3.astype(jnp.bfloat16), col(b3),
        w4.reshape(-1, 1).astype(jnp.float32), col(b4),
    ]

    # x tiled along the batch; all weights/biases resident (constant index_map).
    in_specs = [pl.BlockSpec((tile, input_dim), lambda i: (i, 0))]
    in_specs += [pl.BlockSpec(a.shape, lambda i: (0, 0)) for a in kernel_args]
    out_spec = pl.BlockSpec((1, tile), lambda i: (0, i))

    flops = 2 * B_pad * (input_dim * 512 + 512 * 512 + 512 * 128
                         + 128 * 128 + 128 * 32 + 32 * 1)
    param_bytes = sum(int(a.size) * a.dtype.itemsize for a in kernel_args)
    bytes_accessed = (int(x_bf.size) * x_bf.dtype.itemsize
                      + param_bytes
                      + B_pad * 4)

    out = pl.pallas_call(
        functools.partial(_mlp_kernel, apply_sigmoid=apply_sigmoid),
        out_shape=jax.ShapeDtypeStruct((1, B_pad), jnp.float32),
        grid=(grid,),
        in_specs=in_specs,
        out_specs=out_spec,
        compiler_params=pltpu.CompilerParams(
            dimension_semantics=("parallel",),
            vmem_limit_bytes=32 << 20),
        cost_estimate=pl.CostEstimate(
            flops=flops, transcendentals=0, bytes_accessed=bytes_accessed),
    )(x_bf, *kernel_args)

    return out[0, :B].reshape(B, 1)


def init_params(key, input_dim):
    """torch.nn.Linear default init: U(-1/sqrt(fan_in), 1/sqrt(fan_in)).
    PyTorch layout: W = (out, in), b = (out,)."""
    sizes = [(input_dim, 512), (512, 512), (512, 128),
             (128, 128), (128, 32), (32, 1)]
    params = []
    for fan_in, fan_out in sizes:
        key, kw, kb = jax.random.split(key, 3)
        bound = float(fan_in) ** -0.5
        w = jax.random.uniform(kw, (fan_out, fan_in), jnp.float32,
                               minval=-bound, maxval=bound)
        b = jax.random.uniform(kb, (fan_out,), jnp.float32,
                               minval=-bound, maxval=bound)
        params.append((w, b))
    return params


def reference_forward(x, params, *, matmul_dtype=jnp.float32):
    """Pure-JAX reference with the same mixed precision as the kernel:
    matmul inputs in `matmul_dtype`, f32 accumulation, f32 final layer."""
    h = x
    n = len(params)
    for i, (w, b) in enumerate(params):
        if i < n - 1:
            y = jnp.dot(h.astype(matmul_dtype), w.T.astype(matmul_dtype),
                        preferred_element_type=jnp.float32)
            h = jnp.maximum(y + b, 0.0)
        else:
            h = jnp.dot(h, w.T, preferred_element_type=jnp.float32) + b
    return h


if __name__ == "__main__":
    key = jax.random.PRNGKey(0)
    input_dim = 32
    batch = 300   # not 128-aligned on purpose: pads to 384, grid of 3 tiles

    kx, kp = jax.random.split(key)
    x = jax.random.normal(kx, (batch, input_dim), jnp.float32)
    params = init_params(kp, input_dim)

    fwd = jax.jit(functools.partial(photon_classifier_forward, batch_tile=512))
    out = jax.block_until_ready(fwd(x, params))

    ref = reference_forward(x, params, matmul_dtype=jnp.bfloat16)
    assert out.shape == (batch, 1)
    err = jnp.max(jnp.abs(out - ref))
    assert jnp.allclose(out, ref, atol=1e-2, rtol=1e-2), f"max abs err {err}"

    # .predict() == photon_classifier_forward(..., apply_sigmoid=True)
    print("KERNEL_OK")
</pallas_src>

<mosaic_0001>
module attributes {stable_mosaic.version = 11 : i64} {
  func.func @_mlp_kernel(%arg0: i32, %arg1: memref<128x32xbf16, #tpu.memory_space<vmem>>, %arg2: memref<512x32xbf16, #tpu.memory_space<vmem>>, %arg3: memref<512x1xf32, #tpu.memory_space<vmem>>, %arg4: memref<512x512xbf16, #tpu.memory_space<vmem>>, %arg5: memref<512x1xf32, #tpu.memory_space<vmem>>, %arg6: memref<128x512xbf16, #tpu.memory_space<vmem>>, %arg7: memref<128x1xf32, #tpu.memory_space<vmem>>, %arg8: memref<128x128xbf16, #tpu.memory_space<vmem>>, %arg9: memref<128x1xf32, #tpu.memory_space<vmem>>, %arg10: memref<32x128xbf16, #tpu.memory_space<vmem>>, %arg11: memref<32x1xf32, #tpu.memory_space<vmem>>, %arg12: memref<32x1xf32, #tpu.memory_space<vmem>>, %arg13: memref<1x1xf32, #tpu.memory_space<vmem>>, %arg14: memref<1x128xf32, #tpu.memory_space<vmem>>) attributes {dimension_semantics = [#tpu.dimension_semantics<parallel>], iteration_bounds = array<i64: 3>, scalar_prefetch = 0 : i64, scratch_operands = 0 : i64, tpu.core_type = #tpu.core_type<tc>, window_params = [{transform_indices = @transform_0, window_bounds = array<i64: 128, 32>}, {pipeline_mode = #tpu.pipeline_mode<synchronous>, transform_indices = @transform_1, window_bounds = array<i64: 512, 32>}, {pipeline_mode = #tpu.pipeline_mode<synchronous>, transform_indices = @transform_2, window_bounds = array<i64: 512, 1>}, {pipeline_mode = #tpu.pipeline_mode<synchronous>, transform_indices = @transform_3, window_bounds = array<i64: 512, 512>}, {pipeline_mode = #tpu.pipeline_mode<synchronous>, transform_indices = @transform_4, window_bounds = array<i64: 512, 1>}, {pipeline_mode = #tpu.pipeline_mode<synchronous>, transform_indices = @transform_5, window_bounds = array<i64: 128, 512>}, {pipeline_mode = #tpu.pipeline_mode<synchronous>, transform_indices = @transform_6, window_bounds = array<i64: 128, 1>}, {pipeline_mode = #tpu.pipeline_mode<synchronous>, transform_indices = @transform_7, window_bounds = array<i64: 128, 128>}, {pipeline_mode = #tpu.pipeline_mode<synchronous>, transform_indices = @transform_8, window_bounds = array<i64: 128, 1>}, {pipeline_mode = #tpu.pipeline_mode<synchronous>, transform_indices = @transform_9, window_bounds = array<i64: 32, 128>}, {pipeline_mode = #tpu.pipeline_mode<synchronous>, transform_indices = @transform_10, window_bounds = array<i64: 32, 1>}, {pipeline_mode = #tpu.pipeline_mode<synchronous>, transform_indices = @transform_11, window_bounds = array<i64: 32, 1>}, {pipeline_mode = #tpu.pipeline_mode<synchronous>, transform_indices = @transform_12, window_bounds = array<i64: 1, 1>}, {transform_indices = @transform_13, window_bounds = array<i64: 1, 128>}]} {
    %c0 = arith.constant 0 : index
    %c0_0 = arith.constant 0 : index
    %0 = vector.load %arg1[%c0, %c0_0] : memref<128x32xbf16, #tpu.memory_space<vmem>>, vector<128x32xbf16>
    %c0_1 = arith.constant 0 : index
    %c0_2 = arith.constant 0 : index
    %1 = vector.load %arg2[%c0_1, %c0_2] : memref<512x32xbf16, #tpu.memory_space<vmem>>, vector<512x32xbf16>
    %cst = arith.constant dense<0.000000e+00> : vector<512x128xf32>
    %2 = tpu.matmul %1, %0, %cst {dimension_numbers = #tpu.dot_dimension_numbers<[1], [1], [0], [0], [0, 0, 1, 0], [], []>} : vector<512x32xbf16>, vector<128x32xbf16>, vector<512x128xf32> -> vector<512x128xf32>
    %c0_3 = arith.constant 0 : index
    %c0_4 = arith.constant 0 : index
    %3 = vector.load %arg3[%c0_3, %c0_4] : memref<512x1xf32, #tpu.memory_space<vmem>>, vector<512x1xf32>
    %4 = vector.broadcast %3 : vector<512x1xf32> to vector<512x128xf32>
    %5 = arith.addf %2, %4 : vector<512x128xf32>
    %cst_5 = arith.constant 0.000000e+00 : f32
    %6 = vector.broadcast %cst_5 : f32 to vector<512x128xf32>
    %7 = arith.maximumf %5, %6 : vector<512x128xf32>
    %8 = arith.truncf %7 : vector<512x128xf32> to vector<512x128xbf16>
    %c0_6 = arith.constant 0 : index
    %c0_7 = arith.constant 0 : index
    %9 = vector.load %arg4[%c0_6, %c0_7] : memref<512x512xbf16, #tpu.memory_space<vmem>>, vector<512x512xbf16>
    %cst_8 = arith.constant dense<0.000000e+00> : vector<512x128xf32>
    %10 = tpu.matmul %9, %8, %cst_8 {dimension_numbers = #tpu.dot_dimension_numbers<[1], [0], [0], [1], [0, 0, 1, 1], [], []>} : vector<512x512xbf16>, vector<512x128xbf16>, vector<512x128xf32> -> vector<512x128xf32>
    %c0_9 = arith.constant 0 : index
    %c0_10 = arith.constant 0 : index
    %11 = vector.load %arg5[%c0_9, %c0_10] : memref<512x1xf32, #tpu.memory_space<vmem>>, vector<512x1xf32>
    %12 = vector.broadcast %11 : vector<512x1xf32> to vector<512x128xf32>
    %13 = arith.addf %10, %12 : vector<512x128xf32>
    %cst_11 = arith.constant 0.000000e+00 : f32
    %14 = vector.broadcast %cst_11 : f32 to vector<512x128xf32>
    %15 = arith.maximumf %13, %14 : vector<512x128xf32>
    %16 = arith.truncf %15 : vector<512x128xf32> to vector<512x128xbf16>
    %c0_12 = arith.constant 0 : index
    %c0_13 = arith.constant 0 : index
    %17 = vector.load %arg6[%c0_12, %c0_13] : memref<128x512xbf16, #tpu.memory_space<vmem>>, vector<128x512xbf16>
    %cst_14 = arith.constant dense<0.000000e+00> : vector<128x128xf32>
    %18 = tpu.matmul %17, %16, %cst_14 {dimension_numbers = #tpu.dot_dimension_numbers<[1], [0], [0], [1], [0, 0, 1, 1], [], []>} : vector<128x512xbf16>, vector<512x128xbf16>, vector<128x128xf32> -> vector<128x128xf32>
    %c0_15 = arith.constant 0 : index
    %c0_16 = arith.constant 0 : index
    %19 = vector.load %arg7[%c0_15, %c0_16] : memref<128x1xf32, #tpu.memory_space<vmem>>, vector<128x1xf32>
    %20 = vector.broadcast %19 : vector<128x1xf32> to vector<128x128xf32>
    %21 = arith.addf %18, %20 : vector<128x128xf32>
    %cst_17 = arith.constant 0.000000e+00 : f32
    %22 = vector.broadcast %cst_17 : f32 to vector<128x128xf32>
    %23 = arith.maximumf %21, %22 : vector<128x128xf32>
    %24 = arith.truncf %23 : vector<128x128xf32> to vector<128x128xbf16>
    %c0_18 = arith.constant 0 : index
    %c0_19 = arith.constant 0 : index
    %25 = vector.load %arg8[%c0_18, %c0_19] : memref<128x128xbf16, #tpu.memory_space<vmem>>, vector<128x128xbf16>
    %cst_20 = arith.constant dense<0.000000e+00> : vector<128x128xf32>
    %26 = tpu.matmul %25, %24, %cst_20 {dimension_numbers = #tpu.dot_dimension_numbers<[1], [0], [0], [1], [0, 0, 1, 1], [], []>} : vector<128x128xbf16>, vector<128x128xbf16>, vector<128x128xf32> -> vector<128x128xf32>
    %c0_21 = arith.constant 0 : index
    %c0_22 = arith.constant 0 : index
    %27 = vector.load %arg9[%c0_21, %c0_22] : memref<128x1xf32, #tpu.memory_space<vmem>>, vector<128x1xf32>
    %28 = vector.broadcast %27 : vector<128x1xf32> to vector<128x128xf32>
    %29 = arith.addf %26, %28 : vector<128x128xf32>
    %cst_23 = arith.constant 0.000000e+00 : f32
    %30 = vector.broadcast %cst_23 : f32 to vector<128x128xf32>
    %31 = arith.maximumf %29, %30 : vector<128x128xf32>
    %32 = arith.truncf %31 : vector<128x128xf32> to vector<128x128xbf16>
    %c0_24 = arith.constant 0 : index
    %c0_25 = arith.constant 0 : index
    %33 = vector.load %arg10[%c0_24, %c0_25] : memref<32x128xbf16, #tpu.memory_space<vmem>>, vector<32x128xbf16>
    %cst_26 = arith.constant dense<0.000000e+00> : vector<32x128xf32>
    %34 = tpu.matmul %33, %32, %cst_26 {dimension_numbers = #tpu.dot_dimension_numbers<[1], [0], [0], [1], [0, 0, 1, 1], [], []>} : vector<32x128xbf16>, vector<128x128xbf16>, vector<32x128xf32> -> vector<32x128xf32>
    %c0_27 = arith.constant 0 : index
    %c0_28 = arith.constant 0 : index
    %35 = vector.load %arg11[%c0_27, %c0_28] : memref<32x1xf32, #tpu.memory_space<vmem>>, vector<32x1xf32>
    %36 = vector.broadcast %35 : vector<32x1xf32> to vector<32x128xf32>
    %37 = arith.addf %34, %36 : vector<32x128xf32>
    %cst_29 = arith.constant 0.000000e+00 : f32
    %38 = vector.broadcast %cst_29 : f32 to vector<32x128xf32>
    %39 = arith.maximumf %37, %38 : vector<32x128xf32>
    %c0_30 = arith.constant 0 : index
    %c0_31 = arith.constant 0 : index
    %40 = vector.load %arg12[%c0_30, %c0_31] : memref<32x1xf32, #tpu.memory_space<vmem>>, vector<32x1xf32>
    %41 = vector.broadcast %40 : vector<32x1xf32> to vector<32x128xf32>
    %42 = arith.mulf %39, %41 : vector<32x128xf32>
    %cst_32 = arith.constant dense<0.000000e+00> : vector<128xf32>
    %43 = vector.multi_reduction <add>, %42, %cst_32 [0] : vector<32x128xf32> to vector<128xf32>
    %44 = vector.shape_cast %43 : vector<128xf32> to vector<1x128xf32>
    %c0_33 = arith.constant 0 : index
    %c0_34 = arith.constant 0 : index
    %45 = vector.load %arg13[%c0_33, %c0_34] : memref<1x1xf32, #tpu.memory_space<vmem>>, vector<1x1xf32>
    %46 = vector.broadcast %45 : vector<1x1xf32> to vector<1x128xf32>
    %47 = arith.addf %44, %46 : vector<1x128xf32>
    %c0_35 = arith.constant 0 : index
    %c0_36 = arith.constant 0 : index
    %48 = vector.load %arg14[%c0_35, %c0_36] : memref<1x128xf32, #tpu.memory_space<vmem>>, vector<1x128xf32>
    tpu.vector_store %arg14[%c0_35, %c0_36], %47 {strides = array<i32>} : memref<1x128xf32, #tpu.memory_space<vmem>>, vector<1x128xf32>,
    return
  }
  func.func @transform_0(%arg0: i32) -> (i32, i32) {
    %c0_i32 = arith.constant 0 : i32
    %c0_i32_0 = arith.constant 0 : i32
    return %arg0, %c0_i32 : i32, i32
  }
  func.func @transform_1(%arg0: i32) -> (i32, i32) {
    %c0_i32 = arith.constant 0 : i32
    %c0_i32_0 = arith.constant 0 : i32
    %c0_i32_1 = arith.constant 0 : i32
    return %c0_i32, %c0_i32_0 : i32, i32
  }
  func.func @transform_2(%arg0: i32) -> (i32, i32) {
    %c0_i32 = arith.constant 0 : i32
    %c0_i32_0 = arith.constant 0 : i32
    %c0_i32_1 = arith.constant 0 : i32
    return %c0_i32, %c0_i32_0 : i32, i32
  }
  func.func @transform_3(%arg0: i32) -> (i32, i32) {
    %c0_i32 = arith.constant 0 : i32
    %c0_i32_0 = arith.constant 0 : i32
    %c0_i32_1 = arith.constant 0 : i32
    return %c0_i32, %c0_i32_0 : i32, i32
  }
  func.func @transform_4(%arg0: i32) -> (i32, i32) {
    %c0_i32 = arith.constant 0 : i32
    %c0_i32_0 = arith.constant 0 : i32
    %c0_i32_1 = arith.constant 0 : i32
    return %c0_i32, %c0_i32_0 : i32, i32
  }
  func.func @transform_5(%arg0: i32) -> (i32, i32) {
    %c0_i32 = arith.constant 0 : i32
    %c0_i32_0 = arith.constant 0 : i32
    %c0_i32_1 = arith.constant 0 : i32
    return %c0_i32, %c0_i32_0 : i32, i32
  }
  func.func @transform_6(%arg0: i32) -> (i32, i32) {
    %c0_i32 = arith.constant 0 : i32
    %c0_i32_0 = arith.constant 0 : i32
    %c0_i32_1 = arith.constant 0 : i32
    return %c0_i32, %c0_i32_0 : i32, i32
  }
  func.func @transform_7(%arg0: i32) -> (i32, i32) {
    %c0_i32 = arith.constant 0 : i32
    %c0_i32_0 = arith.constant 0 : i32
    %c0_i32_1 = arith.constant 0 : i32
    return %c0_i32, %c0_i32_0 : i32, i32
  }
  func.func @transform_8(%arg0: i32) -> (i32, i32) {
    %c0_i32 = arith.constant 0 : i32
    %c0_i32_0 = arith.constant 0 : i32
    %c0_i32_1 = arith.constant 0 : i32
    return %c0_i32, %c0_i32_0 : i32, i32
  }
  func.func @transform_9(%arg0: i32) -> (i32, i32) {
    %c0_i32 = arith.constant 0 : i32
    %c0_i32_0 = arith.constant 0 : i32
    %c0_i32_1 = arith.constant 0 : i32
    return %c0_i32, %c0_i32_0 : i32, i32
  }
  func.func @transform_10(%arg0: i32) -> (i32, i32) {
    %c0_i32 = arith.constant 0 : i32
    %c0_i32_0 = arith.constant 0 : i32
    %c0_i32_1 = arith.constant 0 : i32
    return %c0_i32, %c0_i32_0 : i32, i32
  }
  func.func @transform_11(%arg0: i32) -> (i32, i32) {
    %c0_i32 = arith.constant 0 : i32
    %c0_i32_0 = arith.constant 0 : i32
    %c0_i32_1 = arith.constant 0 : i32
    return %c0_i32, %c0_i32_0 : i32, i32
  }
  func.func @transform_12(%arg0: i32) -> (i32, i32) {
    %c0_i32 = arith.constant 0 : i32
    %c0_i32_0 = arith.constant 0 : i32
    %c0_i32_1 = arith.constant 0 : i32
    return %c0_i32, %c0_i32_0 : i32, i32
  }
  func.func @transform_13(%arg0: i32) -> (i32, i32) {
    %c0_i32 = arith.constant 0 : i32
    %c0_i32_0 = arith.constant 0 : i32
    return %c0_i32, %arg0 : i32, i32
  }
}

</mosaic_0001>

<bundles_post_ra>
// kernel: photon_classifier_forward.1
= control target key start
LH: loop header
LB: loop body
LE: loop exit
PB: predicated region body
PF: predicated region fallthrough
CT: control target
= control target key end

     0   :  { %s5580_s27 = smov 0   ;;  %s7273_s0 = inlined_call_operand.vmem [shape: bf16[384,32], index: 0, kind: input, shape index: {}]   ;;  %s7274_s1 = inlined_call_operand.vmem [shape: bf16[512,32], index: 1, kind: input, shape index: {}]   ;;  %s7275_s2 = inlined_call_operand.vmem [shape: f32[512,1], index: 2, kind: input, shape index: {}]   ;;  %s7276_s3 = inlined_call_operand.vmem [shape: bf16[512,512], index: 3, kind: input, shape index: {}]   ;;  %s7277_s4 = inlined_call_operand.vmem [shape: f32[512,1], index: 4, kind: input, shape index: {}]   ;;  %s7278_s5 = inlined_call_operand.vmem [shape: bf16[128,512], index: 5, kind: input, shape index: {}]   ;;  %s7279_s6 = inlined_call_operand.vmem [shape: f32[128,1], index: 6, kind: input, shape index: {}]   ;;  %s7280_s7 = inlined_call_operand.vmem [shape: bf16[128,128], index: 7, kind: input, shape index: {}]   ;;  %s7281_s8 = inlined_call_operand.vmem [shape: f32[128,1], index: 8, kind: input, shape index: {}]   ;;  %s7282_s9 = inlined_call_operand.vmem [shape: bf16[32,128], index: 9, kind: input, shape index: {}]   ;;  %s7283_s10 = inlined_call_operand.vmem [shape: f32[32,1], index: 10, kind: input, shape index: {}]   ;;  %s7284_s11 = inlined_call_operand.vmem [shape: f32[32,1], index: 11, kind: input, shape index: {}]   ;;  %s7285_s12 = inlined_call_operand.<no memory space> [shape: f32[1,1], index: 12, kind: input, shape index: {}]   ;;  %s7286_s13 = inlined_call_operand.vmem [shape: f32[1,384], index: 13, kind: output, shape index: {}]  }
   0x1   :  { %v18_v0 = vstv %s7285_s12 }
   0x2   :  { %19 = vst [vmem:[#allocation2] sm:$0x1] %v18_v0 }
   0x3 LB: > { %s5586_s28 = sadd.s32 4294967295, %s5504_s27   ;;  %p4418_p0 = scmp.ge.s32.totalorder %s5504_s27, 1  ;;  %s5504_s27 = sphi %s5580_s27, %s25_s27  }
   0x4   : > { %p390_p1 = scmp.lt.s32.totalorder %s5504_s27, 4 }
   0x6   : > { %p391_p2 = pnand %p4418_p0, %p390_p1 }
   0x8   : > { %394 = sbr.rel (%p391_p2) target bundleno = 1772 (0x6ec), region = 72 }
   0xf   : > { %v524_v1 = vld [vmem:[%s7275_s2 + $0x10] sm:$0xff]  ;;  %v522_v2 = vld [vmem:[%s7275_s2] sm:$0xff]  ;;  %s4419_s15 = sshll.u32 %s5586_s28, 4  ;;  %v7287_v3 = vmov 0   ;;  %v525_v4 = vld [vmem:[%s7275_s2 + $0x18] sm:$0xff]  ;;  %vm1106_vm0 = vcmask 261120  }
  0x10   : > { %5207 = vset.pattern.permute.xlu1 %v7287_v3  ;;  %5206 = vset.pattern.permute.xlu0 %v7287_v3  ;;  %p433_p3 = scmp.lt.s32.totalorder %s4419_s15, 47  ;;  %v523_v5 = vld [vmem:[%s7275_s2 + $0x8] sm:$0xff]  ;;  %v526_v7 = vld [vmem:[%s7275_s2 + $0x20] sm:$0xff]  ;;  %v529_v11 = vld [vmem:[%s7275_s2 + $0x38] sm:$0xff]  ;;  %p438_p4 = scmp.lt.s32.totalorder %s5586_s28, 2 }
  0x11   : > { %598 = vperm.xlu1 %5207, %v524_v1   ;;  %588 = vperm.xlu0 %5206, %v522_v2   ;;  %v527_v6 = vld [vmem:[%s7275_s2 + $0x28] sm:$0xff]  ;;  %v528_v12 = vld [vmem:[%s7275_s2 + $0x30] sm:$0xff]  ;;  %v530_v14 = vld [vmem:[%s7275_s2 + $0x40] sm:$0xff] }
  0x12   : > { %s7301_s15 = smov (!%p433_p3, %s4419_s15), 47  ;;  %4991 = vmatprep.subr.bf16.mxu1 %v7287_v3  ;;  %v531_v13 = vld [vmem:[%s7275_s2 + $0x48] sm:$0xff]  ;;  %v533_v17 = vld [vmem:[%s7275_s2 + $0x58] sm:$0xff]  ;;  %v532_v18 = vld [vmem:[%s7275_s2 + $0x50] sm:$0xff]  ;;  %s7303_s28 = smov (!%p438_p4, %s5586_s28), 2 }
  0x13   : > { %s4420_s20 = sshll.u32 %s7301_s15, 2  ;;  %v5216_v19 = vld [vmem:[%s7274_s1] sm:$0xff]   ;;  %v535_v20 = vld [vmem:[%s7275_s2 + $0x68] sm:$0xff]  ;;  %v537_v24 = vld [vmem:[%s7275_s2 + $0x78] sm:$0xff]  ;;  %s440_s24 = scalar_lea.vmem %s7286_s13, %s7303_s28 }
  0x14   : > { %s5615_s29 = scalar_lea.vmem %s7273_s0, %s4420_s20  ;;  %v534_v21 = vld [vmem:[%s7275_s2 + $0x60] sm:$0xff]  ;;  %4875 = vmatprep.mubr.msk.bf16.mxu0 %vm1106_vm0, %v5216_v19  ;;  %v536_v25 = vld [vmem:[%s7275_s2 + $0x70] sm:$0xff]  ;;  %v539_v26 = vld [vmem:[%s7275_s2 + $0x88] sm:$0xff] }
  0x15   : > { %603 = vperm.xlu1 %5207, %v525_v4   ;;  %593 = vperm.xlu0 %5206, %v523_v5   ;;  %v5208_v8 = vld [vmem:[%s5615_s29] sm:$0xff]   ;;  %v5209_v9 = vld [vmem:[%s5615_s29 + $0x8] sm:$0xff]   ;;  %v5210_v16 = vld [vmem:[%s5615_s29 + $0x10] sm:$0xff]  }
  0x16   : > { %5189 = vmatprep.subr.msk.bf16.mxu0 %vm1106_vm0, %v5208_v8  ;;  %v1204_v10 = vsel %vm1106_vm0, %v5208_v8, 0  ;;  %v1207_v15 = vsel %vm1106_vm0, %v5209_v9, 0  ;;  %v1210_v22 = vsel %vm1106_vm0, %v5210_v16, 0  ;;  %v5211_v23 = vld [vmem:[%s5615_s29 + $0x18] sm:$0xff]   ;;  %v538_v27 = vld [vmem:[%s7275_s2 + $0x80] sm:$0xff]  ;;  %v540_v31 = vld [vmem:[%s7275_s2 + $0x90] sm:$0xff] }
  0x17   : > { %4860 = vmatpush3.bf16.xpose.msra.mxu0 %v1204_v10  ;;  %v1213_v28 = vsel %vm1106_vm0, %v5211_v23, 0  ;;  %v5212_v29 = vld [vmem:[%s5615_s29 + $0x20] sm:$0xff]   ;;  %v541_v30 = vld [vmem:[%s7275_s2 + $0x98] sm:$0xff]  ;;  %v543_v32 = vld [vmem:[%s7275_s2 + $0xa8] sm:$0xff] }
  0x18   : > { %5190 = vmatprep.subr.msk.bf16.mxu0 %vm1106_vm0, %v5209_v9  ;;  %v542_v33 = vld [vmem:[%s7275_s2 + $0xa0] sm:$0xff]  ;;  %v1216_v34 = vsel %vm1106_vm0, %v5212_v29, 0  ;;  %v5213_v35 = vld [vmem:[%s5615_s29 + $0x28] sm:$0xff]   ;;  %v545_v36 = vld [vmem:[%s7275_s2 + $0xb8] sm:$0xff] }
  0x19   : > { %613 = vperm.xlu1 %5207, %v527_v6   ;;  %608 = vperm.xlu0 %5206, %v526_v7   ;;  %v544_v37 = vld [vmem:[%s7275_s2 + $0xb0] sm:$0xff]  ;;  %v547_v38 = vld [vmem:[%s7275_s2 + $0xc8] sm:$0xff]  ;;  %v546_v39 = vld [vmem:[%s7275_s2 + $0xc0] sm:$0xff]  ;;  %v1219_v40 = vsel %vm1106_vm0, %v5213_v35, 0 }
  0x1a   : > { %v5214_v41 = vld [vmem:[%s5615_s29 + $0x30] sm:$0xff]   ;;  %v549_v42 = vld [vmem:[%s7275_s2 + $0xd8] sm:$0xff]  ;;  %v551_v44 = vld [vmem:[%s7275_s2 + $0xe8] sm:$0xff] }
  0x1b   : > { %v548_v43 = vld [vmem:[%s7275_s2 + $0xd0] sm:$0xff]  ;;  %v550_v45 = vld [vmem:[%s7275_s2 + $0xe0] sm:$0xff]  ;;  %v1222_v46 = vsel %vm1106_vm0, %v5214_v41, 0  ;;  %v5215_v47 = vld [vmem:[%s5615_s29 + $0x38] sm:$0xff]  }
  0x1c   : > { %v553_v48 = vld [vmem:[%s7275_s2 + $0xf8] sm:$0xff]  ;;  %v552_v49 = vld [vmem:[%s7275_s2 + $0xf0] sm:$0xff]  ;;  %v555_v50 = vld [vmem:[%s7275_s2 + $0x108] sm:$0xff]  ;;  %v1225_v52 = vsel %vm1106_vm0, %v5215_v47, 0 }
  0x1d   : > { %623 = vperm.xlu1 %5207, %v529_v11   ;;  %618 = vperm.xlu0 %5206, %v528_v12   ;;  %v554_v51 = vld [vmem:[%s7275_s2 + $0x100] sm:$0xff]  ;;  %v557_v53 = vld [vmem:[%s7275_s2 + $0x118] sm:$0xff]  ;;  %v556_v54 = vld [vmem:[%s7275_s2 + $0x110] sm:$0xff] }
  0x1e   : > { %v559_v55 = vld [vmem:[%s7275_s2 + $0x128] sm:$0xff]  ;;  %v558_v56 = vld [vmem:[%s7275_s2 + $0x120] sm:$0xff]  ;;  %v5218_v58 = vld [vmem:[%s7274_s1 + $0x10] sm:$0xff]  }
  0x1f   : > { %4862 = vmatpush3.bf16.xpose.msra.mxu0 %v1207_v15  ;;  %v5217_v57 = vld [vmem:[%s7274_s1 + $0x8] sm:$0xff]   ;;  %v561_v59 = vld [vmem:[%s7275_s2 + $0x138] sm:$0xff]  ;;  %v560_v60 = vld [vmem:[%s7275_s2 + $0x130] sm:$0xff] }
  0x20   : > { %5191 = vmatprep.subr.msk.bf16.mxu0 %vm1106_vm0, %v5210_v16  ;;  %v563_v61 = vld [vmem:[%s7275_s2 + $0x148] sm:$0xff]  ;;  %v562_v62 = vld [vmem:[%s7275_s2 + $0x140] sm:$0xff]  ;;  %v5219_v63 = vld [vmem:[%s7274_s1 + $0x18] sm:$0xff]  }
  0x21   : > { %633 = vperm.xlu1 %5207, %v531_v13   ;;  %628 = vperm.xlu0 %5206, %v530_v14   ;;  %v5220_v0 = vld [vmem:[%s7274_s1 + $0x20] sm:$0xff]   ;;  %v565_v1 = vld [vmem:[%s7275_s2 + $0x158] sm:$0xff]  ;;  %v564_v2 = vld [vmem:[%s7275_s2 + $0x150] sm:$0xff] }
  0x22   : > { %v567_v4 = vld [vmem:[%s7275_s2 + $0x168] sm:$0xff]  ;;  %v566_v5 = vld [vmem:[%s7275_s2 + $0x160] sm:$0xff]  ;;  %v5222_v7 = vld [vmem:[%s7274_s1 + $0x30] sm:$0xff]  }
  0x23   : > { %v5221_v6 = vld [vmem:[%s7274_s1 + $0x28] sm:$0xff]   ;;  %v569_v8 = vld [vmem:[%s7275_s2 + $0x178] sm:$0xff]  ;;  %v568_v9 = vld [vmem:[%s7275_s2 + $0x170] sm:$0xff] }
  0x24   : > { %v571_v10 = vld [vmem:[%s7275_s2 + $0x188] sm:$0xff]  ;;  %v570_v11 = vld [vmem:[%s7275_s2 + $0x180] sm:$0xff]  ;;  %v5223_v12 = vld [vmem:[%s7274_s1 + $0x38] sm:$0xff]  }
  0x25   : > { %643 = vperm.xlu1 %5207, %v533_v17   ;;  %638 = vperm.xlu0 %5206, %v532_v18   ;;  %v5224_v13 = vld [vmem:[%s7274_s1 + $0x40] sm:$0xff]   ;;  %v573_v14 = vld [vmem:[%s7275_s2 + $0x198] sm:$0xff]  ;;  %v572_v15 = vld [vmem:[%s7275_s2 + $0x190] sm:$0xff] }
  0x26   : > { %v575_v16 = vld [vmem:[%s7275_s2 + $0x1a8] sm:$0xff]  ;;  %v574_v17 = vld [vmem:[%s7275_s2 + $0x1a0] sm:$0xff]  ;;  %v5226_v19 = vld [vmem:[%s7274_s1 + $0x50] sm:$0xff]  }
  0x27   : > { %4864 = vmatpush3.bf16.xpose.msra.mxu0 %v1210_v22  ;;  %v5225_v18 = vld [vmem:[%s7274_s1 + $0x48] sm:$0xff]  }
  0x28   : > { %5192 = vmatprep.subr.msk.bf16.mxu0 %vm1106_vm0, %v5211_v23  ;;  %v579_v22 = vld [vmem:[%s7275_s2 + $0x1c8] sm:$0xff]  ;;  %v578_v23 = vld [vmem:[%s7275_s2 + $0x1c0] sm:$0xff] }
  0x29   : > { %653 = vperm.xlu1 %5207, %v535_v20   ;;  %648 = vperm.xlu0 %5206, %v534_v21   ;;  %v577_v20 = vld [vmem:[%s7275_s2 + $0x1b8] sm:$0xff]  ;;  %v576_v21 = vld [vmem:[%s7275_s2 + $0x1b0] sm:$0xff] }
  0x2d   : > { %663 = vperm.xlu1 %5207, %v537_v24   ;;  %658 = vperm.xlu0 %5206, %v536_v25   ;;  %v5227_v24 = vld [vmem:[%s7274_s1 + $0x58] sm:$0xff]   ;;  %v5228_v25 = vld [vmem:[%s7274_s1 + $0x60] sm:$0xff]  }
  0x2f   : > { %4866 = vmatpush3.bf16.xpose.msra.mxu0 %v1213_v28  ;;  %v583_v28 = vld [vmem:[%s7275_s2 + $0x1e8] sm:$0xff] }
  0x30   : > { %5193 = vmatprep.subr.msk.bf16.mxu0 %vm1106_vm0, %v5212_v29  ;;  %v582_v29 = vld [vmem:[%s7275_s2 + $0x1e0] sm:$0xff] }
  0x31   : > { %673 = vperm.xlu1 %5207, %v539_v26   ;;  %668 = vperm.xlu0 %5206, %v538_v27   ;;  %v581_v26 = vld [vmem:[%s7275_s2 + $0x1d8] sm:$0xff]  ;;  %v580_v27 = vld [vmem:[%s7275_s2 + $0x1d0] sm:$0xff] }
  0x35   : > { %683 = vperm.xlu1 %5207, %v541_v30   ;;  %678 = vperm.xlu0 %5206, %v540_v31   ;;  %v5229_v30 = vld [vmem:[%s7274_s1 + $0x68] sm:$0xff]   ;;  %v5230_v31 = vld [vmem:[%s7274_s1 + $0x70] sm:$0xff]  }
  0x37   : > { %4868 = vmatpush3.bf16.xpose.msra.mxu0 %v1216_v34  ;;  %v1757_v34 = vld [vmem:[%s7277_s4 + $0x88] sm:$0xff] }
  0x38   : > { %5194 = vmatprep.subr.msk.bf16.mxu0 %vm1106_vm0, %v5213_v35  ;;  %v1756_v35 = vld [vmem:[%s7277_s4 + $0x80] sm:$0xff] }
  0x39   : > { %693 = vperm.xlu1 %5207, %v543_v32   ;;  %688 = vperm.xlu0 %5206, %v542_v33   ;;  %v585_v32 = vld [vmem:[%s7275_s2 + $0x1f8] sm:$0xff]  ;;  %v584_v33 = vld [vmem:[%s7275_s2 + $0x1f0] sm:$0xff] }
  0x3d   : > { %703 = vperm.xlu1 %5207, %v545_v36   ;;  %698 = vperm.xlu0 %5206, %v544_v37   ;;  %v5231_v36 = vld [vmem:[%s7274_s1 + $0x78] sm:$0xff]   ;;  %v5232_v37 = vld [vmem:[%s7274_s1 + $0x80] sm:$0xff]  }
  0x3f   : > { %4870 = vmatpush3.bf16.xpose.msra.mxu0 %v1219_v40 }
  0x40   : > { %5195 = vmatprep.subr.msk.bf16.mxu0 %vm1106_vm0, %v5214_v41  ;;  %v1740_v41 = vld [vmem:[%s7277_s4] sm:$0xff] }
  0x41   : > { %713 = vperm.xlu1 %5207, %v547_v38   ;;  %708 = vperm.xlu0 %5206, %v546_v39   ;;  %v1741_v39 = vld [vmem:[%s7277_s4 + $0x8] sm:$0xff] }
  0x45   : > { %723 = vperm.xlu1 %5207, %v549_v42   ;;  %718 = vperm.xlu0 %5206, %v548_v43   ;;  %v1759_v42 = vld [vmem:[%s7277_s4 + $0x98] sm:$0xff]  ;;  %v1758_v43 = vld [vmem:[%s7277_s4 + $0x90] sm:$0xff] }
  0x47   : > { %4872 = vmatpush3.bf16.xpose.msra.mxu0 %v1222_v46  ;;  %v5234_v46 = vld [vmem:[%s7274_s1 + $0x90] sm:$0xff]  }
  0x48   : > { %5196 = vmatprep.subr.msk.bf16.mxu0 %vm1106_vm0, %v5215_v47 }
  0x49   : > { %733 = vperm.xlu1 %5207, %v551_v44   ;;  %728 = vperm.xlu0 %5206, %v550_v45   ;;  %v5233_v44 = vld [vmem:[%s7274_s1 + $0x88] sm:$0xff]  }
  0x4d   : > { %743 = vperm.xlu1 %5207, %v553_v48   ;;  %738 = vperm.xlu0 %5206, %v552_v49   ;;  %v1743_v48 = vld [vmem:[%s7277_s4 + $0x18] sm:$0xff]  ;;  %v1742_v49 = vld [vmem:[%s7277_s4 + $0x10] sm:$0xff] }
  0x4f   : > { %4874 = vmatpush3.bf16.xpose.msra.mxu0 %v1225_v52  ;;  %v1760_v52 = vld [vmem:[%s7277_s4 + $0xa0] sm:$0xff] }
  0x50   : > { %2764 = vmatprep.subr.bf16.mxu0 %v7287_v3 }
  0x51   : > { %753 = vperm.xlu1 %5207, %v555_v50   ;;  %748 = vperm.xlu0 %5206, %v554_v51   ;;  %v1761_v51 = vld [vmem:[%s7277_s4 + $0xa8] sm:$0xff] }
  0x55   : > { %763 = vperm.xlu1 %5207, %v557_v53   ;;  %758 = vperm.xlu0 %5206, %v556_v54   ;;  %v5235_v53 = vld [vmem:[%s7274_s1 + $0x98] sm:$0xff]  }
  0x56   : > { %4876 = vmatmul.mubr.msk.bf16.vlgmr.msra.gmra.mrb[0].mxu0 %vm1106_vm0, %v5217_v57  ;;  %v1745_v57 = vld [vmem:[%s7277_s4 + $0x28] sm:$0xff] }
  0x57   : > { %4879 = vmatprep.mubr.msk.bf16.mxu0 %vm1106_vm0, %v5218_v58  ;;  %v1744_v58 = vld [vmem:[%s7277_s4 + $0x20] sm:$0xff] }
  0x59   : > { %773 = vperm.xlu1 %5207, %v559_v55   ;;  %768 = vperm.xlu0 %5206, %v558_v56   ;;  %v5236_v55 = vld [vmem:[%s7274_s1 + $0xa0] sm:$0xff]  }
  0x5d   : > { %783 = vperm.xlu1 %5207, %v561_v59   ;;  %778 = vperm.xlu0 %5206, %v560_v60   ;;  %v1763_v60 = vld [vmem:[%s7277_s4 + $0xb8] sm:$0xff] }
  0x5e   : > { %4880 = vmatmul.mubr.msk.bf16.gmra.mrb[4].mxu0 %vm1106_vm0, %v5219_v63 }
  0x5f   : > { %4883 = vmatprep.mubr.msk.bf16.mxu0 %vm1106_vm0, %v5220_v0  ;;  %v5238_v0 = vld [vmem:[%s7274_s1 + $0xb0] sm:$0xff]  }
  0x61   : > { %793 = vperm.xlu1 %5207, %v563_v61   ;;  %788 = vperm.xlu0 %5206, %v562_v62   ;;  %v1762_v61 = vld [vmem:[%s7277_s4 + $0xb0] sm:$0xff]  ;;  %v5237_v62 = vld [vmem:[%s7274_s1 + $0xa8] sm:$0xff]  }
  0x65   : > { %803 = vperm.xlu1 %5207, %v565_v1   ;;  %798 = vperm.xlu0 %5206, %v564_v2   ;;  %v1747_v2 = vld [vmem:[%s7277_s4 + $0x38] sm:$0xff] }
  0x66   : > { %4884 = vmatmul.mubr.msk.bf16.gmra.mrb[8].mxu0 %vm1106_vm0, %v5221_v6  ;;  %v1765_v6 = vld [vmem:[%s7277_s4 + $0xc8] sm:$0xff] }
  0x67   : > { %4887 = vmatprep.mubr.msk.bf16.mxu0 %vm1106_vm0, %v5222_v7  ;;  %v1764_v7 = vld [vmem:[%s7277_s4 + $0xc0] sm:$0xff] }
  0x69   : > { %813 = vperm.xlu1 %5207, %v567_v4   ;;  %808 = vperm.xlu0 %5206, %v566_v5   ;;  %v1746_v4 = vld [vmem:[%s7277_s4 + $0x30] sm:$0xff] }
  0x6d   : > { %823 = vperm.xlu1 %5207, %v569_v8   ;;  %818 = vperm.xlu0 %5206, %v568_v9   ;;  %v5239_v8 = vld [vmem:[%s7274_s1 + $0xb8] sm:$0xff]  }
  0x6e   : > { %4888 = vmatmul.mubr.msk.bf16.gmra.mrb[12].mxu0 %vm1106_vm0, %v5223_v12  ;;  %v1748_v12 = vld [vmem:[%s7277_s4 + $0x40] sm:$0xff] }
  0x6f   : > { %4891 = vmatprep.mubr.msk.bf16.mxu0 %vm1106_vm0, %v5224_v13 }
  0x71   : > { %833 = vperm.xlu1 %5207, %v571_v10   ;;  %828 = vperm.xlu0 %5206, %v570_v11   ;;  %v5240_v10 = vld [vmem:[%s7274_s1 + $0xc0] sm:$0xff]   ;;  %v1749_v11 = vld [vmem:[%s7277_s4 + $0x48] sm:$0xff] }
  0x75   : > { %843 = vperm.xlu1 %5207, %v573_v14   ;;  %838 = vperm.xlu0 %5206, %v572_v15   ;;  %v1751_v15 = vld [vmem:[%s7277_s4 + $0x58] sm:$0xff] }
  0x76   : > { %4892 = vmatmul.mubr.msk.bf16.gmra.mrb[16].mxu0 %vm1106_vm0, %v5225_v18  ;;  %v5242_v18 = vld [vmem:[%s7274_s1 + $0xd0] sm:$0xff]  }
  0x77   : > { %4895 = vmatprep.mubr.msk.bf16.mxu0 %vm1106_vm0, %v5226_v19 }
  0x79   : > { %853 = vperm.xlu1 %5207, %v575_v16   ;;  %848 = vperm.xlu0 %5206, %v574_v17   ;;  %v1750_v16 = vld [vmem:[%s7277_s4 + $0x50] sm:$0xff]  ;;  %v5241_v17 = vld [vmem:[%s7274_s1 + $0xc8] sm:$0xff]  }
  0x7d   : > { %863 = vperm.xlu1 %5207, %v577_v20   ;;  %858 = vperm.xlu0 %5206, %v576_v21   ;;  %v1767_v20 = vld [vmem:[%s7277_s4 + $0xd8] sm:$0xff]  ;;  %v1766_v21 = vld [vmem:[%s7277_s4 + $0xd0] sm:$0xff] }
  0x7e   : > { %4896 = vmatmul.mubr.msk.bf16.gmra.mrb[20].mxu0 %vm1106_vm0, %v5227_v24  ;;  %v1752_v24 = vld [vmem:[%s7277_s4 + $0x60] sm:$0xff] }
  0x7f   : > { %4899 = vmatprep.mubr.msk.bf16.mxu0 %vm1106_vm0, %v5228_v25  ;;  %v5243_v25 = vld [vmem:[%s7274_s1 + $0xd8] sm:$0xff]  }
  0x81   : > { %873 = vperm.xlu1 %5207, %v579_v22   ;;  %868 = vperm.xlu0 %5206, %v578_v23   ;;  %v1753_v23 = vld [vmem:[%s7277_s4 + $0x68] sm:$0xff] }
  0x85   : > { %883 = vperm.xlu1 %5207, %v581_v26   ;;  %878 = vperm.xlu0 %5206, %v580_v27   ;;  %v5244_v27 = vld [vmem:[%s7274_s1 + $0xe0] sm:$0xff]  }
  0x86   : > { %4900 = vmatmul.mubr.msk.bf16.gmra.mrb[24].mxu0 %vm1106_vm0, %v5229_v30  ;;  %v1768_v30 = vld [vmem:[%s7277_s4 + $0xe0] sm:$0xff] }
  0x87   : > { %4903 = vmatprep.mubr.msk.bf16.mxu0 %vm1106_vm0, %v5230_v31 }
  0x89   : > { %893 = vperm.xlu1 %5207, %v583_v28   ;;  %888 = vperm.xlu0 %5206, %v582_v29   ;;  %v1769_v29 = vld [vmem:[%s7277_s4 + $0xe8] sm:$0xff] }
  0x8d   : > { %903 = vperm.xlu1 %5207, %v585_v32   ;;  %898 = vperm.xlu0 %5206, %v584_v33   ;;  %v1755_v32 = vld [vmem:[%s7277_s4 + $0x78] sm:$0xff]  ;;  %v1754_v33 = vld [vmem:[%s7277_s4 + $0x70] sm:$0xff] }
  0x8e   : > { %4904 = vmatmul.mubr.msk.bf16.gmra.mrb[28].mxu0 %vm1106_vm0, %v5231_v36  ;;  %v5246_v36 = vld [vmem:[%s7274_s1 + $0xf0] sm:$0xff]  }
  0x8f   : > { %4907 = vmatprep.mubr.msk.bf16.mxu0 %vm1106_vm0, %v5232_v37  ;;  %v1771_v37 = vld [vmem:[%s7277_s4 + $0xf8] sm:$0xff] }
  0x90   : > { %v5888_v38 = vpop.permute.xlu0 %588  ;;  %v5893_v40 = vpop.permute.xlu1 %598 }
  0x91   : > { %1891 = vperm.xlu1 %5207, %v1757_v34   ;;  %1886 = vperm.xlu0 %5206, %v1756_v35   ;;  %v5245_v34 = vld [vmem:[%s7274_s1 + $0xe8] sm:$0xff]  }
  0x94   : > { %v5909_v45 = vpop.permute.xlu0 %593  ;;  %v5914_v47 = vpop.permute.xlu1 %603 }
  0x95   : > { %1811 = vperm.xlu1 %5207, %v1741_v39   ;;  %1806 = vperm.xlu0 %5206, %v1740_v41   ;;  %v1770_v39 = vld [vmem:[%s7277_s4 + $0xf0] sm:$0xff] }
  0x96   : > { %4908 = vmatmul.mubr.msk.bf16.gmra.mrb[32].mxu0 %vm1106_vm0, %v5233_v44  ;;  %v1788_v44 = vld [vmem:[%s7277_s4 + $0x180] sm:$0xff] }
  0x97   : > { %4911 = vmatprep.mubr.msk.bf16.mxu0 %vm1106_vm0, %v5234_v46  ;;  %v5247_v46 = vld [vmem:[%s7274_s1 + $0xf8] sm:$0xff]  }
  0x98   : > { %v5923_v50 = vpop.permute.xlu0 %608  ;;  %v5935_v54 = vpop.permute.xlu1 %613 }
  0x99   : > { %1901 = vperm.xlu1 %5207, %v1759_v42   ;;  %1896 = vperm.xlu0 %5206, %v1758_v43   ;;  %v1789_v43 = vld [vmem:[%s7277_s4 + $0x188] sm:$0xff] }
  0x9c   : > { %v5940_v56 = vpop.permute.xlu0 %618  ;;  %v5949_v59 = vpop.permute.xlu1 %623 }
  0x9d   : > { %1821 = vperm.xlu1 %5207, %v1743_v48   ;;  %1816 = vperm.xlu0 %5206, %v1742_v49   ;;  %v1773_v49 = vld [vmem:[%s7277_s4 + $0x108] sm:$0xff] }
  0x9e   : > { %4912 = vmatmul.mubr.msk.bf16.gmra.mrb[36].mxu0 %vm1106_vm0, %v5235_v53  ;;  %v1791_v53 = vld [vmem:[%s7277_s4 + $0x198] sm:$0xff] }
  0x9f   : > { %4915 = vmatprep.mubr.msk.bf16.mxu0 %vm1106_vm0, %v5236_v55  ;;  %v1790_v55 = vld [vmem:[%s7277_s4 + $0x190] sm:$0xff] }
  0xa0   : > { %v5961_v63 = vpop.permute.xlu0 %628  ;;  %v5966_v1 = vpop.permute.xlu1 %633 }
  0xa1   : > { %1911 = vperm.xlu1 %5207, %v1761_v51   ;;  %1906 = vperm.xlu0 %5206, %v1760_v52   ;;  %v1772_v51 = vld [vmem:[%s7277_s4 + $0x100] sm:$0xff] }
  0xa4   : > { %v5976_v5 = vpop.permute.xlu0 %638  ;;  %v5987_v9 = vpop.permute.xlu1 %643 }
  0xa5   : > { %1831 = vperm.xlu1 %5207, %v1745_v57   ;;  %1826 = vperm.xlu0 %5206, %v1744_v58  }
  0xa6   : > { %4916 = vmatmul.mubr.msk.bf16.gmra.mrb[40].mxu0 %vm1106_vm0, %v5237_v62 }
  0xa7   : > { %4919 = vmatprep.mubr.msk.bf16.mxu0 %vm1106_vm0, %v5238_v0  ;;  %v1793_v0 = vld [vmem:[%s7277_s4 + $0x1a8] sm:$0xff] }
  0xa8   : > { %v5999_v13 = vpop.permute.xlu0 %648  ;;  %v6002_v14 = vpop.permute.xlu1 %653 }
  0xa9   : > { %1921 = vperm.xlu1 %5207, %v1763_v60   ;;  %1916 = vperm.xlu0 %5206, %v1762_v61   ;;  %v1775_v60 = vld [vmem:[%s7277_s4 + $0x118] sm:$0xff]  ;;  %v1774_v61 = vld [vmem:[%s7277_s4 + $0x110] sm:$0xff] }
  0xac   : > { %v6016_v19 = vpop.permute.xlu0 %658  ;;  %v6025_v22 = vpop.permute.xlu1 %663 }
  0xad   : > { %1841 = vperm.xlu1 %5207, %v1747_v2   ;;  %1836 = vperm.xlu0 %5206, %v1746_v4   ;;  %v1792_v2 = vld [vmem:[%s7277_s4 + $0x1a0] sm:$0xff] }
  0xae   : > { %4920 = vmatmul.mubr.msk.bf16.gmra.mrb[44].mxu0 %vm1106_vm0, %v5239_v8 }
  0xaf   : > { %4923 = vmatprep.mubr.msk.bf16.mxu0 %vm1106_vm0, %v5240_v10 }
  0xb0   : > { %v6037_v26 = vpop.permute.xlu0 %668  ;;  %v6042_v28 = vpop.permute.xlu1 %673 }
  0xb1   : > { %1931 = vperm.xlu1 %5207, %v1765_v6   ;;  %1926 = vperm.xlu0 %5206, %v1764_v7   ;;  %v1777_v6 = vld [vmem:[%s7277_s4 + $0x128] sm:$0xff]  ;;  %v1776_v7 = vld [vmem:[%s7277_s4 + $0x120] sm:$0xff] }
  0xb4   : > { %v6052_v31 = vpop.permute.xlu0 %678  ;;  %v6063_v35 = vpop.permute.xlu1 %683 }
  0xb5   : > { %1851 = vperm.xlu1 %5207, %v1749_v11   ;;  %1846 = vperm.xlu0 %5206, %v1748_v12   ;;  %v1795_v11 = vld [vmem:[%s7277_s4 + $0x1b8] sm:$0xff]  ;;  %v1794_v12 = vld [vmem:[%s7277_s4 + $0x1b0] sm:$0xff] }
  0xb6   : > { %4924 = vmatmul.mubr.msk.bf16.gmra.mrb[48].mxu0 %vm1106_vm0, %v5241_v17  ;;  %v1778_v17 = vld [vmem:[%s7277_s4 + $0x130] sm:$0xff] }
  0xb7   : > { %4927 = vmatprep.mubr.msk.bf16.mxu0 %vm1106_vm0, %v5242_v18 }
  0xb8   : > { %v6075_v41 = vpop.permute.xlu0 %688  ;;  %v6078_v42 = vpop.permute.xlu1 %693 }
  0xb9   : > { %1861 = vperm.xlu1 %5207, %v1751_v15   ;;  %1856 = vperm.xlu0 %5206, %v1750_v16   ;;  %v1779_v16 = vld [vmem:[%s7277_s4 + $0x138] sm:$0xff] }
  0xbc   : > { %v6089_v48 = vpop.permute.xlu0 %698  ;;  %v6098_v52 = vpop.permute.xlu1 %703 }
  0xbd   : > { %1941 = vperm.xlu1 %5207, %v1767_v20   ;;  %1936 = vperm.xlu0 %5206, %v1766_v21   ;;  %v1797_v20 = vld [vmem:[%s7277_s4 + $0x1c8] sm:$0xff]  ;;  %v1796_v21 = vld [vmem:[%s7277_s4 + $0x1c0] sm:$0xff] }
  0xbe   : > { %4928 = vmatmul.mubr.msk.bf16.gmra.mrb[52].mxu0 %vm1106_vm0, %v5243_v25  ;;  %v1781_v25 = vld [vmem:[%s7277_s4 + $0x148] sm:$0xff] }
  0xbf   : > { %4931 = vmatprep.mubr.msk.bf16.mxu0 %vm1106_vm0, %v5244_v27  ;;  %v1780_v27 = vld [vmem:[%s7277_s4 + $0x140] sm:$0xff] }
  0xc0   : > { %v6106_v57 = vpop.permute.xlu0 %708  ;;  %v6108_v58 = vpop.permute.xlu1 %713 }
  0xc1   : > { %1871 = vperm.xlu1 %5207, %v1753_v23   ;;  %1866 = vperm.xlu0 %5206, %v1752_v24  }
  0xc4   : > { %v6116_v62 = vpop.permute.xlu0 %718  ;;  %v6124_v4 = vpop.permute.xlu1 %723 }
  0xc5   : > { %1951 = vperm.xlu1 %5207, %v1769_v29   ;;  %1946 = vperm.xlu0 %5206, %v1768_v30   ;;  %v5250_v29 = vld [vmem:[%s7276_s3 + $0x1a4] ss:$16 sps:$4 sm:$0xff]  }
  0xc6   : > { %4932 = vmatmul.mubr.msk.bf16.gmra.mrb[56].mxu0 %vm1106_vm0, %v5245_v34  ;;  %v5253_v30 = vld [vmem:[%s7276_s3 + $0x4] ss:$16 sps:$4 sm:$0xff]   ;;  %2900 = vmatprep.mubr.bf16.mxu1 %v5250_v29 }
  0xc7   : > { %4935 = vmatprep.mubr.msk.bf16.mxu0 %vm1106_vm0, %v5246_v36  ;;  %v1798_v34 = vld [vmem:[%s7277_s4 + $0x1d0] sm:$0xff] }
  0xc8   : > { %v6132_v8 = vpop.permute.xlu0 %728  ;;  %v6134_v10 = vpop.permute.xlu1 %733 }
  0xc9   : > { %1881 = vperm.xlu1 %5207, %v1755_v32   ;;  %1876 = vperm.xlu0 %5206, %v1754_v33   ;;  %v1799_v33 = vld [vmem:[%s7277_s4 + $0x1d8] sm:$0xff] }
  0xcc   : > { %v6142_v15 = vpop.permute.xlu0 %738  ;;  %v6150_v18 = vpop.permute.xlu1 %743 }
  0xcd   : > { %1961 = vperm.xlu1 %5207, %v1771_v37   ;;  %1956 = vperm.xlu0 %5206, %v1770_v39   ;;  %v1783_v37 = vld [vmem:[%s7277_s4 + $0x158] sm:$0xff]  ;;  %v1782_v39 = vld [vmem:[%s7277_s4 + $0x150] sm:$0xff] }
  0xce   : > { %4936 = vmatmul.mubr.msk.bf16.gmra.mrb[60].mxu0 %vm1106_vm0, %v5247_v46  ;;  %v1801_v46 = vld [vmem:[%s7277_s4 + $0x1e8] sm:$0xff] }
  0xcf   : > { %2796 = vmatprep.mubr.bf16.mxu0 %v5253_v30  ;;  %v3475_v30 = vld [vmem:[%s7279_s6 + $0x28] sm:$0xff] }
  0xd0   : > { %v6158_v23 = vpop.permute.xlu0 %748  ;;  %v6160_v24 = vpop.permute.xlu1 %753 }
  0xd1   : > { %2051 = vperm.xlu1 %5207, %v1789_v43   ;;  %2046 = vperm.xlu0 %5206, %v1788_v44  }
  0xd4   : > { %v6174_v32 = vpop.permute.xlu0 %758  ;;  %v6182_v36 = vpop.permute.xlu1 %763 }
  0xd5   : > { %1971 = vperm.xlu1 %5207, %v1773_v49   ;;  %1966 = vperm.xlu0 %5206, %v1772_v51   ;;  %v1800_v49 = vld [vmem:[%s7277_s4 + $0x1e0] sm:$0xff] }
  0xd8   : > { %v6190_v43 = vpop.permute.xlu0 %768  ;;  %v6192_v44 = vpop.permute.xlu1 %773 }
  0xd9   : > { %2061 = vperm.xlu1 %5207, %v1791_v53   ;;  %2056 = vperm.xlu0 %5206, %v1790_v55   ;;  %v1785_v53 = vld [vmem:[%s7277_s4 + $0x168] sm:$0xff]  ;;  %v1784_v55 = vld [vmem:[%s7277_s4 + $0x160] sm:$0xff] }
  0xdc   : > { %v6200_v51 = vpop.permute.xlu0 %778 }
  0xdd   : > { %1981 = vperm.xlu1 %5207, %v1775_v60   ;;  %1976 = vperm.xlu0 %5206, %v1774_v61   ;;  %v6208_v60 = vpop.permute.xlu1 %783  ;;  %v1803_v61 = vld [vmem:[%s7277_s4 + $0x1f8] sm:$0xff] }
  0xe1   : > { %2071 = vperm.xlu1 %5207, %v1793_v0   ;;  %2066 = vperm.xlu0 %5206, %v1792_v2   ;;  %v1802_v0 = vld [vmem:[%s7277_s4 + $0x1f0] sm:$0xff]  ;;  %v6216_v2 = vpop.permute.xlu0 %788 }
  0xe5   : > { %1991 = vperm.xlu1 %5207, %v1777_v6   ;;  %1986 = vperm.xlu0 %5206, %v1776_v7   ;;  %v6218_v6 = vpop.permute.xlu1 %793  ;;  %v1787_v7 = vld [vmem:[%s7277_s4 + $0x178] sm:$0xff] }
  0xe9   : > { %2081 = vperm.xlu1 %5207, %v1795_v11   ;;  %2076 = vperm.xlu0 %5206, %v1794_v12   ;;  %v1786_v11 = vld [vmem:[%s7277_s4 + $0x170] sm:$0xff]  ;;  %v6226_v12 = vpop.permute.xlu0 %798 }
  0xed   : > { %2001 = vperm.xlu1 %5207, %v1779_v16   ;;  %1996 = vperm.xlu0 %5206, %v1778_v17   ;;  %v3471_v16 = vld [vmem:[%s7279_s6 + $0x8] sm:$0xff]  ;;  %v3470_v17 = vld [vmem:[%s7279_s6] sm:$0xff] }
  0xf1   : > { %2091 = vperm.xlu1 %5207, %v1797_v20   ;;  %2086 = vperm.xlu0 %5206, %v1796_v21   ;;  %v6234_v20 = vpop.permute.xlu1 %803  ;;  %v3473_v21 = vld [vmem:[%s7279_s6 + $0x18] sm:$0xff] }
  0xf5   : > { %2011 = vperm.xlu1 %5207, %v1781_v25   ;;  %2006 = vperm.xlu0 %5206, %v1780_v27   ;;  %v3472_v25 = vld [vmem:[%s7279_s6 + $0x10] sm:$0xff]  ;;  %v6242_v27 = vpop.permute.xlu0 %808  ;;  %v6244_v29 = vpop.permute.xlu1 %813 }
  0xf9   : > { %2101 = vperm.xlu1 %5207, %v1799_v33   ;;  %2096 = vperm.xlu0 %5206, %v1798_v34   ;;  %v3474_v33 = vld [vmem:[%s7279_s6 + $0x20] sm:$0xff]  ;;  %v6252_v34 = vpop.permute.xlu0 %818 }
  0xfd   : > { %2021 = vperm.xlu1 %5207, %v1783_v37   ;;  %2016 = vperm.xlu0 %5206, %v1782_v39   ;;  %v3477_v37 = vld [vmem:[%s7279_s6 + $0x38] sm:$0xff]  ;;  %v3476_v39 = vld [vmem:[%s7279_s6 + $0x30] sm:$0xff] }
 0x101   : > { %2111 = vperm.xlu1 %5207, %v1801_v46   ;;  %2106 = vperm.xlu0 %5206, %v1800_v49   ;;  %v6260_v46 = vpop.permute.xlu1 %823  ;;  %v3479_v49 = vld [vmem:[%s7279_s6 + $0x48] sm:$0xff] }
 0x105   : > { %2031 = vperm.xlu1 %5207, %v1785_v53   ;;  %2026 = vperm.xlu0 %5206, %v1784_v55   ;;  %v3478_v53 = vld [vmem:[%s7279_s6 + $0x40] sm:$0xff]  ;;  %v6268_v55 = vpop.permute.xlu0 %828 }
 0x109   : > { %2121 = vperm.xlu1 %5207, %v1803_v61   ;;  %2116 = vperm.xlu0 %5206, %v1802_v0   ;;  %v6270_v61 = vpop.permute.xlu1 %833  ;;  %v3481_v0 = vld [vmem:[%s7279_s6 + $0x58] sm:$0xff] }
 0x10a   : > { %7289 = vst [vmem:[#allocation3_spill] sm:$0xff] %v6270_v61 }
 0x10d   : > { %2041 = vperm.xlu1 %5207, %v1787_v7   ;;  %2036 = vperm.xlu0 %5206, %v1786_v11   ;;  %v3480_v7 = vld [vmem:[%s7279_s6 + $0x50] sm:$0xff]  ;;  %v6278_v11 = vpop.permute.xlu0 %838 }
 0x111   : > { %3493 = vperm.xlu1 %5207, %v3471_v16   ;;  %3488 = vperm.xlu0 %5206, %v3470_v17   ;;  %v3483_v16 = vld [vmem:[%s7279_s6 + $0x68] sm:$0xff]  ;;  %v3482_v17 = vld [vmem:[%s7279_s6 + $0x60] sm:$0xff] }
 0x115   : > { %3503 = vperm.xlu1 %5207, %v3473_v21   ;;  %3498 = vperm.xlu0 %5206, %v3472_v25   ;;  %v6286_v21 = vpop.permute.xlu1 %843  ;;  %v3485_v25 = vld [vmem:[%s7279_s6 + $0x78] sm:$0xff] }
 0x116   : > { %7290 = vst [vmem:[#allocation4_spill] sm:$0xff] %v6286_v21 }
 0x119   : > { %3513 = vperm.xlu1 %5207, %v3475_v30   ;;  %3508 = vperm.xlu0 %5206, %v3474_v33   ;;  %v3484_v30 = vld [vmem:[%s7279_s6 + $0x70] sm:$0xff]  ;;  %v6294_v33 = vpop.permute.xlu0 %848 }
 0x11a   : > { %7291 = vst [vmem:[#allocation5_spill] sm:$0xff] %v6294_v33 }
 0x11d   : > { %3523 = vperm.xlu1 %5207, %v3477_v37   ;;  %3518 = vperm.xlu0 %5206, %v3476_v39   ;;  %v6296_v37 = vpop.permute.xlu1 %853  ;;  %v6307_v33 = vpop.permute.xlu0 %858 }
 0x11e   : > { %7292 = vst [vmem:[#allocation6_spill] sm:$0xff] %v6296_v37  ;;  %7293 = vst [vmem:[#allocation7_spill] sm:$0xff] %v6307_v33 }
 0x121   : > { %3533 = vperm.xlu1 %5207, %v3479_v49   ;;  %3528 = vperm.xlu0 %5206, %v3478_v53  }
 0x125   : > { %3543 = vperm.xlu1 %5207, %v3481_v0   ;;  %3538 = vperm.xlu0 %5206, %v3480_v7   ;;  %v3961_v0 = vld [vmem:[%s7281_s8 + $0x8] sm:$0xff]  ;;  %v3960_v7 = vld [vmem:[%s7281_s8] sm:$0xff] }
 0x129   : > { %3553 = vperm.xlu1 %5207, %v3483_v16   ;;  %3548 = vperm.xlu0 %5206, %v3482_v17   ;;  %v4877_v39 = vpop.f32.mrb[0].mxu0 }
 0x12a   : > { %v1270_v49 = vadd.f32 %v4877_v39, %v5893_v40  ;;  %v1261_v53 = vpop.f32.mrb[1].mxu0  ;;  %v3963_v39 = vld [vmem:[%s7281_s8 + $0x18] sm:$0xff] }
 0x12b   : > { %v1262_v16 = vadd.f32 %v1261_v53, %v5888_v38  ;;  %v4878_v17 = vpop.f32.mrb[2].mxu0  ;;  %v3962_v38 = vld [vmem:[%s7281_s8 + $0x10] sm:$0xff]  ;;  %v6316_v53 = vpop.permute.xlu1 %863 }
 0x12c   : > { %v1273_v3 = vadd.f32 %v4878_v17, %v5914_v47  ;;  %v1264_v37 = vpop.f32.mrb[3].mxu0  ;;  %v1518_v40 = vmax.f32 %v1270_v49, 0.0  ;;  %v3964_v49 = vld [vmem:[%s7281_s8 + $0x20] sm:$0xff] }
 0x12d   : > { %3563 = vperm.xlu1 %5207, %v3485_v25   ;;  %3558 = vperm.xlu0 %5206, %v3484_v30   ;;  %v1265_v25 = vadd.f32 %v1264_v37, %v5909_v45  ;;  %v1516_v47 = vmax.f32 %v1262_v16, 0.0  ;;  %v3965_v37 = vld [vmem:[%s7281_s8 + $0x28] sm:$0xff] }
 0x12e   : > { %v1519_v30 = vmax.f32 %v1273_v3, 0.0 }
 0x12f   : > { %v1517_v17 = vmax.f32 %v1265_v25, 0.0 }
 0x130   : > { %v1581_v61 = vpack.c.bf16 %v1519_v30, %v1518_v40 }
 0x131   : > { %3983 = vperm.xlu1 %5207, %v3961_v0   ;;  %3978 = vperm.xlu0 %5206, %v3960_v7   ;;  %v1580_v33 = vpack.c.bf16 %v1517_v17, %v1516_v47  ;;  %v4881_v21 = vpop.f32.mrb[4].mxu0  ;;  %v6325_v0 = vpop.permute.xlu0 %868 }
 0x132   : > { %v1286_v45 = vadd.f32 %v4881_v21, %v5940_v56  ;;  %v1277_v3 = vpop.f32.mrb[5].mxu0  ;;  %v7294_v56 = vmov 0   ;;  %v6331_v21 = vpop.permute.xlu1 %873 }
 0x133   : > { %v1278_v7 = vadd.f32 %v1277_v3, %v5923_v50  ;;  %v4882_v16 = vpop.f32.mrb[6].mxu0  ;;  %2765 = vmatpush1.bf16.msra.mxu0 %v1580_v33  ;;  %5007 = vmatpush1.bf16.msra.mxu1 %v1580_v33  ;;  %v3967_v50 = vld [vmem:[%s7281_s8 + $0x38] sm:$0xff] }
 0x134   : > { %v1289_v25 = vadd.f32 %v4882_v16, %v5949_v59  ;;  %v1280_v40 = vpop.f32.mrb[7].mxu0  ;;  %2766 = vmatprep.subr.bf16.mxu0 %v7294_v56  ;;  %4992 = vmatprep.subr.bf16.mxu1 %v7294_v56  ;;  %v3966_v59 = vld [vmem:[%s7281_s8 + $0x30] sm:$0xff] }
 0x135   : > { %3993 = vperm.xlu1 %5207, %v3963_v39   ;;  %3988 = vperm.xlu0 %5206, %v3962_v38   ;;  %v1281_v30 = vadd.f32 %v1280_v40, %v5935_v54  ;;  %v1522_v39 = vmax.f32 %v1286_v45, 0.0  ;;  %v1520_v33 = vmax.f32 %v1278_v7, 0.0  ;;  %v6342_v54 = vpop.permute.xlu0 %878  ;;  %v3969_v7 = vld [vmem:[%s7281_s8 + $0x48] sm:$0xff] }
 0x136   : > { %v1523_v38 = vmax.f32 %v1289_v25, 0.0  ;;  %v6351_v16 = vpop.permute.xlu1 %883 }
 0x137   : > { %v1521_v47 = vmax.f32 %v1281_v30, 0.0  ;;  %2767 = vmatpush1.bf16.msra.mxu0 %v1581_v61  ;;  %5008 = vmatpush1.bf16.msra.mxu1 %v1581_v61  ;;  %v3968_v61 = vld [vmem:[%s7281_s8 + $0x40] sm:$0xff] }
 0x138   : > { %v1583_v17 = vpack.c.bf16 %v1523_v38, %v1522_v39  ;;  %2768 = vmatprep.subr.bf16.mxu0 %v7294_v56  ;;  %4993 = vmatprep.subr.bf16.mxu1 %v7294_v56 }
 0x139   : > { %4003 = vperm.xlu1 %5207, %v3965_v37   ;;  %3998 = vperm.xlu0 %5206, %v3964_v49   ;;  %v1582_v45 = vpack.c.bf16 %v1521_v47, %v1520_v33  ;;  %v4885_v3 = vpop.f32.mrb[8].mxu0 }
 0x13a   : > { %v1302_v37 = vadd.f32 %v4885_v3, %v5976_v5  ;;  %v1293_v49 = vpop.f32.mrb[9].mxu0 }
 0x13b   : > { %v1294_v25 = vadd.f32 %v1293_v49, %v5961_v63  ;;  %v4886_v40 = vpop.f32.mrb[10].mxu0  ;;  %2769 = vmatpush1.bf16.msra.mxu0 %v1582_v45  ;;  %5009 = vmatpush1.bf16.msra.mxu1 %v1582_v45  ;;  %v3971_v63 = vld [vmem:[%s7281_s8 + $0x58] sm:$0xff] }
 0x13c   : > { %v1305_v30 = vadd.f32 %v4886_v40, %v5987_v9  ;;  %v1296_v39 = vpop.f32.mrb[11].mxu0  ;;  %2770 = vmatprep.subr.bf16.mxu0 %v7294_v56  ;;  %4994 = vmatprep.subr.bf16.mxu1 %v7294_v56  ;;  %v1526_v38 = vmax.f32 %v1302_v37, 0.0  ;;  %v6364_v9 = vpop.permute.xlu0 %888 }
 0x13d   : > { %4013 = vperm.xlu1 %5207, %v3967_v50   ;;  %4008 = vperm.xlu0 %5206, %v3966_v59   ;;  %v1297_v5 = vadd.f32 %v1296_v39, %v5966_v1  ;;  %v3970_v59 = vld [vmem:[%s7281_s8 + $0x50] sm:$0xff]  ;;  %v1524_v33 = vmax.f32 %v1294_v25, 0.0  ;;  %v6368_v1 = vpop.permute.xlu1 %893 }
 0x13e   : > { %v1527_v50 = vmax.f32 %v1305_v30, 0.0 }
 0x13f   : > { %v1525_v47 = vmax.f32 %v1297_v5, 0.0  ;;  %2771 = vmatpush1.bf16.msra.mxu0 %v1583_v17  ;;  %5010 = vmatpush1.bf16.msra.mxu1 %v1583_v17  ;;  %v3972_v17 = vld [vmem:[%s7281_s8 + $0x60] sm:$0xff] }
 0x140   : > { %v1585_v45 = vpack.c.bf16 %v1527_v50, %v1526_v38  ;;  %2772 = vmatprep.subr.bf16.mxu0 %v7294_v56  ;;  %4995 = vmatprep.subr.bf16.mxu1 %v7294_v56 }
 0x141   : > { %4023 = vperm.xlu1 %5207, %v3969_v7   ;;  %4018 = vperm.xlu0 %5206, %v3968_v61   ;;  %v1584_v3 = vpack.c.bf16 %v1525_v47, %v1524_v33  ;;  %v4889_v37 = vpop.f32.mrb[12].mxu0  ;;  %v3973_v61 = vld [vmem:[%s7281_s8 + $0x68] sm:$0xff] }
 0x142   : > { %v1318_v49 = vadd.f32 %v4889_v37, %v6016_v19  ;;  %v1309_v7 = vpop.f32.mrb[13].mxu0  ;;  %v6381_v19 = vpop.permute.xlu0 %898 }
 0x143   : > { %v1310_v25 = vadd.f32 %v1309_v7, %v5999_v13  ;;  %v4890_v40 = vpop.f32.mrb[14].mxu0  ;;  %2773 = vmatpush1.bf16.msra.mxu0 %v1584_v3  ;;  %5011 = vmatpush1.bf16.msra.mxu1 %v1584_v3  ;;  %v3975_v13 = vld [vmem:[%s7281_s8 + $0x78] sm:$0xff]  ;;  %v4230_v7 = vld [vmem:[%s7283_s10 + $0x8] sm:$0xff] }
 0x144   : > { %v1321_v30 = vadd.f32 %v4890_v40, %v6025_v22  ;;  %v1312_v39 = vpop.f32.mrb[15].mxu0  ;;  %2774 = vmatprep.subr.bf16.mxu0 %v7294_v56  ;;  %4996 = vmatprep.subr.bf16.mxu1 %v7294_v56  ;;  %v1530_v38 = vmax.f32 %v1318_v49, 0.0  ;;  %v3974_v22 = vld [vmem:[%s7281_s8 + $0x70] sm:$0xff] }
 0x145   : > { %4033 = vperm.xlu1 %5207, %v3971_v63   ;;  %4028 = vperm.xlu0 %5206, %v3970_v59   ;;  %v1313_v5 = vadd.f32 %v1312_v39, %v6002_v14  ;;  %v6390_v63 = vpop.permute.xlu1 %903  ;;  %v1528_v59 = vmax.f32 %v1310_v25, 0.0 }
 0x146   : > { %v1531_v50 = vmax.f32 %v1321_v30, 0.0 }
 0x147   : > { %v1529_v33 = vmax.f32 %v1313_v5, 0.0  ;;  %2775 = vmatpush1.bf16.msra.mxu0 %v1585_v45  ;;  %5012 = vmatpush1.bf16.msra.mxu1 %v1585_v45  ;;  %v4229_v45 = vld [vmem:[%s7283_s10] sm:$0xff] }
 0x148   : > { %v1587_v47 = vpack.c.bf16 %v1531_v50, %v1530_v38  ;;  %2776 = vmatprep.subr.bf16.mxu0 %v7294_v56  ;;  %4997 = vmatprep.subr.bf16.mxu1 %v7294_v56 }
 0x149   : > { %4043 = vperm.xlu1 %5207, %v3973_v61   ;;  %4038 = vperm.xlu0 %5206, %v3972_v17   ;;  %v1586_v14 = vpack.c.bf16 %v1529_v33, %v1528_v59  ;;  %v4893_v3 = vpop.f32.mrb[16].mxu0  ;;  %v6401_v61 = vpop.permute.xlu0 %1886 }
 0x14a   : > { %v1334_v37 = vadd.f32 %v4893_v3, %v6052_v31  ;;  %v1325_v49 = vpop.f32.mrb[17].mxu0  ;;  %v6407_v31 = vpop.permute.xlu1 %1891 }
 0x14b   : > { %v1326_v17 = vadd.f32 %v1325_v49, %v6037_v26  ;;  %v4894_v25 = vpop.f32.mrb[18].mxu0  ;;  %2777 = vmatpush1.bf16.msra.mxu0 %v1586_v14  ;;  %5013 = vmatpush1.bf16.msra.mxu1 %v1586_v14  ;;  %v4232_v26 = vld [vmem:[%s7283_s10 + $0x18] sm:$0xff] }
 0x14c   : > { %v1337_v40 = vadd.f32 %v4894_v25, %v6063_v35  ;;  %v1328_v30 = vpop.f32.mrb[19].mxu0  ;;  %2778 = vmatprep.subr.bf16.mxu0 %v7294_v56  ;;  %4998 = vmatprep.subr.bf16.mxu1 %v7294_v56  ;;  %v1534_v5 = vmax.f32 %v1334_v37, 0.0  ;;  %v4231_v35 = vld [vmem:[%s7283_s10 + $0x10] sm:$0xff]  ;;  %v4319_v37 = vld [vmem:[%s7284_s11 + $0x8] sm:$0xff] }
 0x14d   : > { %4053 = vperm.xlu1 %5207, %v3975_v13   ;;  %4048 = vperm.xlu0 %5206, %v3974_v22   ;;  %v1329_v39 = vadd.f32 %v1328_v30, %v6042_v28  ;;  %v1532_v50 = vmax.f32 %v1326_v17, 0.0  ;;  %v6418_v28 = vpop.permute.xlu0 %1806 }
 0x14e   : > { %v1535_v38 = vmax.f32 %v1337_v40, 0.0  ;;  %v6427_v49 = vpop.permute.xlu1 %1811 }
 0x14f   : > { %v1533_v13 = vmax.f32 %v1329_v39, 0.0  ;;  %2779 = vmatpush1.bf16.msra.mxu0 %v1587_v47  ;;  %5014 = vmatpush1.bf16.msra.mxu1 %v1587_v47  ;;  %v4318_v47 = vld [vmem:[%s7284_s11] sm:$0xff]  ;;  %v4320_v39 = vld [vmem:[%s7284_s11 + $0x10] sm:$0xff] }
 0x150   : > { %v1589_v22 = vpack.c.bf16 %v1535_v38, %v1534_v5  ;;  %2780 = vmatprep.subr.bf16.mxu0 %v7294_v56  ;;  %4999 = vmatprep.subr.bf16.mxu1 %v7294_v56 }
 0x151   : > { %4240 = vperm.xlu1 %5207, %v4230_v7   ;;  %4235 = vperm.xlu0 %5206, %v4229_v45   ;;  %v1588_v59 = vpack.c.bf16 %v1533_v13, %v1532_v50  ;;  %v4897_v33 = vpop.f32.mrb[20].mxu0 }
 0x152   : > { %v1350_v14 = vadd.f32 %v4897_v33, %v6089_v48  ;;  %v1341_v3 = vpop.f32.mrb[21].mxu0  ;;  %v4355_v33 = vld [vmem:[#allocation2] sm:$0x1] }
 0x153   : > { %v1342_v7 = vadd.f32 %v1341_v3, %v6075_v41  ;;  %v4898_v45 = vpop.f32.mrb[22].mxu0  ;;  %2781 = vmatpush1.bf16.msra.mxu0 %v1588_v59  ;;  %5015 = vmatpush1.bf16.msra.mxu1 %v1588_v59  ;;  %v4321_v41 = vld [vmem:[%s7284_s11 + $0x18] sm:$0xff] }
 0x154   : > { %v1353_v17 = vadd.f32 %v4898_v45, %v6098_v52  ;;  %v1344_v25 = vpop.f32.mrb[23].mxu0  ;;  %2782 = vmatprep.subr.bf16.mxu0 %v7294_v56  ;;  %5000 = vmatprep.subr.bf16.mxu1 %v7294_v56  ;;  %v1538_v40 = vmax.f32 %v1350_v14, 0.0  ;;  %v6440_v52 = vpop.permute.xlu0 %1896 }
 0x155   : > { %4250 = vperm.xlu1 %5207, %v4232_v26   ;;  %4245 = vperm.xlu0 %5206, %v4231_v35   ;;  %v1345_v48 = vadd.f32 %v1344_v25, %v6078_v42  ;;  %v1536_v5 = vmax.f32 %v1342_v7, 0.0  ;;  %v6444_v42 = vpop.permute.xlu1 %1901 }
 0x156   : > { %v1539_v30 = vmax.f32 %v1353_v17, 0.0 }
 0x157   : > { %v1537_v38 = vmax.f32 %v1345_v48, 0.0  ;;  %2783 = vmatpush1.bf16.msra.mxu0 %v1589_v22  ;;  %5016 = vmatpush1.bf16.msra.mxu1 %v1589_v22 }
 0x158   : > { %v1591_v26 = vpack.c.bf16 %v1539_v30, %v1538_v40  ;;  %2784 = vmatprep.subr.bf16.mxu0 %v7294_v56  ;;  %5001 = vmatprep.subr.bf16.mxu1 %v7294_v56 }
 0x159   : > { %4329 = vperm.xlu1 %5207, %v4319_v37   ;;  %4324 = vperm.xlu0 %5206, %v4318_v47   ;;  %v1590_v35 = vpack.c.bf16 %v1537_v38, %v1536_v5  ;;  %v4901_v50 = vpop.f32.mrb[24].mxu0  ;;  %v6451_v47 = vpop.permute.xlu0 %1816 }
 0x15a   : > { %v1366_v13 = vadd.f32 %v4901_v50, %v6116_v62  ;;  %v1357_v59 = vpop.f32.mrb[25].mxu0 }
 0x15b   : > { %v1358_v14 = vadd.f32 %v1357_v59, %v6106_v57  ;;  %v4902_v3 = vpop.f32.mrb[26].mxu0  ;;  %2785 = vmatpush1.bf16.msra.mxu0 %v1590_v35  ;;  %5017 = vmatpush1.bf16.msra.mxu1 %v1590_v35 }
 0x15c   : > { %v1369_v22 = vadd.f32 %v4902_v3, %v6124_v4  ;;  %v1360_v37 = vpop.f32.mrb[27].mxu0  ;;  %2786 = vmatprep.subr.bf16.mxu0 %v7294_v56  ;;  %5002 = vmatprep.subr.bf16.mxu1 %v7294_v56  ;;  %v1542_v62 = vmax.f32 %v1366_v13, 0.0 }
 0x15d   : > { %4339 = vperm.xlu1 %5207, %v4321_v41   ;;  %4334 = vperm.xlu0 %5206, %v4320_v39   ;;  %v1361_v7 = vadd.f32 %v1360_v37, %v6108_v58  ;;  %v1540_v17 = vmax.f32 %v1358_v14, 0.0 }
 0x15e   : > { %v1543_v45 = vmax.f32 %v1369_v22, 0.0 }
 0x15f   : > { %v1541_v25 = vmax.f32 %v1361_v7, 0.0  ;;  %2787 = vmatpush1.bf16.msra.mxu0 %v1591_v26  ;;  %5018 = vmatpush1.bf16.msra.mxu1 %v1591_v26 }
 0x160   : > { %v1593_v57 = vpack.c.bf16 %v1543_v45, %v1542_v62  ;;  %2788 = vmatprep.subr.bf16.mxu0 %v7294_v56  ;;  %5003 = vmatprep.subr.bf16.mxu1 %v7294_v56 }
 0x161   : > { %4358 = vperm.xlu0 %5206, %v4355_v33   ;;  %v1592_v4 = vpack.c.bf16 %v1541_v25, %v1540_v17  ;;  %v4905_v48 = vpop.f32.mrb[28].mxu0 }
 0x162   : > { %v1382_v40 = vadd.f32 %v4905_v48, %v6142_v15  ;;  %v1373_v30 = vpop.f32.mrb[29].mxu0 }
 0x163   : > { %v1374_v41 = vadd.f32 %v1373_v30, %v6132_v8  ;;  %v4906_v58 = vpop.f32.mrb[30].mxu0  ;;  %2789 = vmatpush1.bf16.msra.mxu0 %v1592_v4  ;;  %5019 = vmatpush1.bf16.msra.mxu1 %v1592_v4 }
 0x164   : > { %v1385_v39 = vadd.f32 %v4906_v58, %v6150_v18  ;;  %v1376_v5 = vpop.f32.mrb[31].mxu0  ;;  %2790 = vmatprep.subr.bf16.mxu0 %v7294_v56  ;;  %5004 = vmatprep.subr.bf16.mxu1 %v7294_v56  ;;  %v1546_v26 = vmax.f32 %v1382_v40, 0.0 }
 0x165   : > { %v1377_v38 = vadd.f32 %v1376_v5, %v6134_v10  ;;  %v1544_v50 = vmax.f32 %v1374_v41, 0.0 }
 0x166   : > { %v1547_v35 = vmax.f32 %v1385_v39, 0.0 }
 0x167   : > { %v1545_v13 = vmax.f32 %v1377_v38, 0.0  ;;  %2791 = vmatpush1.bf16.msra.mxu0 %v1593_v57  ;;  %5020 = vmatpush1.bf16.msra.mxu1 %v1593_v57 }
 0x168   : > { %v1595_v15 = vpack.c.bf16 %v1547_v35, %v1546_v26  ;;  %2792 = vmatprep.subr.bf16.mxu0 %v7294_v56  ;;  %5005 = vmatprep.subr.bf16.mxu1 %v7294_v56 }
 0x169   : > { %v1594_v8 = vpack.c.bf16 %v1545_v13, %v1544_v50  ;;  %v4909_v18 = vpop.f32.mrb[32].mxu0 }
 0x16a   : > { %v1398_v59 = vadd.f32 %v4909_v18, %v6174_v32  ;;  %v1389_v33 = vpop.f32.mrb[33].mxu0  ;;  %v5248_v32 = vld [vmem:[%s7276_s3 + $0x1a0] ss:$16 sps:$4 sm:$0xff]  }
 0x16b   : > { %v1390_v14 = vadd.f32 %v1389_v33, %v6158_v23  ;;  %v4910_v3 = vpop.f32.mrb[34].mxu0  ;;  %2793 = vmatpush1.bf16.msra.mxu0 %v1594_v8  ;;  %5021 = vmatpush1.bf16.msra.mxu1 %v1594_v8  ;;  %v5251_v23 = vld [vmem:[%s7276_s3] ss:$16 sps:$4 sm:$0xff]  }
 0x16c   : > { %v1401_v10 = vadd.f32 %v4910_v3, %v6182_v36  ;;  %v1392_v22 = vpop.f32.mrb[35].mxu0  ;;  %2794 = vmatprep.subr.bf16.mxu0 %v7294_v56  ;;  %5006 = vmatprep.subr.bf16.mxu1 %v7294_v56  ;;  %v1550_v7 = vmax.f32 %v1398_v59, 0.0  ;;  %v5254_v36 = vld [vmem:[%s7276_s3 + $0x24] ss:$16 sps:$4 sm:$0xff]  }
 0x16d   : > { %v1393_v37 = vadd.f32 %v1392_v22, %v6160_v24  ;;  %v1548_v45 = vmax.f32 %v1390_v14, 0.0  ;;  %v5256_v24 = vld [vmem:[%s7276_s3 + $0x1c4] ss:$16 sps:$4 sm:$0xff]  }
 0x16e   : > { %v1551_v62 = vmax.f32 %v1401_v10, 0.0 }
 0x16f   : > { %v1549_v17 = vmax.f32 %v1393_v37, 0.0  ;;  %2795 = vmatpush1.bf16.msra.mxu0 %v1595_v15  ;;  %5022 = vmatpush1.bf16.msra.mxu1 %v1595_v15 }
 0x170   : > { %v1597_v25 = vpack.c.bf16 %v1551_v62, %v1550_v7  ;;  %3053 = vmatprep.subr.bf16.mxu1 %v7294_v56 }
 0x171   : > { %v1596_v57 = vpack.c.bf16 %v1549_v17, %v1548_v45  ;;  %v4913_v4 = vpop.f32.mrb[36].mxu0 }
 0x172   : > { %v1414_v48 = vadd.f32 %v4913_v4, %v6200_v51  ;;  %v1405_v40 = vpop.f32.mrb[37].mxu0  ;;  %2797 = vmatmul.mubr.bf16.vlgmr.msra.gmra.mrb[64].mxu0 %v5251_v23  ;;  %2901 = vmatmul.mubr.bf16.vlgmr.msra.gmra.mrb[0].mxu1 %v5248_v32  ;;  %v5258_v51 = vld [vmem:[%s7276_s3 + $0x20] ss:$16 sps:$4 sm:$0xff]  }
 0x173   : > { %v1406_v30 = vadd.f32 %v1405_v40, %v6190_v43  ;;  %v4914_v41 = vpop.f32.mrb[38].mxu0  ;;  %3054 = vmatpush1.bf16.msra.mxu1 %v1596_v57  ;;  %2804 = vmatprep.mubr.bf16.mxu0 %v5254_v36  ;;  %v5259_v43 = vld [vmem:[%s7276_s3 + $0x1c0] ss:$16 sps:$4 sm:$0xff]  }
 0x174   : > { %v1417_v58 = vadd.f32 %v4914_v41, %v6208_v60  ;;  %v1408_v39 = vpop.f32.mrb[39].mxu0  ;;  %3055 = vmatprep.subr.bf16.mxu1 %v7294_v56  ;;  %2908 = vmatprep.mubr.bf16.mxu1 %v5256_v24  ;;  %v1554_v38 = vmax.f32 %v1414_v48, 0.0  ;;  %v5260_v60 = vld [vmem:[%s7276_s3 + $0x44] ss:$16 sps:$4 sm:$0xff]  }
 0x175   : > { %v1409_v5 = vadd.f32 %v1408_v39, %v6192_v44  ;;  %v1552_v35 = vmax.f32 %v1406_v30, 0.0  ;;  %v5262_v44 = vld [vmem:[%s7276_s3 + $0x1e4] ss:$16 sps:$4 sm:$0xff]  }
 0x176   : > { %v1555_v26 = vmax.f32 %v1417_v58, 0.0 }
 0x177   : > { %v1553_v50 = vmax.f32 %v1409_v5, 0.0  ;;  %3056 = vmatpush1.bf16.msra.mxu1 %v1597_v25 }
 0x178   : > { %v1599_v13 = vpack.c.bf16 %v1555_v26, %v1554_v38  ;;  %3057 = vmatprep.subr.bf16.mxu1 %v7294_v56 }
 0x179   : > { %v1598_v15 = vpack.c.bf16 %v1553_v50, %v1552_v35  ;;  %v4917_v8 = vpop.f32.mrb[40].mxu0 }
 0x17a   : > { %v1430_v18 = vadd.f32 %v4917_v8, %v6226_v12  ;;  %v1421_v59 = vpop.f32.mrb[41].mxu0  ;;  %2805 = vmatmul.mubr.bf16.gmra.mrb[68].mxu0 %v5258_v51  ;;  %2909 = vmatmul.mubr.bf16.gmra.mrb[4].mxu1 %v5259_v43  ;;  %v5264_v12 = vld [vmem:[%s7276_s3 + $0x40] ss:$16 sps:$4 sm:$0xff]  }
 0x17b   : > { %v1422_v33 = vadd.f32 %v1421_v59, %v6216_v2  ;;  %v4918_v14 = vpop.f32.mrb[42].mxu0  ;;  %3058 = vmatpush1.bf16.msra.mxu1 %v1598_v15  ;;  %2812 = vmatprep.mubr.bf16.mxu0 %v5260_v60  ;;  %v5265_v2 = vld [vmem:[%s7276_s3 + $0x1e0] ss:$16 sps:$4 sm:$0xff]  }
 0x17c   : > { %v1433_v3 = vadd.f32 %v4918_v14, %v6234_v20  ;;  %v1424_v10 = vpop.f32.mrb[43].mxu0  ;;  %3059 = vmatprep.subr.bf16.mxu1 %v7294_v56  ;;  %2916 = vmatprep.mubr.bf16.mxu1 %v5262_v44  ;;  %v1558_v37 = vmax.f32 %v1430_v18, 0.0  ;;  %v5266_v20 = vld [vmem:[%s7276_s3 + $0x64] ss:$16 sps:$4 sm:$0xff]   ;;  %v7295_v60 = vld [vmem:[#allocation4_spill] sm:$0xff] }
 0x17d   : > { %v1425_v22 = vadd.f32 %v1424_v10, %v6218_v6  ;;  %v1556_v62 = vmax.f32 %v1422_v33, 0.0  ;;  %v5268_v6 = vld [vmem:[%s7276_s3 + $0x204] ss:$16 sps:$4 sm:$0xff]  }
 0x17e   : > { %v1559_v7 = vmax.f32 %v1433_v3, 0.0  ;;  %v7296_v15 = vld [vmem:[#allocation3_spill] sm:$0xff] }
 0x17f   : > { %v1557_v32 = vmax.f32 %v1425_v22, 0.0  ;;  %3060 = vmatpush1.bf16.msra.mxu1 %v1599_v13  ;;  %v5278_v3 = vld [vmem:[%s7276_s3 + $0xa4] ss:$16 sps:$4 sm:$0xff]  }
 0x180   : > { %v1601_v23 = vpack.c.bf16 %v1559_v7, %v1558_v37  ;;  %3061 = vmatprep.subr.bf16.mxu1 %v7294_v56  ;;  %v5280_v22 = vld [vmem:[%s7276_s3 + $0x244] ss:$16 sps:$4 sm:$0xff]  }
 0x181   : > { %v1600_v45 = vpack.c.bf16 %v1557_v32, %v1556_v62  ;;  %v4921_v17 = vpop.f32.mrb[44].mxu0  ;;  %v7298_v32 = vld [vmem:[#allocation5_spill] sm:$0xff] }
 0x182   : > { %v1446_v36 = vadd.f32 %v4921_v17, %v6252_v34  ;;  %v1437_v25 = vpop.f32.mrb[45].mxu0  ;;  %2813 = vmatmul.mubr.bf16.gmra.mrb[72].mxu0 %v5264_v12  ;;  %2917 = vmatmul.mubr.bf16.gmra.mrb[8].mxu1 %v5265_v2  ;;  %v5270_v34 = vld [vmem:[%s7276_s3 + $0x60] ss:$16 sps:$4 sm:$0xff]  }
 0x183   : > { %v1438_v24 = vadd.f32 %v1437_v25, %v6242_v27  ;;  %v4922_v57 = vpop.f32.mrb[46].mxu0  ;;  %3062 = vmatpush1.bf16.msra.mxu1 %v1600_v45  ;;  %2820 = vmatprep.mubr.bf16.mxu0 %v5266_v20  ;;  %v5271_v27 = vld [vmem:[%s7276_s3 + $0x200] ss:$16 sps:$4 sm:$0xff]  }
 0x184   : > { %v1449_v4 = vadd.f32 %v4922_v57, %v6260_v46  ;;  %v1440_v48 = vpop.f32.mrb[47].mxu0  ;;  %3063 = vmatprep.subr.bf16.mxu1 %v7294_v56  ;;  %2924 = vmatprep.mubr.bf16.mxu1 %v5268_v6  ;;  %v1562_v30 = vmax.f32 %v1446_v36, 0.0  ;;  %v5272_v46 = vld [vmem:[%s7276_s3 + $0x84] ss:$16 sps:$4 sm:$0xff]   ;;  %v7299_v17 = vld [vmem:[#allocation6_spill] sm:$0xff] }
 0x185   : > { %v1441_v40 = vadd.f32 %v1440_v48, %v6244_v29  ;;  %v1560_v58 = vmax.f32 %v1438_v24, 0.0  ;;  %v5274_v29 = vld [vmem:[%s7276_s3 + $0x224] ss:$16 sps:$4 sm:$0xff]   ;;  %v5282_v57 = vld [vmem:[%s7276_s3 + $0xa0] ss:$16 sps:$4 sm:$0xff]  }
 0x186   : > { %v1563_v41 = vmax.f32 %v1449_v4, 0.0  ;;  %v7297_v12 = vld [vmem:[#allocation7_spill] sm:$0xff] }
 0x187   : > { %v1561_v39 = vmax.f32 %v1441_v40, 0.0  ;;  %3064 = vmatpush1.bf16.msra.mxu1 %v1601_v23  ;;  %v5283_v4 = vld [vmem:[%s7276_s3 + $0x240] ss:$16 sps:$4 sm:$0xff]  }
 0x188   : > { %v1603_v5 = vpack.c.bf16 %v1563_v41, %v1562_v30  ;;  %3065 = vmatprep.subr.bf16.mxu1 %v7294_v56  ;;  %v5286_v41 = vld [vmem:[%s7276_s3 + $0x264] ss:$16 sps:$4 sm:$0xff]  }
 0x189   : > { %v1602_v38 = vpack.c.bf16 %v1561_v39, %v1560_v58  ;;  %v4925_v26 = vpop.f32.mrb[48].mxu0 }
 0x18a   : > { %v1462_v51 = vadd.f32 %v4925_v26, %v6278_v11  ;;  %v1453_v43 = vpop.f32.mrb[49].mxu0  ;;  %2821 = vmatmul.mubr.bf16.gmra.mrb[76].mxu0 %v5270_v34  ;;  %2925 = vmatmul.mubr.bf16.gmra.mrb[12].mxu1 %v5271_v27  ;;  %v5276_v11 = vld [vmem:[%s7276_s3 + $0x80] ss:$16 sps:$4 sm:$0xff]  }
 0x18b   : > { %v1454_v35 = vadd.f32 %v1453_v43, %v6268_v55  ;;  %v4926_v50 = vpop.f32.mrb[50].mxu0  ;;  %3066 = vmatpush1.bf16.msra.mxu1 %v1602_v38  ;;  %2828 = vmatprep.mubr.bf16.mxu0 %v5272_v46  ;;  %v5277_v55 = vld [vmem:[%s7276_s3 + $0x220] ss:$16 sps:$4 sm:$0xff]  }
 0x18c   : > { %v1465_v13 = vadd.f32 %v4926_v50, %v7295_v60  ;;  %v1456_v44 = vpop.f32.mrb[51].mxu0  ;;  %3067 = vmatprep.subr.bf16.mxu1 %v7294_v56  ;;  %2932 = vmatprep.mubr.bf16.mxu1 %v5274_v29  ;;  %v1566_v18 = vmax.f32 %v1462_v51, 0.0 }
 0x18d   : > { %v1457_v8 = vadd.f32 %v1456_v44, %v7296_v15  ;;  %v1564_v33 = vmax.f32 %v1454_v35, 0.0 }
 0x18e   : > { %v1567_v59 = vmax.f32 %v1465_v13, 0.0 }
 0x18f   : > { %v1565_v14 = vmax.f32 %v1457_v8, 0.0  ;;  %3068 = vmatpush1.bf16.msra.mxu1 %v1603_v5 }
 0x190   : > { %v1605_v10 = vpack.c.bf16 %v1567_v59, %v1566_v18  ;;  %3069 = vmatprep.subr.bf16.mxu1 %v7294_v56 }
 0x191   : > { %v1604_v37 = vpack.c.bf16 %v1565_v14, %v1564_v33  ;;  %v4929_v7 = vpop.f32.mrb[52].mxu0 }
 0x192   : > { %v1478_v2 = vadd.f32 %v4929_v7, %v7297_v12  ;;  %v1469_v62 = vpop.f32.mrb[53].mxu0  ;;  %2829 = vmatmul.mubr.bf16.gmra.mrb[80].mxu0 %v5276_v11  ;;  %2933 = vmatmul.mubr.bf16.gmra.mrb[16].mxu1 %v5277_v55  ;;  %v5300_v12 = vld [vmem:[%s7276_s3 + $0x100] ss:$16 sps:$4 sm:$0xff]  }
 0x193   : > { %v1470_v20 = vadd.f32 %v1469_v62, %v7298_v32  ;;  %v4930_v23 = vpop.f32.mrb[54].mxu0  ;;  %3070 = vmatpush1.bf16.msra.mxu1 %v1604_v37  ;;  %2836 = vmatprep.mubr.bf16.mxu0 %v5278_v3  ;;  %v5302_v62 = vld [vmem:[%s7276_s3 + $0x124] ss:$16 sps:$4 sm:$0xff]  }
 0x194   : > { %v1481_v6 = vadd.f32 %v4930_v23, %v6316_v53  ;;  %v1472_v45 = vpop.f32.mrb[55].mxu0  ;;  %3071 = vmatprep.subr.bf16.mxu1 %v7294_v56  ;;  %2940 = vmatprep.mubr.bf16.mxu1 %v5280_v22  ;;  %v1570_v25 = vmax.f32 %v1478_v2, 0.0  ;;  %v5284_v53 = vld [vmem:[%s7276_s3 + $0xc4] ss:$16 sps:$4 sm:$0xff]   ;;  %v5301_v2 = vld [vmem:[%s7276_s3 + $0x2a0] ss:$16 sps:$4 sm:$0xff]  }
 0x195   : > { %v1473_v36 = vadd.f32 %v1472_v45, %v7299_v17  ;;  %v1568_v48 = vmax.f32 %v1470_v20, 0.0  ;;  %v5304_v32 = vld [vmem:[%s7276_s3 + $0x2c4] ss:$16 sps:$4 sm:$0xff]   ;;  %v5307_v20 = vld [vmem:[%s7276_s3 + $0x2c0] ss:$16 sps:$4 sm:$0xff]  }
 0x196   : > { %v1571_v24 = vmax.f32 %v1481_v6, 0.0  ;;  %v5308_v23 = vld [vmem:[%s7276_s3 + $0x144] ss:$16 sps:$4 sm:$0xff]   ;;  %v5312_v45 = vld [vmem:[%s7276_s3 + $0x140] ss:$16 sps:$4 sm:$0xff]  }
 0x197   : > { %v1569_v40 = vmax.f32 %v1473_v36, 0.0  ;;  %3072 = vmatpush1.bf16.msra.mxu1 %v1605_v10  ;;  %v5310_v6 = vld [vmem:[%s7276_s3 + $0x2e4] ss:$16 sps:$4 sm:$0xff]   ;;  %v5313_v17 = vld [vmem:[%s7276_s3 + $0x2e0] ss:$16 sps:$4 sm:$0xff]  }
 0x198   : > { %v1607_v30 = vpack.c.bf16 %v1571_v24, %v1570_v25  ;;  %3073 = vmatprep.subr.bf16.mxu1 %v7294_v56  ;;  %v5314_v36 = vld [vmem:[%s7276_s3 + $0x164] ss:$16 sps:$4 sm:$0xff]   ;;  %v5318_v24 = vld [vmem:[%s7276_s3 + $0x160] ss:$16 sps:$4 sm:$0xff]  }
 0x199   : > { %v1606_v34 = vpack.c.bf16 %v1569_v40, %v1568_v48  ;;  %v4933_v27 = vpop.f32.mrb[56].mxu0  ;;  %v5316_v25 = vld [vmem:[%s7276_s3 + $0x304] ss:$16 sps:$4 sm:$0xff]   ;;  %v5324_v40 = vld [vmem:[%s7276_s3 + $0x180] ss:$16 sps:$4 sm:$0xff]  }
 0x19a   : > { %v1494_v58 = vadd.f32 %v4933_v27, %v6342_v54  ;;  %v1485_v39 = vpop.f32.mrb[57].mxu0  ;;  %2837 = vmatmul.mubr.bf16.gmra.mrb[84].mxu0 %v5282_v57  ;;  %2941 = vmatmul.mubr.bf16.gmra.mrb[20].mxu1 %v5283_v4  ;;  %v5288_v54 = vld [vmem:[%s7276_s3 + $0xc0] ss:$16 sps:$4 sm:$0xff]   ;;  %v5320_v4 = vld [vmem:[%s7276_s3 + $0x184] ss:$16 sps:$4 sm:$0xff]  }
 0x19b   : > { %v1486_v46 = vadd.f32 %v1485_v39, %v6325_v0  ;;  %v4934_v5 = vpop.f32.mrb[58].mxu0  ;;  %3074 = vmatpush1.bf16.msra.mxu1 %v1606_v34  ;;  %2844 = vmatprep.mubr.bf16.mxu0 %v5284_v53  ;;  %v5289_v0 = vld [vmem:[%s7276_s3 + $0x260] ss:$16 sps:$4 sm:$0xff]   ;;  %v5322_v48 = vld [vmem:[%s7276_s3 + $0x324] ss:$16 sps:$4 sm:$0xff]  }
 0x19c   : > { %v1497_v29 = vadd.f32 %v4934_v5, %v6351_v16  ;;  %v1488_v38 = vpop.f32.mrb[59].mxu0  ;;  %3075 = vmatprep.subr.bf16.mxu1 %v7294_v56  ;;  %2948 = vmatprep.mubr.bf16.mxu1 %v5286_v41  ;;  %v1574_v51 = vmax.f32 %v1494_v58, 0.0  ;;  %v5290_v16 = vld [vmem:[%s7276_s3 + $0xe4] ss:$16 sps:$4 sm:$0xff]   ;;  %v5319_v57 = vld [vmem:[%s7276_s3 + $0x300] ss:$16 sps:$4 sm:$0xff]  }
 0x19d   : > { %v1489_v26 = vadd.f32 %v1488_v38, %v6331_v21  ;;  %v1572_v35 = vmax.f32 %v1486_v46, 0.0  ;;  %v5292_v21 = vld [vmem:[%s7276_s3 + $0x284] ss:$16 sps:$4 sm:$0xff]   ;;  %v5325_v53 = vld [vmem:[%s7276_s3 + $0x320] ss:$16 sps:$4 sm:$0xff]  }
 0x19e   : > { %v1575_v43 = vmax.f32 %v1497_v29, 0.0  ;;  %v5328_v41 = vld [vmem:[%s7276_s3 + $0x340] ss:$16 sps:$4 sm:$0xff]   ;;  %v5329_v34 = vld [vmem:[%s7276_s3 + $0x364] ss:$16 sps:$4 sm:$0xff]  }
 0x19f   : > { %v1573_v50 = vmax.f32 %v1489_v26, 0.0  ;;  %3076 = vmatpush1.bf16.msra.mxu1 %v1607_v30  ;;  %v5326_v30 = vld [vmem:[%s7276_s3 + $0x344] ss:$16 sps:$4 sm:$0xff]   ;;  %v5331_v27 = vld [vmem:[%s7276_s3 + $0x360] ss:$16 sps:$4 sm:$0xff]  }
 0x1a0   : > { %v1609_v60 = vpack.c.bf16 %v1575_v43, %v1574_v51  ;;  %3077 = vmatprep.subr.bf16.mxu1 %v7294_v56  ;;  %v5332_v58 = vld [vmem:[%s7276_s3 + $0x384] ss:$16 sps:$4 sm:$0xff]   ;;  %v5334_v39 = vld [vmem:[%s7276_s3 + $0x380] ss:$16 sps:$4 sm:$0xff]   ;;  %v5346_v43 = vld [vmem:[%s7276_s3 + $0xc] ss:$16 sps:$4 sm:$0xff]  }
 0x1a1   : > { %v1608_v13 = vpack.c.bf16 %v1573_v50, %v1572_v35  ;;  %v4937_v44 = vpop.f32.mrb[60].mxu0  ;;  %v5335_v46 = vld [vmem:[%s7276_s3 + $0x3a4] ss:$16 sps:$4 sm:$0xff]   ;;  %v5337_v5 = vld [vmem:[%s7276_s3 + $0x3a0] ss:$16 sps:$4 sm:$0xff]  }
 0x1a2   : > { %v1510_v15 = vadd.f32 %v4937_v44, %v6381_v19  ;;  %v1501_v8 = vpop.f32.mrb[61].mxu0  ;;  %2845 = vmatmul.mubr.bf16.gmra.mrb[88].mxu0 %v5288_v54  ;;  %2949 = vmatmul.mubr.bf16.gmra.mrb[24].mxu1 %v5289_v0  ;;  %v5294_v19 = vld [vmem:[%s7276_s3 + $0xe0] ss:$16 sps:$4 sm:$0xff]   ;;  %v5338_v29 = vld [vmem:[%s7276_s3 + $0x3c4] ss:$16 sps:$4 sm:$0xff]  }
 0x1a3   : > { %v1502_v18 = vadd.f32 %v1501_v8, %v6364_v9  ;;  %v4938_v59 = vpop.f32.mrb[62].mxu0  ;;  %3078 = vmatpush1.bf16.msra.mxu1 %v1608_v13  ;;  %2852 = vmatprep.mubr.bf16.mxu0 %v5290_v16  ;;  %v5295_v9 = vld [vmem:[%s7276_s3 + $0x280] ss:$16 sps:$4 sm:$0xff]   ;;  %v5341_v26 = vld [vmem:[%s7276_s3 + $0x3e4] ss:$16 sps:$4 sm:$0xff]  }
 0x1a4   : > { %v1513_v11 = vadd.f32 %v4938_v59, %v6390_v63  ;;  %v1504_v55 = vpop.f32.mrb[63].mxu0  ;;  %3079 = vmatprep.subr.bf16.mxu1 %v7294_v56  ;;  %2956 = vmatprep.mubr.bf16.mxu1 %v5292_v21  ;;  %v1578_v14 = vmax.f32 %v1510_v15, 0.0  ;;  %v5296_v63 = vld [vmem:[%s7276_s3 + $0x104] ss:$16 sps:$4 sm:$0xff]   ;;  %v5340_v38 = vld [vmem:[%s7276_s3 + $0x3c0] ss:$16 sps:$4 sm:$0xff]  }
 0x1a5   : > { %v1505_v33 = vadd.f32 %v1504_v55, %v6368_v1  ;;  %v1576_v10 = vmax.f32 %v1502_v18, 0.0  ;;  %v5298_v1 = vld [vmem:[%s7276_s3 + $0x2a4] ss:$16 sps:$4 sm:$0xff]   ;;  %v5343_v51 = vld [vmem:[%s7276_s3 + $0x3e0] ss:$16 sps:$4 sm:$0xff]  }
 0x1a6   : > { %v1579_v3 = vmax.f32 %v1513_v11, 0.0  ;;  %v5344_v54 = vld [vmem:[%s7276_s3 + $0x8] ss:$16 sps:$4 sm:$0xff]   ;;  %v5347_v0 = vld [vmem:[%s7276_s3 + $0x2c] ss:$16 sps:$4 sm:$0xff]  }
 0x1a7   : > { %v1577_v22 = vmax.f32 %v1505_v33, 0.0  ;;  %3080 = vmatpush1.bf16.msra.mxu1 %v1609_v60  ;;  %v5349_v35 = vld [vmem:[%s7276_s3 + $0x28] ss:$16 sps:$4 sm:$0xff]   ;;  %v5350_v50 = vld [vmem:[%s7276_s3 + $0x4c] ss:$16 sps:$4 sm:$0xff]  }
 0x1a8   : > { %v1611_v37 = vpack.c.bf16 %v1579_v3, %v1578_v14  ;;  %3081 = vmatprep.subr.bf16.mxu1 %v7294_v56  ;;  %v5352_v16 = vld [vmem:[%s7276_s3 + $0x48] ss:$16 sps:$4 sm:$0xff]   ;;  %v5353_v60 = vld [vmem:[%s7276_s3 + $0x6c] ss:$16 sps:$4 sm:$0xff]  }
 0x1a9   : > { %v1610_v7 = vpack.c.bf16 %v1577_v22, %v1576_v10  ;;  %v5355_v21 = vld [vmem:[%s7276_s3 + $0x68] ss:$16 sps:$4 sm:$0xff]   ;;  %v5356_v13 = vld [vmem:[%s7276_s3 + $0x8c] ss:$16 sps:$4 sm:$0xff]  }
 0x1aa   : > { %2853 = vmatmul.mubr.bf16.gmra.mrb[92].mxu0 %v5294_v19  ;;  %2957 = vmatmul.mubr.bf16.gmra.mrb[28].mxu1 %v5295_v9  ;;  %v5358_v44 = vld [vmem:[%s7276_s3 + $0x88] ss:$16 sps:$4 sm:$0xff]   ;;  %v5359_v15 = vld [vmem:[%s7276_s3 + $0xac] ss:$16 sps:$4 sm:$0xff]  }
 0x1ab   : > { %3082 = vmatpush1.bf16.msra.mxu1 %v1610_v7  ;;  %2860 = vmatprep.mubr.bf16.mxu0 %v5296_v63  ;;  %v5361_v8 = vld [vmem:[%s7276_s3 + $0xa8] ss:$16 sps:$4 sm:$0xff]   ;;  %v5362_v18 = vld [vmem:[%s7276_s3 + $0xcc] ss:$16 sps:$4 sm:$0xff]  }
 0x1ac   : > { %3083 = vmatprep.subr.bf16.mxu1 %v7294_v56  ;;  %2964 = vmatprep.mubr.bf16.mxu1 %v5298_v1  ;;  %v5306_v56 = vld [vmem:[%s7276_s3 + $0x120] ss:$16 sps:$4 sm:$0xff]   ;;  %v5364_v59 = vld [vmem:[%s7276_s3 + $0xc8] ss:$16 sps:$4 sm:$0xff]   ;;  %v5365_v11 = vld [vmem:[%s7276_s3 + $0xec] ss:$16 sps:$4 sm:$0xff]  }
 0x1ad   : > { %v5367_v55 = vld [vmem:[%s7276_s3 + $0xe8] ss:$16 sps:$4 sm:$0xff]   ;;  %v5368_v33 = vld [vmem:[%s7276_s3 + $0x10c] ss:$16 sps:$4 sm:$0xff]  }
 0x1ae   : > { %v5370_v19 = vld [vmem:[%s7276_s3 + $0x108] ss:$16 sps:$4 sm:$0xff]   ;;  %v5371_v10 = vld [vmem:[%s7276_s3 + $0x12c] ss:$16 sps:$4 sm:$0xff]  }
 0x1af   : > { %3084 = vmatpush1.bf16.msra.mxu1 %v1611_v37  ;;  %v5373_v1 = vld [vmem:[%s7276_s3 + $0x128] ss:$16 sps:$4 sm:$0xff]  }
 0x1b2   : > { %2861 = vmatmul.mubr.bf16.gmra.mrb[96].mxu0 %v5300_v12  ;;  %2965 = vmatmul.mubr.bf16.gmra.mrb[32].mxu1 %v5301_v2  ;;  %v5374_v12 = vld [vmem:[%s7276_s3 + $0x14c] ss:$16 sps:$4 sm:$0xff]  }
 0x1b3   : > { %2868 = vmatprep.mubr.bf16.mxu0 %v5302_v62  ;;  %2972 = vmatprep.mubr.bf16.mxu1 %v5304_v32 }
 0x1ba   : > { %2869 = vmatmul.mubr.bf16.gmra.mrb[100].mxu0 %v5306_v56  ;;  %2973 = vmatmul.mubr.bf16.gmra.mrb[36].mxu1 %v5307_v20  ;;  %v5376_v56 = vld [vmem:[%s7276_s3 + $0x148] ss:$16 sps:$4 sm:$0xff]  }
 0x1bb   : > { %2876 = vmatprep.mubr.bf16.mxu0 %v5308_v23  ;;  %2980 = vmatprep.mubr.bf16.mxu1 %v5310_v6  ;;  %v5377_v23 = vld [vmem:[%s7276_s3 + $0x16c] ss:$16 sps:$4 sm:$0xff]  }
 0x1c2   : > { %2877 = vmatmul.mubr.bf16.gmra.mrb[104].mxu0 %v5312_v45  ;;  %2981 = vmatmul.mubr.bf16.gmra.mrb[40].mxu1 %v5313_v17 }
 0x1c3   : > { %2884 = vmatprep.mubr.bf16.mxu0 %v5314_v36  ;;  %2988 = vmatprep.mubr.bf16.mxu1 %v5316_v25  ;;  %v5379_v36 = vld [vmem:[%s7276_s3 + $0x168] ss:$16 sps:$4 sm:$0xff]  }
 0x1ca   : > { %2885 = vmatmul.mubr.bf16.gmra.mrb[108].mxu0 %v5318_v24  ;;  %2989 = vmatmul.mubr.bf16.gmra.mrb[44].mxu1 %v5319_v57  ;;  %v5380_v24 = vld [vmem:[%s7276_s3 + $0x18c] ss:$16 sps:$4 sm:$0xff]  }
 0x1cb   : > { %2892 = vmatprep.mubr.bf16.mxu0 %v5320_v4  ;;  %2996 = vmatprep.mubr.bf16.mxu1 %v5322_v48 }
 0x1d2   : > { %2893 = vmatmul.mubr.bf16.gmra.mrb[112].mxu0 %v5324_v40  ;;  %2997 = vmatmul.mubr.bf16.gmra.mrb[48].mxu1 %v5325_v53  ;;  %v5382_v40 = vld [vmem:[%s7276_s3 + $0x188] ss:$16 sps:$4 sm:$0xff]  }
 0x1d3   : > { %3004 = vmatprep.mubr.bf16.mxu1 %v5326_v30  ;;  %v5383_v30 = vld [vmem:[%s7276_s3 + $0x1ac] ss:$16 sps:$4 sm:$0xff]  }
 0x1da   : > { %3005 = vmatmul.mubr.bf16.gmra.mrb[52].mxu1 %v5328_v41 }
 0x1db   : > { %3012 = vmatprep.mubr.bf16.mxu1 %v5329_v34 }
 0x1e2   : > { %3013 = vmatmul.mubr.bf16.gmra.mrb[56].mxu1 %v5331_v27 }
 0x1e3   : > { %3020 = vmatprep.mubr.bf16.mxu1 %v5332_v58  ;;  %v5385_v58 = vld [vmem:[%s7276_s3 + $0x1a8] ss:$16 sps:$4 sm:$0xff]  }
 0x1ea   : > { %3021 = vmatmul.mubr.bf16.gmra.mrb[60].mxu1 %v5334_v39 }
 0x1eb   : > { %3028 = vmatprep.mubr.bf16.mxu1 %v5335_v46  ;;  %v5386_v46 = vld [vmem:[%s7276_s3 + $0x1cc] ss:$16 sps:$4 sm:$0xff]  }
 0x1f2   : > { %3029 = vmatmul.mubr.bf16.gmra.mrb[64].mxu1 %v5337_v5 }
 0x1f3   : > { %3036 = vmatprep.mubr.bf16.mxu1 %v5338_v29 }
 0x1fa   : > { %3037 = vmatmul.mubr.bf16.gmra.mrb[68].mxu1 %v5340_v38 }
 0x1fb   : > { %3044 = vmatprep.mubr.bf16.mxu1 %v5341_v26  ;;  %v5388_v26 = vld [vmem:[%s7276_s3 + $0x1c8] ss:$16 sps:$4 sm:$0xff]  }
 0x202   : > { %3045 = vmatmul.mubr.bf16.gmra.mrb[72].mxu1 %v5343_v51 }
 0x203   : > { %3085 = vmatprep.mubr.bf16.mxu1 %v5346_v43  ;;  %v5389_v43 = vld [vmem:[%s7276_s3 + $0x1ec] ss:$16 sps:$4 sm:$0xff]  }
 0x20a   : > { %3086 = vmatmul.mubr.bf16.vlgmr.msra.gmra.mrb[76].mxu1 %v5344_v54 }
 0x20b   : > { %3093 = vmatprep.mubr.bf16.mxu1 %v5347_v0 }
 0x212   : > { %3094 = vmatmul.mubr.bf16.gmra.mrb[80].mxu1 %v5349_v35 }
 0x213   : > { %3101 = vmatprep.mubr.bf16.mxu1 %v5350_v50  ;;  %v5391_v50 = vld [vmem:[%s7276_s3 + $0x1e8] ss:$16 sps:$4 sm:$0xff]  }
 0x21a   : > { %3102 = vmatmul.mubr.bf16.gmra.mrb[84].mxu1 %v5352_v16 }
 0x21b   : > { %3109 = vmatprep.mubr.bf16.mxu1 %v5353_v60  ;;  %v5392_v60 = vld [vmem:[%s7276_s3 + $0x20c] ss:$16 sps:$4 sm:$0xff]  }
 0x222   : > { %3110 = vmatmul.mubr.bf16.gmra.mrb[88].mxu1 %v5355_v21 }
 0x223   : > { %3117 = vmatprep.mubr.bf16.mxu1 %v5356_v13 }
 0x22a   : > { %3118 = vmatmul.mubr.bf16.gmra.mrb[92].mxu1 %v5358_v44 }
 0x22b   : > { %3125 = vmatprep.mubr.bf16.mxu1 %v5359_v15  ;;  %v5394_v15 = vld [vmem:[%s7276_s3 + $0x208] ss:$16 sps:$4 sm:$0xff]  }
 0x232   : > { %3126 = vmatmul.mubr.bf16.gmra.mrb[96].mxu1 %v5361_v8 }
 0x233   : > { %3133 = vmatprep.mubr.bf16.mxu1 %v5362_v18  ;;  %v5395_v18 = vld [vmem:[%s7276_s3 + $0x22c] ss:$16 sps:$4 sm:$0xff]  }
 0x23a   : > { %3134 = vmatmul.mubr.bf16.gmra.mrb[100].mxu1 %v5364_v59 }
 0x23b   : > { %3141 = vmatprep.mubr.bf16.mxu1 %v5365_v11 }
 0x242   : > { %3142 = vmatmul.mubr.bf16.gmra.mrb[104].mxu1 %v5367_v55 }
 0x243   : > { %3149 = vmatprep.mubr.bf16.mxu1 %v5368_v33  ;;  %v5397_v33 = vld [vmem:[%s7276_s3 + $0x228] ss:$16 sps:$4 sm:$0xff]  }
 0x245   : > { %v6751_v14 = vpop.f32.mrb[64].mxu0 }
 0x246   : > { %v2800_v3 = vpop.f32.mrb[65].mxu0 }
 0x247   : > { %v6756_v9 = vpop.f32.mrb[66].mxu0 }
 0x248   : > { %v2803_v22 = vpop.f32.mrb[67].mxu0 }
 0x24a   : > { %3150 = vmatmul.mubr.bf16.gmra.mrb[108].mxu1 %v5370_v19  ;;  %v5398_v19 = vld [vmem:[%s7276_s3 + $0x24c] ss:$16 sps:$4 sm:$0xff]  }
 0x24b   : > { %3157 = vmatprep.mubr.bf16.mxu1 %v5371_v10 }
 0x24d   : > { %v6761_v63 = vpop.f32.mrb[68].mxu0 }
 0x24e   : > { %v2808_v37 = vpop.f32.mrb[69].mxu0 }
 0x24f   : > { %v6766_v7 = vpop.f32.mrb[70].mxu0 }
 0x250   : > { %v2811_v2 = vpop.f32.mrb[71].mxu0 }
 0x251   : > { %v5401_v2 = vld [vmem:[%s7276_s3 + $0x26c] ss:$16 sps:$4 sm:$0xff]  }
 0x252   : > { %3158 = vmatmul.mubr.bf16.gmra.mrb[112].mxu1 %v5373_v1  ;;  %v5400_v1 = vld [vmem:[%s7276_s3 + $0x248] ss:$16 sps:$4 sm:$0xff]  }
 0x253   : > { %3165 = vmatprep.mubr.bf16.mxu1 %v5374_v12 }
 0x255   : > { %v6771_v62 = vpop.f32.mrb[72].mxu0 }
 0x256   : > { %v2816_v32 = vpop.f32.mrb[73].mxu0 }
 0x257   : > { %v6776_v20 = vpop.f32.mrb[74].mxu0 }
 0x258   : > { %v2819_v6 = vpop.f32.mrb[75].mxu0 }
 0x259   : > { %v5403_v6 = vld [vmem:[%s7276_s3 + $0x268] ss:$16 sps:$4 sm:$0xff]  }
 0x25a   : > { %3166 = vmatmul.mubr.bf16.gmra.mrb[116].mxu1 %v5376_v56 }
 0x25b   : > { %3173 = vmatprep.mubr.bf16.mxu1 %v5377_v23 }
 0x25d   : > { %v6781_v45 = vpop.f32.mrb[76].mxu0 }
 0x25e   : > { %v2824_v17 = vpop.f32.mrb[77].mxu0 }
 0x25f   : > { %v6786_v25 = vpop.f32.mrb[78].mxu0 }
 0x260   : > { %v2827_v57 = vpop.f32.mrb[79].mxu0 }
 0x262   : > { %3174 = vmatmul.mubr.bf16.gmra.mrb[120].mxu1 %v5379_v36  ;;  %v5404_v36 = vld [vmem:[%s7276_s3 + $0x28c] ss:$16 sps:$4 sm:$0xff]  }
 0x263   : > { %3181 = vmatprep.mubr.bf16.mxu1 %v5380_v24 }
 0x265   : > { %v6791_v4 = vpop.f32.mrb[80].mxu0 }
 0x266   : > { %v2832_v48 = vpop.f32.mrb[81].mxu0 }
 0x267   : > { %v6796_v53 = vpop.f32.mrb[82].mxu0 }
 0x268   : > { %v2835_v41 = vpop.f32.mrb[83].mxu0 }
 0x269   : > { %v5407_v41 = vld [vmem:[%s7276_s3 + $0x2ac] ss:$16 sps:$4 sm:$0xff]  }
 0x26a   : > { %3182 = vmatmul.mubr.bf16.gmra.mrb[124].mxu1 %v5382_v40  ;;  %v5406_v40 = vld [vmem:[%s7276_s3 + $0x288] ss:$16 sps:$4 sm:$0xff]  }
 0x26b   : > { %3189 = vmatprep.mubr.bf16.mxu1 %v5383_v30 }
 0x26d   : > { %v6801_v34 = vpop.f32.mrb[84].mxu0 }
 0x26e   : > { %v2840_v27 = vpop.f32.mrb[85].mxu0 }
 0x26f   : > { %v6806_v39 = vpop.f32.mrb[86].mxu0 }
 0x270   : > { %v2843_v5 = vpop.f32.mrb[87].mxu0 }
 0x271   : > { %v5412_v5 = vld [vmem:[%s7276_s3 + $0x2c8] ss:$16 sps:$4 sm:$0xff]  }
 0x272   : > { %3190 = vmatmul.mubr.bf16.gmra.mrb[0].mxu1 %v5385_v58  ;;  %v5409_v58 = vld [vmem:[%s7276_s3 + $0x2a8] ss:$16 sps:$4 sm:$0xff]  }
 0x273   : > { %3197 = vmatprep.mubr.bf16.mxu1 %v5386_v46  ;;  %v5410_v46 = vld [vmem:[%s7276_s3 + $0x2cc] ss:$16 sps:$4 sm:$0xff]  }
 0x275   : > { %v6811_v29 = vpop.f32.mrb[88].mxu0 }
 0x276   : > { %v2848_v38 = vpop.f32.mrb[89].mxu0 }
 0x277   : > { %v6816_v51 = vpop.f32.mrb[90].mxu0  ;;  %v5413_v38 = vld [vmem:[%s7276_s3 + $0x2ec] ss:$16 sps:$4 sm:$0xff]  }
 0x278   : > { %v2851_v54 = vpop.f32.mrb[91].mxu0 }
 0x279   : > { %v5418_v54 = vld [vmem:[%s7276_s3 + $0x308] ss:$16 sps:$4 sm:$0xff]  }
 0x27a   : > { %3198 = vmatmul.mubr.bf16.gmra.mrb[4].mxu1 %v5388_v26  ;;  %v5415_v26 = vld [vmem:[%s7276_s3 + $0x2e8] ss:$16 sps:$4 sm:$0xff]  }
 0x27b   : > { %3205 = vmatprep.mubr.bf16.mxu1 %v5389_v43  ;;  %v5416_v43 = vld [vmem:[%s7276_s3 + $0x30c] ss:$16 sps:$4 sm:$0xff]  }
 0x27d   : > { %v6821_v0 = vpop.f32.mrb[92].mxu0 }
 0x27e   : > { %v2856_v35 = vpop.f32.mrb[93].mxu0 }
 0x27f   : > { %v6826_v16 = vpop.f32.mrb[94].mxu0  ;;  %v5419_v35 = vld [vmem:[%s7276_s3 + $0x32c] ss:$16 sps:$4 sm:$0xff]  }
 0x280   : > { %v2859_v21 = vpop.f32.mrb[95].mxu0 }
 0x281   : > { %v1822_v21 = vpop.permute.xlu1 %1821 }
 0x282   : > { %3206 = vmatmul.mubr.bf16.gmra.mrb[8].mxu1 %v5391_v50  ;;  %v5421_v50 = vld [vmem:[%s7276_s3 + $0x328] ss:$16 sps:$4 sm:$0xff]  }
 0x283   : > { %3213 = vmatprep.mubr.bf16.mxu1 %v5392_v60  ;;  %v5422_v60 = vld [vmem:[%s7276_s3 + $0x34c] ss:$16 sps:$4 sm:$0xff]  }
 0x285   : > { %v6831_v13 = vpop.f32.mrb[96].mxu0 }
 0x286   : > { %v2864_v44 = vpop.f32.mrb[97].mxu0 }
 0x287   : > { %v6836_v8 = vpop.f32.mrb[98].mxu0  ;;  %v5424_v44 = vld [vmem:[%s7276_s3 + $0x348] ss:$16 sps:$4 sm:$0xff]  }
 0x288   : > { %v2867_v59 = vpop.f32.mrb[99].mxu0 }
 0x289   : > { %v6919_v59 = vpop.permute.xlu1 %1911 }
 0x28a   : > { %3214 = vmatmul.mubr.bf16.gmra.mrb[12].mxu1 %v5394_v15  ;;  %v6914_v15 = vpop.permute.xlu0 %1906 }
 0x28b   : > { %3221 = vmatprep.mubr.bf16.mxu1 %v5395_v18  ;;  %v5425_v18 = vld [vmem:[%s7276_s3 + $0x36c] ss:$16 sps:$4 sm:$0xff]  }
 0x28d   : > { %v6841_v11 = vpop.f32.mrb[100].mxu0 }
 0x28e   : > { %v2872_v55 = vpop.f32.mrb[101].mxu0 }
 0x28f   : > { %v6846_v3 = vpop.f32.mrb[102].mxu0  ;;  %v2799_v55 = vadd.f32 %v6751_v14, %v6418_v28  ;;  %v5442_v28 = vld [vmem:[%s7278_s5 + $0x4] ss:$16 sps:$4 sm:$0xff]  }
 0x290   : > { %v2875_v10 = vpop.f32.mrb[103].mxu0  ;;  %3758 = vmatprep.mubr.bf16.mxu0 %v5442_v28 }
 0x291   : > { %v2802_v10 = vadd.f32 %v6756_v9, %v6427_v49 }
 0x292   : > { %3222 = vmatmul.mubr.bf16.gmra.mrb[16].mxu1 %v5397_v33  ;;  %v1827_v33 = vpop.permute.xlu0 %1826 }
 0x293   : > { %3229 = vmatprep.mubr.bf16.mxu1 %v5398_v19 }
 0x295   : > { %v6851_v22 = vpop.f32.mrb[104].mxu0 }
 0x296   : > { %v2880_v37 = vpop.f32.mrb[105].mxu0 }
 0x297   : > { %v6856_v12 = vpop.f32.mrb[106].mxu0 }
 0x298   : > { %v2883_v32 = vpop.f32.mrb[107].mxu0 }
 0x299   : > { %v1832_v32 = vpop.permute.xlu1 %1831 }
 0x29a   : > { %3230 = vmatmul.mubr.bf16.gmra.mrb[20].mxu1 %v5400_v1 }
 0x29b   : > { %3237 = vmatprep.mubr.bf16.mxu1 %v5401_v2  ;;  %v5427_v2 = vld [vmem:[%s7276_s3 + $0x368] ss:$16 sps:$4 sm:$0xff]  }
 0x29d   : > { %v6861_v56 = vpop.f32.mrb[108].mxu0 }
 0x29e   : > { %v2888_v23 = vpop.f32.mrb[109].mxu0 }
 0x29f   : > { %v6866_v17 = vpop.f32.mrb[110].mxu0 }
 0x2a0   : > { %v2891_v24 = vpop.f32.mrb[111].mxu0 }
 0x2a1   : > { %v6934_v24 = vpop.permute.xlu0 %1916 }
 0x2a2   : > { %3238 = vmatmul.mubr.bf16.gmra.mrb[24].mxu1 %v5403_v6  ;;  %v5428_v6 = vld [vmem:[%s7276_s3 + $0x38c] ss:$16 sps:$4 sm:$0xff]  }
 0x2a3   : > { %3245 = vmatprep.mubr.bf16.mxu1 %v5404_v36 }
 0x2a5   : > { %v6871_v57 = vpop.f32.mrb[112].mxu0 }
 0x2a6   : > { %v2896_v48 = vpop.f32.mrb[113].mxu0 }
 0x2a7   : > { %v6876_v30 = vpop.f32.mrb[114].mxu0  ;;  %v2807_v48 = vadd.f32 %v6761_v63, %v6451_v47  ;;  %v1837_v63 = vpop.permute.xlu0 %1836 }
 0x2a8   : > { %v2899_v27 = vpop.f32.mrb[115].mxu0 }
 0x2aa   : > { %3246 = vmatmul.mubr.bf16.gmra.mrb[28].mxu1 %v5406_v40 }
 0x2ab   : > { %3253 = vmatprep.mubr.bf16.mxu1 %v5407_v41  ;;  %v6940_v41 = vpop.permute.xlu1 %1921 }
 0x2b2   : > { %3254 = vmatmul.mubr.bf16.gmra.mrb[32].mxu1 %v5409_v58  ;;  %v2810_v58 = vadd.f32 %v6766_v7, %v1822_v21  ;;  %v2815_v7 = vadd.f32 %v6771_v62, %v1827_v33 }
 0x2b3   : > { %3261 = vmatprep.mubr.bf16.mxu1 %v5410_v46 }
 0x2ba   : > { %3262 = vmatmul.mubr.bf16.gmra.mrb[36].mxu1 %v5412_v5 }
 0x2bb   : > { %3269 = vmatprep.mubr.bf16.mxu1 %v5413_v38  ;;  %v5430_v38 = vld [vmem:[%s7276_s3 + $0x388] ss:$16 sps:$4 sm:$0xff]  }
 0x2c2   : > { %3270 = vmatmul.mubr.bf16.gmra.mrb[40].mxu1 %v5415_v26 }
 0x2c3   : > { %3277 = vmatprep.mubr.bf16.mxu1 %v5416_v43  ;;  %v5431_v43 = vld [vmem:[%s7276_s3 + $0x3ac] ss:$16 sps:$4 sm:$0xff]  }
 0x2ca   : > { %3278 = vmatmul.mubr.bf16.gmra.mrb[44].mxu1 %v5418_v54 }
 0x2cb   : > { %3285 = vmatprep.mubr.bf16.mxu1 %v5419_v35 }
 0x2d2   : > { %3286 = vmatmul.mubr.bf16.gmra.mrb[48].mxu1 %v5421_v50 }
 0x2d3   : > { %3293 = vmatprep.mubr.bf16.mxu1 %v5422_v60  ;;  %v1842_v60 = vpop.permute.xlu1 %1841 }
 0x2d7   : > { %v6961_v33 = vpop.permute.xlu1 %1931 }
 0x2da   : > { %3294 = vmatmul.mubr.bf16.gmra.mrb[52].mxu1 %v5424_v44 }
 0x2db   : > { %3301 = vmatprep.mubr.bf16.mxu1 %v5425_v18  ;;  %v2818_v18 = vadd.f32 %v6776_v20, %v1832_v32  ;;  %v2823_v20 = vadd.f32 %v6781_v45, %v1837_v63 }
 0x2dd   : > { %v3087_v19 = vpop.f32.mrb[76].mxu1 }
 0x2de   : > { %v3088_v37 = vadd.f32 %v3087_v19, %v2799_v55  ;;  %v3089_v1 = vpop.f32.mrb[77].mxu1 }
 0x2df   : > { %v3090_v23 = vpop.f32.mrb[78].mxu1 }
 0x2e0   : > { %v3091_v14 = vadd.f32 %v3090_v23, %v2802_v10  ;;  %v3092_v36 = vpop.f32.mrb[79].mxu1  ;;  %v3342_v49 = vmax.f32 %v3088_v37, 0.0  ;;  %v5433_v10 = vld [vmem:[%s7276_s3 + $0x3a8] ss:$16 sps:$4 sm:$0xff]   ;;  %v6956_v37 = vpop.permute.xlu0 %1926 }
 0x2e2   : > { %v3343_v9 = vmax.f32 %v3091_v14, 0.0  ;;  %3302 = vmatmul.mubr.bf16.gmra.mrb[56].mxu1 %v5427_v2  ;;  %v5434_v2 = vld [vmem:[%s7276_s3 + $0x3cc] ss:$16 sps:$4 sm:$0xff]  }
 0x2e3   : > { %3309 = vmatprep.mubr.bf16.mxu1 %v5428_v6 }
 0x2e4   : > { %v6938_v40 = vpack.c.bf16 %v3343_v9, %v3342_v49  ;;  %v1847_v14 = vpop.permute.xlu0 %1846  ;;  %v2826_v49 = vadd.f32 %v6786_v25, %v1842_v60 }
 0x2e5   : > { %v3095_v27 = vpop.f32.mrb[80].mxu1  ;;  %v2831_v25 = vadd.f32 %v6791_v4, %v1847_v14 }
 0x2e6   : > { %v3096_v46 = vadd.f32 %v3095_v27, %v2807_v48  ;;  %v3097_v5 = vpop.f32.mrb[81].mxu1  ;;  %v5436_v27 = vld [vmem:[%s7276_s3 + $0x3c8] ss:$16 sps:$4 sm:$0xff]  }
 0x2e7   : > { %v3098_v26 = vpop.f32.mrb[82].mxu1  ;;  %v5437_v5 = vld [vmem:[%s7276_s3 + $0x3ec] ss:$16 sps:$4 sm:$0xff]  }
 0x2e8   : > { %v3099_v54 = vadd.f32 %v3098_v26, %v2810_v58  ;;  %v3100_v47 = vpop.f32.mrb[83].mxu1  ;;  %v3344_v35 = vmax.f32 %v3096_v46, 0.0  ;;  %v1852_v58 = vpop.permute.xlu1 %1851 }
 0x2ea   : > { %v3345_v50 = vmax.f32 %v3099_v54, 0.0  ;;  %3310 = vmatmul.mubr.bf16.gmra.mrb[60].mxu1 %v5430_v38  ;;  %v1857_v54 = vpop.permute.xlu0 %1856 }
 0x2eb   : > { %3317 = vmatprep.mubr.bf16.mxu1 %v5431_v43 }
 0x2ec   : > { %v6950_v21 = vpack.c.bf16 %v3345_v50, %v3344_v35  ;;  %v1862_v63 = vpop.permute.xlu1 %1861  ;;  %v2834_v50 = vadd.f32 %v6796_v53, %v1852_v58 }
 0x2ed   : > { %v3103_v44 = vpop.f32.mrb[84].mxu1 }
 0x2ee   : > { %v3104_v55 = vadd.f32 %v3103_v44, %v2815_v7  ;;  %v3105_v19 = vpop.f32.mrb[85].mxu1  ;;  %v5439_v44 = vld [vmem:[%s7276_s3 + $0x3e8] ss:$16 sps:$4 sm:$0xff]  }
 0x2ef   : > { %v3106_v1 = vpop.f32.mrb[86].mxu1 }
 0x2f0   : > { %v3107_v23 = vadd.f32 %v3106_v1, %v2818_v18  ;;  %v3108_v62 = vpop.f32.mrb[87].mxu1  ;;  %v3346_v6 = vmax.f32 %v3104_v55, 0.0  ;;  %v6982_v4 = vpop.permute.xlu1 %1941 }
 0x2f2   : > { %v3347_v28 = vmax.f32 %v3107_v23, 0.0  ;;  %3318 = vmatmul.mubr.bf16.gmra.mrb[64].mxu1 %v5433_v10  ;;  %v6980_v10 = vpop.permute.xlu0 %1936  ;;  %v2839_v23 = vadd.f32 %v6801_v34, %v1857_v54 }
 0x2f3   : > { %3325 = vmatprep.mubr.bf16.mxu1 %v5434_v2 }
 0x2f4   : > { %v6964_v32 = vpack.c.bf16 %v3347_v28, %v3346_v6  ;;  %v2842_v6 = vadd.f32 %v6806_v39, %v1862_v63 }
 0x2f5   : > { %v3111_v36 = vpop.f32.mrb[88].mxu1 }
 0x2f6   : > { %v3112_v9 = vadd.f32 %v3111_v36, %v2823_v20  ;;  %v3113_v48 = vpop.f32.mrb[89].mxu1  ;;  %v1867_v14 = vpop.permute.xlu0 %1866 }
 0x2f7   : > { %v3114_v46 = vpop.f32.mrb[90].mxu1  ;;  %v1872_v48 = vpop.permute.xlu1 %1871 }
 0x2f8   : > { %v3115_v38 = vadd.f32 %v3114_v46, %v2826_v49  ;;  %v3116_v45 = vpop.f32.mrb[91].mxu1  ;;  %v3348_v26 = vmax.f32 %v3112_v9, 0.0  ;;  %v2847_v46 = vadd.f32 %v6811_v29, %v1867_v14 }
 0x2f9   : > { %v2850_v45 = vadd.f32 %v6816_v51, %v1872_v48 }
 0x2fa   : > { %v3349_v43 = vmax.f32 %v3115_v38, 0.0  ;;  %3326 = vmatmul.mubr.bf16.gmra.mrb[68].mxu1 %v5436_v27  ;;  %v6991_v38 = vpop.permute.xlu0 %1946 }
 0x2fb   : > { %3333 = vmatprep.mubr.bf16.mxu1 %v5437_v5 }
 0x2fc   : > { %v6974_v47 = vpack.c.bf16 %v3349_v43, %v3348_v26  ;;  %v6994_v43 = vpop.permute.xlu1 %1951 }
 0x2fd   : > { %v3119_v35 = vpop.f32.mrb[92].mxu1 }
 0x2fe   : > { %v3120_v60 = vadd.f32 %v3119_v35, %v2831_v25  ;;  %v3121_v7 = vpop.f32.mrb[93].mxu1 }
 0x2ff   : > { %v3122_v18 = vpop.f32.mrb[94].mxu1 }
 0x300   : > { %v3123_v55 = vadd.f32 %v3122_v18, %v2834_v50  ;;  %v3124_v19 = vpop.f32.mrb[95].mxu1  ;;  %v3350_v1 = vmax.f32 %v3120_v60, 0.0  ;;  %v1877_v60 = vpop.permute.xlu0 %1876 }
 0x301   : > { %v2855_v7 = vadd.f32 %v6821_v0, %v1877_v60  ;;  %v2866_v0 = vadd.f32 %v6836_v8, %v6407_v31 }
 0x302   : > { %v3351_v2 = vmax.f32 %v3123_v55, 0.0  ;;  %3334 = vmatmul.mubr.bf16.gmra.mrb[72].mxu1 %v5439_v44  ;;  %v1882_v44 = vpop.permute.xlu1 %1881 }
 0x303   : > { %v2858_v55 = vadd.f32 %v6826_v16, %v1882_v44 }
 0x304   : > { %v6985_v62 = vpack.c.bf16 %v3351_v2, %v3350_v1 }
 0x305   : > { %v3127_v53 = vpop.f32.mrb[96].mxu1 }
 0x306   : > { %v3128_v28 = vadd.f32 %v3127_v53, %v2839_v23  ;;  %v3129_v20 = vpop.f32.mrb[97].mxu1 }
 0x307   : > { %v3130_v36 = vpop.f32.mrb[98].mxu1 }
 0x308   : > { %v3131_v49 = vadd.f32 %v3130_v36, %v2842_v6  ;;  %v3132_v9 = vpop.f32.mrb[99].mxu1  ;;  %v3352_v27 = vmax.f32 %v3128_v28, 0.0  ;;  %v2863_v28 = vadd.f32 %v6831_v13, %v6401_v61  ;;  %v2874_v61 = vadd.f32 %v6846_v3, %v6444_v42 }
 0x30a   : > { %v3353_v58 = vmax.f32 %v3131_v49, 0.0 }
 0x30c   : > { %v6989_v5 = vpack.c.bf16 %v3353_v58, %v3352_v27 }
 0x30d   : > { %v3135_v34 = vpop.f32.mrb[100].mxu1 }
 0x30e   : > { %v3136_v26 = vadd.f32 %v3135_v34, %v2847_v46  ;;  %v3137_v39 = vpop.f32.mrb[101].mxu1  ;;  %v2871_v46 = vadd.f32 %v6841_v11, %v6440_v52  ;;  %v2882_v11 = vadd.f32 %v6856_v12, %v6919_v59 }
 0x30f   : > { %v3138_v54 = vpop.f32.mrb[102].mxu1 }
 0x310   : > { %v3139_v25 = vadd.f32 %v3138_v54, %v2850_v45  ;;  %v3140_v63 = vpop.f32.mrb[103].mxu1  ;;  %v3354_v35 = vmax.f32 %v3136_v26, 0.0 }
 0x311   : > { %v2879_v63 = vadd.f32 %v6851_v22, %v6914_v15  ;;  %v1957_v22 = vpop.permute.xlu0 %1956 }
 0x312   : > { %v3355_v50 = vmax.f32 %v3139_v25, 0.0 }
 0x314   : > { %v6997_v29 = vpack.c.bf16 %v3355_v50, %v3354_v35 }
 0x315   : > { %v3143_v18 = vpop.f32.mrb[104].mxu1 }
 0x316   : > { %v3144_v19 = vadd.f32 %v3143_v18, %v2855_v7  ;;  %v3145_v51 = vpop.f32.mrb[105].mxu1  ;;  %v2887_v18 = vadd.f32 %v6861_v56, %v6934_v24  ;;  %v2895_v56 = vadd.f32 %v6871_v57, %v6956_v37 }
 0x317   : > { %v3146_v1 = vpop.f32.mrb[106].mxu1  ;;  %v1962_v51 = vpop.permute.xlu1 %1961 }
 0x318   : > { %v3147_v2 = vadd.f32 %v3146_v1, %v2858_v55  ;;  %v3148_v23 = vpop.f32.mrb[107].mxu1  ;;  %v3356_v53 = vmax.f32 %v3144_v19, 0.0  ;;  %v2890_v19 = vadd.f32 %v6866_v17, %v6940_v41  ;;  %v2898_v41 = vadd.f32 %v6876_v30, %v6961_v33 }
 0x31a   : > { %v3357_v6 = vmax.f32 %v3147_v2, 0.0 }
 0x31c   : > { %v7002_v20 = vpack.c.bf16 %v3357_v6, %v3356_v53  ;;  %v7021_v6 = vpop.permute.xlu0 %2046 }
 0x31d   : > { %v3151_v14 = vpop.f32.mrb[108].mxu1 }
 0x31e   : > { %v3152_v36 = vadd.f32 %v3151_v14, %v2863_v28  ;;  %v3153_v49 = vpop.f32.mrb[109].mxu1  ;;  %v7025_v28 = vpop.permute.xlu1 %2051 }
 0x31f   : > { %v3154_v9 = vpop.f32.mrb[110].mxu1 }
 0x320   : > { %v3155_v16 = vadd.f32 %v3154_v9, %v2866_v0  ;;  %v3156_v48 = vpop.f32.mrb[111].mxu1  ;;  %v3358_v27 = vmax.f32 %v3152_v36, 0.0  ;;  %v1967_v9 = vpop.permute.xlu0 %1966 }
 0x322   : > { %v3359_v58 = vmax.f32 %v3155_v16, 0.0 }
 0x324   : > { %v3414_v34 = vpack.c.bf16 %v3359_v58, %v3358_v27  ;;  %v1972_v27 = vpop.permute.xlu1 %1971 }
 0x325   : > { %v3159_v45 = vpop.f32.mrb[112].mxu1 }
 0x326   : > { %v3160_v13 = vadd.f32 %v3159_v45, %v2871_v46  ;;  %v3161_v26 = vpop.f32.mrb[113].mxu1  ;;  %4705 = vmatprep.subr.bf16.mxu0 %v3414_v34  ;;  %v7031_v34 = vpop.permute.xlu0 %2056 }
 0x327   : > { %v3162_v39 = vpop.f32.mrb[114].mxu1  ;;  %4706 = vmatpush3.bf16.msra.mxu0 %v6938_v40 }
 0x328   : > { %v3163_v31 = vadd.f32 %v3162_v39, %v2874_v61  ;;  %v3164_v8 = vpop.f32.mrb[115].mxu1  ;;  %v3360_v54 = vmax.f32 %v3160_v13, 0.0  ;;  %v7035_v45 = vpop.permute.xlu1 %2061 }
 0x32a   : > { %v3361_v25 = vmax.f32 %v3163_v31, 0.0  ;;  %v1977_v39 = vpop.permute.xlu0 %1976 }
 0x32c   : > { %v3415_v35 = vpack.c.bf16 %v3361_v25, %v3360_v54  ;;  %v1982_v54 = vpop.permute.xlu1 %1981 }
 0x32d   : > { %v3167_v52 = vpop.f32.mrb[116].mxu1 }
 0x32e   : > { %v3168_v50 = vadd.f32 %v3167_v52, %v2879_v63  ;;  %v3169_v42 = vpop.f32.mrb[117].mxu1  ;;  %4707 = vmatprep.subr.bf16.mxu0 %v3415_v35  ;;  %v7040_v52 = vpop.permute.xlu0 %2066 }
 0x32f   : > { %v3170_v3 = vpop.f32.mrb[118].mxu1  ;;  %4708 = vmatpush3.bf16.msra.mxu0 %v6950_v21 }
 0x330   : > { %v3171_v60 = vadd.f32 %v3170_v3, %v2882_v11  ;;  %v3172_v40 = vpop.f32.mrb[119].mxu1  ;;  %v3362_v7 = vmax.f32 %v3168_v50, 0.0  ;;  %v7042_v50 = vpop.permute.xlu1 %2071 }
 0x332   : > { %v3363_v44 = vmax.f32 %v3171_v60, 0.0 }
 0x334   : > { %v3416_v55 = vpack.c.bf16 %v3363_v44, %v3362_v7 }
 0x335   : > { %v3175_v15 = vpop.f32.mrb[120].mxu1 }
 0x336   : > { %v3176_v12 = vadd.f32 %v3175_v15, %v2887_v18  ;;  %v3177_v59 = vpop.f32.mrb[121].mxu1  ;;  %4709 = vmatprep.subr.bf16.mxu0 %v3416_v55  ;;  %v1992_v18 = vpop.permute.xlu1 %1991 }
 0x337   : > { %v3178_v1 = vpop.f32.mrb[122].mxu1  ;;  %4710 = vmatpush3.bf16.msra.mxu0 %v6964_v32 }
 0x338   : > { %v3179_v21 = vadd.f32 %v3178_v1, %v2890_v19  ;;  %v3180_v2 = vpop.f32.mrb[123].mxu1  ;;  %v3364_v23 = vmax.f32 %v3176_v12, 0.0 }
 0x33a   : > { %v3365_v53 = vmax.f32 %v3179_v21, 0.0  ;;  %v7054_v2 = vpop.permute.xlu1 %2081 }
 0x33c   : > { %v3417_v24 = vpack.c.bf16 %v3365_v53, %v3364_v23 }
 0x33d   : > { %v3183_v17 = vpop.f32.mrb[124].mxu1 }
 0x33e   : > { %v3184_v14 = vadd.f32 %v3183_v17, %v2895_v56  ;;  %v3185_v0 = vpop.f32.mrb[125].mxu1  ;;  %4711 = vmatprep.subr.bf16.mxu0 %v3417_v24 }
 0x33f   : > { %v3186_v32 = vpop.f32.mrb[126].mxu1  ;;  %4712 = vmatpush3.bf16.msra.mxu0 %v6974_v47  ;;  %v2002_v0 = vpop.permute.xlu1 %2001 }
 0x340   : > { %v3187_v36 = vadd.f32 %v3186_v32, %v2898_v41  ;;  %v3188_v49 = vpop.f32.mrb[127].mxu1  ;;  %v3366_v16 = vmax.f32 %v3184_v14, 0.0 }
 0x342   : > { %v3367_v48 = vmax.f32 %v3187_v36, 0.0  ;;  %v5446_v36 = vld [vmem:[%s7278_s5 + $0x44] ss:$16 sps:$4 sm:$0xff]  }
 0x344   : > { %v3418_v57 = vpack.c.bf16 %v3367_v48, %v3366_v16 }
 0x345   : > { %v3191_v37 = vpop.f32.mrb[0].mxu1 }
 0x346   : > { %v5075_v58 = vadd.f32 %v3191_v37, %v6980_v10  ;;  %v3193_v46 = vpop.f32.mrb[1].mxu1  ;;  %4713 = vmatprep.subr.bf16.mxu0 %v3418_v57  ;;  %v7068_v37 = vpop.permute.xlu1 %2091 }
 0x347   : > { %v3194_v30 = vpop.f32.mrb[2].mxu1  ;;  %4714 = vmatpush3.bf16.msra.mxu0 %v6985_v62 }
 0x348   : > { %v5076_v33 = vadd.f32 %v3194_v30, %v6982_v4  ;;  %v3196_v47 = vpop.f32.mrb[3].mxu1  ;;  %v3368_v61 = vmax.f32 %v5075_v58, 0.0 }
 0x34a   : > { %v3369_v13 = vmax.f32 %v5076_v33, 0.0  ;;  %v5448_v33 = vld [vmem:[%s7278_s5 + $0x40] ss:$16 sps:$4 sm:$0xff]  }
 0x34c   : > { %v3419_v26 = vpack.c.bf16 %v3369_v13, %v3368_v61  ;;  %v5449_v61 = vld [vmem:[%s7278_s5 + $0x64] ss:$16 sps:$4 sm:$0xff]  }
 0x34d   : > { %v3199_v31 = vpop.f32.mrb[4].mxu1 }
 0x34e   : > { %v5077_v8 = vadd.f32 %v3199_v31, %v6991_v38  ;;  %v3201_v10 = vpop.f32.mrb[5].mxu1  ;;  %4715 = vmatprep.subr.bf16.mxu0 %v3419_v26 }
 0x34f   : > { %v3202_v25 = vpop.f32.mrb[6].mxu1  ;;  %4716 = vmatpush3.bf16.msra.mxu0 %v6989_v5  ;;  %v1987_v5 = vpop.permute.xlu0 %1986 }
 0x350   : > { %v5078_v62 = vadd.f32 %v3202_v25, %v6994_v43  ;;  %v3204_v63 = vpop.f32.mrb[7].mxu1  ;;  %v3370_v4 = vmax.f32 %v5077_v8, 0.0  ;;  %v2012_v10 = vpop.permute.xlu1 %2011 }
 0x352   : > { %v3371_v35 = vmax.f32 %v5078_v62, 0.0 }
 0x353   : > { %v7048_v59 = vpop.permute.xlu0 %2076 }
 0x354   : > { %v3420_v11 = vpack.c.bf16 %v3371_v35, %v3370_v4  ;;  %v5451_v4 = vld [vmem:[%s7278_s5 + $0x60] ss:$16 sps:$4 sm:$0xff]  }
 0x355   : > { %v3207_v42 = vpop.f32.mrb[8].mxu1 }
 0x356   : > { %v5079_v3 = vadd.f32 %v3207_v42, %v1957_v22  ;;  %v3209_v60 = vpop.f32.mrb[9].mxu1  ;;  %4717 = vmatprep.subr.bf16.mxu0 %v3420_v11  ;;  %v5440_v22 = vld [vmem:[%s7278_s5] ss:$16 sps:$4 sm:$0xff]   ;;  %v5452_v42 = vld [vmem:[%s7278_s5 + $0x84] ss:$16 sps:$4 sm:$0xff]  }
 0x357   : > { %v3210_v38 = vpop.f32.mrb[10].mxu1  ;;  %4718 = vmatpush3.bf16.msra.mxu0 %v6997_v29  ;;  %v5443_v29 = vld [vmem:[%s7278_s5 + $0x24] ss:$16 sps:$4 sm:$0xff]   ;;  %v1997_v24 = vpop.permute.xlu0 %1996 }
 0x358   : > { %v5080_v40 = vadd.f32 %v3210_v38, %v1962_v51  ;;  %v3212_v7 = vpop.f32.mrb[11].mxu1  ;;  %v3372_v44 = vmax.f32 %v5079_v3, 0.0  ;;  %v7086_v38 = vpop.permute.xlu1 %2101 }
 0x35a   : > { %v3373_v43 = vmax.f32 %v5080_v40, 0.0 }
 0x35c   : > { %v3421_v55 = vpack.c.bf16 %v3373_v43, %v3372_v44 }
 0x35d   : > { %v3215_v15 = vpop.f32.mrb[12].mxu1 }
 0x35e   : > { %v5081_v19 = vadd.f32 %v3215_v15, %v1967_v9  ;;  %v3217_v12 = vpop.f32.mrb[13].mxu1  ;;  %4719 = vmatprep.subr.bf16.mxu0 %v3421_v55  ;;  %v5454_v15 = vld [vmem:[%s7278_s5 + $0x80] ss:$16 sps:$4 sm:$0xff]  }
 0x35f   : > { %v3218_v1 = vpop.f32.mrb[14].mxu1  ;;  %4720 = vmatpush3.bf16.msra.mxu0 %v7002_v20  ;;  %v5445_v20 = vld [vmem:[%s7278_s5 + $0x20] ss:$16 sps:$4 sm:$0xff]  }
 0x360   : > { %v5082_v51 = vadd.f32 %v3218_v1, %v1972_v27  ;;  %v3220_v21 = vpop.f32.mrb[15].mxu1  ;;  %v3374_v23 = vmax.f32 %v5081_v19, 0.0  ;;  %v7064_v27 = vpop.permute.xlu0 %2086 }
 0x361   : > { %v2022_v19 = vpop.permute.xlu1 %2021 }
 0x362   : > { %v3375_v53 = vmax.f32 %v5082_v51, 0.0  ;;  %3759 = vmatmul.mubr.bf16.vlgmr.msra.gmra.mrb[116].mxu0 %v5440_v22  ;;  %v5455_v22 = vld [vmem:[%s7278_s5 + $0xa4] ss:$16 sps:$4 sm:$0xff]  }
 0x363   : > { %3766 = vmatprep.mubr.bf16.mxu0 %v5443_v29 }
 0x364   : > { %v7056_v56 = vpack.c.bf16 %v3375_v53, %v3374_v23 }
 0x365   : > { %v3223_v17 = vpop.f32.mrb[16].mxu1 }
 0x366   : > { %v5083_v41 = vadd.f32 %v3223_v17, %v1977_v39  ;;  %v3225_v14 = vpop.f32.mrb[17].mxu1  ;;  %v2007_v39 = vpop.permute.xlu0 %2006 }
 0x367   : > { %v3226_v32 = vpop.f32.mrb[18].mxu1 }
 0x368   : > { %v5084_v49 = vadd.f32 %v3226_v32, %v1982_v54  ;;  %v3228_v9 = vpop.f32.mrb[19].mxu1  ;;  %v3376_v16 = vmax.f32 %v5083_v41, 0.0  ;;  %v5458_v32 = vld [vmem:[%s7278_s5 + $0xc4] ss:$16 sps:$4 sm:$0xff]  }
 0x36a   : > { %v3377_v48 = vmax.f32 %v5084_v49, 0.0  ;;  %3767 = vmatmul.mubr.bf16.gmra.mrb[120].mxu0 %v5445_v20  ;;  %v7081_v35 = vpop.permute.xlu0 %2096  ;;  %v5457_v20 = vld [vmem:[%s7278_s5 + $0xa0] ss:$16 sps:$4 sm:$0xff]  }
 0x36b   : > { %3774 = vmatprep.mubr.bf16.mxu0 %v5446_v36 }
 0x36c   : > { %v7066_v57 = vpack.c.bf16 %v3377_v48, %v3376_v16 }
 0x36d   : > { %v3231_v58 = vpop.f32.mrb[20].mxu1 }
 0x36e   : > { %v5085_v46 = vadd.f32 %v3231_v58, %v1987_v5  ;;  %v3233_v30 = vpop.f32.mrb[21].mxu1  ;;  %v2017_v44 = vpop.permute.xlu0 %2016 }
 0x36f   : > { %v3234_v47 = vpop.f32.mrb[22].mxu1 }
 0x370   : > { %v5086_v13 = vadd.f32 %v3234_v47, %v1992_v18  ;;  %v3236_v26 = vpop.f32.mrb[23].mxu1  ;;  %v3378_v31 = vmax.f32 %v5085_v46, 0.0 }
 0x372   : > { %v3379_v8 = vmax.f32 %v5086_v13, 0.0  ;;  %3775 = vmatmul.mubr.bf16.gmra.mrb[124].mxu0 %v5448_v33  ;;  %v7096_v23 = vpop.permute.xlu0 %2106 }
 0x373   : > { %3782 = vmatprep.mubr.bf16.mxu0 %v5449_v61  ;;  %v5460_v61 = vld [vmem:[%s7278_s5 + $0xc0] ss:$16 sps:$4 sm:$0xff]  }
 0x374   : > { %v7076_v54 = vpack.c.bf16 %v3379_v8, %v3378_v31 }
 0x375   : > { %v3239_v25 = vpop.f32.mrb[24].mxu1 }
 0x376   : > { %v5087_v62 = vadd.f32 %v3239_v25, %v1997_v24  ;;  %v3241_v63 = vpop.f32.mrb[25].mxu1  ;;  %v7100_v24 = vpop.permute.xlu1 %2111 }
 0x377   : > { %v3242_v11 = vpop.f32.mrb[26].mxu1  ;;  %v2027_v9 = vpop.permute.xlu0 %2026 }
 0x378   : > { %v5088_v3 = vadd.f32 %v3242_v11, %v2002_v0  ;;  %v3244_v60 = vpop.f32.mrb[27].mxu1  ;;  %v3380_v40 = vmax.f32 %v5087_v62, 0.0 }
 0x379   : > { %v5463_v60 = vld [vmem:[%s7278_s5 + $0xe0] ss:$16 sps:$4 sm:$0xff]  }
 0x37a   : > { %v3381_v7 = vmax.f32 %v5088_v3, 0.0  ;;  %3783 = vmatmul.mubr.bf16.gmra.mrb[128].mxu0 %v5451_v4  ;;  %v2032_v58 = vpop.permute.xlu1 %2031 }
 0x37b   : > { %3790 = vmatprep.mubr.bf16.mxu0 %v5452_v42  ;;  %v7113_v13 = vpop.permute.xlu0 %2116 }
 0x37c   : > { %v7088_v5 = vpack.c.bf16 %v3381_v7, %v3380_v40 }
 0x37d   : > { %v3247_v43 = vpop.f32.mrb[28].mxu1 }
 0x37e   : > { %v5089_v18 = vadd.f32 %v3247_v43, %v2007_v39  ;;  %v3249_v55 = vpop.f32.mrb[29].mxu1  ;;  %v5461_v39 = vld [vmem:[%s7278_s5 + $0xe4] ss:$16 sps:$4 sm:$0xff]  }
 0x37f   : > { %v3250_v12 = vpop.f32.mrb[30].mxu1  ;;  %v2037_v4 = vpop.permute.xlu0 %2036 }
 0x380   : > { %v5090_v1 = vadd.f32 %v3250_v12, %v2012_v10  ;;  %v3252_v29 = vpop.f32.mrb[31].mxu1  ;;  %v3382_v51 = vmax.f32 %v5089_v18, 0.0  ;;  %v7118_v10 = vpop.permute.xlu1 %2121 }
 0x382   : > { %v3383_v21 = vmax.f32 %v5090_v1, 0.0  ;;  %3791 = vmatmul.mubr.bf16.gmra.mrb[132].mxu0 %v5454_v15 }
 0x383   : > { %3798 = vmatprep.mubr.bf16.mxu0 %v5455_v22 }
 0x384   : > { %v7098_v53 = vpack.c.bf16 %v3383_v21, %v3382_v51  ;;  %v2042_v40 = vpop.permute.xlu1 %2041 }
 0x385   : > { %v3255_v17 = vpop.f32.mrb[32].mxu1 }
 0x386   : > { %v5091_v41 = vadd.f32 %v3255_v17, %v2017_v44  ;;  %v3257_v14 = vpop.f32.mrb[33].mxu1  ;;  %v5466_v44 = vld [vmem:[%s7278_s5 + $0xc] ss:$16 sps:$4 sm:$0xff]  }
 0x387   : > { %v3258_v0 = vpop.f32.mrb[34].mxu1 }
 0x388   : > { %v5092_v36 = vadd.f32 %v3258_v0, %v2022_v19  ;;  %v3260_v49 = vpop.f32.mrb[35].mxu1  ;;  %v3384_v16 = vmax.f32 %v5091_v41, 0.0 }
 0x38a   : > { %v3385_v48 = vmax.f32 %v5092_v36, 0.0  ;;  %3799 = vmatmul.mubr.bf16.gmra.mrb[136].mxu0 %v5457_v20 }
 0x38b   : > { %3806 = vmatprep.mubr.bf16.mxu0 %v5458_v32 }
 0x38c   : > { %v7108_v46 = vpack.c.bf16 %v3385_v48, %v3384_v16 }
 0x38d   : > { %v3263_v30 = vpop.f32.mrb[36].mxu1 }
 0x38e   : > { %v5093_v33 = vadd.f32 %v3263_v30, %v2027_v9  ;;  %v3265_v47 = vpop.f32.mrb[37].mxu1 }
 0x38f   : > { %v3266_v26 = vpop.f32.mrb[38].mxu1 }
 0x390   : > { %v5094_v31 = vadd.f32 %v3266_v26, %v2032_v58  ;;  %v3268_v8 = vpop.f32.mrb[39].mxu1  ;;  %v3386_v25 = vmax.f32 %v5093_v33, 0.0 }
 0x392   : > { %v3387_v62 = vmax.f32 %v5094_v31, 0.0  ;;  %3807 = vmatmul.mubr.bf16.gmra.mrb[140].mxu0 %v5460_v61 }
 0x393   : > { %3814 = vmatprep.mubr.bf16.mxu0 %v5461_v39 }
 0x394   : > { %v7120_v63 = vpack.c.bf16 %v3387_v62, %v3386_v25 }
 0x395   : > { %v3271_v11 = vpop.f32.mrb[40].mxu1 }
 0x396   : > { %v5095_v42 = vadd.f32 %v3271_v11, %v2037_v4  ;;  %v3273_v3 = vpop.f32.mrb[41].mxu1 }
 0x397   : > { %v3274_v7 = vpop.f32.mrb[42].mxu1 }
 0x398   : > { %v5096_v43 = vadd.f32 %v3274_v7, %v2042_v40  ;;  %v3276_v18 = vpop.f32.mrb[43].mxu1  ;;  %v3388_v55 = vmax.f32 %v5095_v42, 0.0 }
 0x39a   : > { %v3389_v15 = vmax.f32 %v5096_v43, 0.0  ;;  %3815 = vmatmul.mubr.bf16.gmra.mrb[144].mxu0 %v5463_v60 }
 0x39b   : > { %3855 = vmatprep.mubr.bf16.mxu0 %v5466_v44 }
 0x39c   : > { %v7128_v19 = vpack.c.bf16 %v3389_v15, %v3388_v55 }
 0x39d   : > { %v3279_v12 = vpop.f32.mrb[44].mxu1 }
 0x39e   : > { %v5097_v22 = vadd.f32 %v3279_v12, %v7021_v6  ;;  %v3281_v1 = vpop.f32.mrb[45].mxu1 }
 0x39f   : > { %v3282_v29 = vpop.f32.mrb[46].mxu1 }
 0x3a0   : > { %v5098_v51 = vadd.f32 %v3282_v29, %v7025_v28  ;;  %v3284_v21 = vpop.f32.mrb[47].mxu1  ;;  %v3390_v17 = vmax.f32 %v5097_v22, 0.0 }
 0x3a2   : > { %v3391_v41 = vmax.f32 %v5098_v51, 0.0 }
 0x3a4   : > { %v3430_v14 = vpack.c.bf16 %v3391_v41, %v3390_v17 }
 0x3a5   : > { %v3287_v20 = vpop.f32.mrb[48].mxu1 }
 0x3a6   : > { %v5099_v0 = vadd.f32 %v3287_v20, %v7031_v34  ;;  %v3289_v32 = vpop.f32.mrb[49].mxu1  ;;  %4769 = vmatprep.subr.bf16.mxu0 %v3430_v14 }
 0x3a7   : > { %v3290_v36 = vpop.f32.mrb[50].mxu1  ;;  %4770 = vmatpush3.bf16.msra.mxu0 %v7056_v56 }
 0x3a8   : > { %v5100_v49 = vadd.f32 %v3290_v36, %v7035_v45  ;;  %v3292_v9 = vpop.f32.mrb[51].mxu1  ;;  %v3392_v6 = vmax.f32 %v5099_v0, 0.0 }
 0x3a9   : > { %v5475_v9 = vld [vmem:[%s7278_s5 + $0x68] ss:$16 sps:$4 sm:$0xff]  }
 0x3aa   : > { %v3393_v16 = vmax.f32 %v5100_v49, 0.0  ;;  %v5473_v49 = vld [vmem:[%s7278_s5 + $0x6c] ss:$16 sps:$4 sm:$0xff]  }
 0x3ac   : > { %v3431_v48 = vpack.c.bf16 %v3393_v16, %v3392_v6  ;;  %v5476_v6 = vld [vmem:[%s7278_s5 + $0x8c] ss:$16 sps:$4 sm:$0xff]   ;;  %v5478_v16 = vld [vmem:[%s7278_s5 + $0x88] ss:$16 sps:$4 sm:$0xff]  }
 0x3ad   : > { %v3295_v58 = vpop.f32.mrb[52].mxu1 }
 0x3ae   : > { %v5101_v28 = vadd.f32 %v3295_v58, %v7040_v52  ;;  %v3297_v30 = vpop.f32.mrb[53].mxu1  ;;  %4771 = vmatprep.subr.bf16.mxu0 %v3431_v48  ;;  %v5479_v48 = vld [vmem:[%s7278_s5 + $0xac] ss:$16 sps:$4 sm:$0xff]   ;;  %v5481_v58 = vld [vmem:[%s7278_s5 + $0xa8] ss:$16 sps:$4 sm:$0xff]  }
 0x3af   : > { %v3298_v33 = vpop.f32.mrb[54].mxu1  ;;  %4772 = vmatpush3.bf16.msra.mxu0 %v7066_v57  ;;  %v5484_v30 = vld [vmem:[%s7278_s5 + $0xc8] ss:$16 sps:$4 sm:$0xff]  }
 0x3b0   : > { %v5102_v34 = vadd.f32 %v3298_v33, %v7042_v50  ;;  %v3300_v47 = vpop.f32.mrb[55].mxu1  ;;  %v3394_v61 = vmax.f32 %v5101_v28, 0.0  ;;  %v5482_v28 = vld [vmem:[%s7278_s5 + $0xcc] ss:$16 sps:$4 sm:$0xff]  }
 0x3b1   : > { %v5485_v33 = vld [vmem:[%s7278_s5 + $0xec] ss:$16 sps:$4 sm:$0xff]  }
 0x3b2   : > { %v3395_v26 = vmax.f32 %v5102_v34, 0.0  ;;  %v5487_v34 = vld [vmem:[%s7278_s5 + $0xe8] ss:$16 sps:$4 sm:$0xff]  }
 0x3b4   : > { %v3432_v56 = vpack.c.bf16 %v3395_v26, %v3394_v61 }
 0x3b5   : > { %v3303_v39 = vpop.f32.mrb[56].mxu1 }
 0x3b6   : > { %v5103_v45 = vadd.f32 %v3303_v39, %v7048_v59  ;;  %v3305_v31 = vpop.f32.mrb[57].mxu1  ;;  %4773 = vmatprep.subr.bf16.mxu0 %v3432_v56 }
 0x3b7   : > { %v3306_v8 = vpop.f32.mrb[58].mxu1  ;;  %4774 = vmatpush3.bf16.msra.mxu0 %v7076_v54 }
 0x3b8   : > { %v5104_v52 = vadd.f32 %v3306_v8, %v7054_v2  ;;  %v3308_v25 = vpop.f32.mrb[59].mxu1  ;;  %v3396_v62 = vmax.f32 %v5103_v45, 0.0 }
 0x3ba   : > { %v3397_v4 = vmax.f32 %v5104_v52, 0.0 }
 0x3bc   : > { %v3433_v57 = vpack.c.bf16 %v3397_v4, %v3396_v62 }
 0x3bd   : > { %v3311_v11 = vpop.f32.mrb[60].mxu1 }
 0x3be   : > { %v5105_v50 = vadd.f32 %v3311_v11, %v7064_v27  ;;  %v3313_v42 = vpop.f32.mrb[61].mxu1  ;;  %4775 = vmatprep.subr.bf16.mxu0 %v3433_v57 }
 0x3bf   : > { %v3314_v3 = vpop.f32.mrb[62].mxu1  ;;  %4776 = vmatpush3.bf16.msra.mxu0 %v7088_v5 }
 0x3c0   : > { %v5106_v59 = vadd.f32 %v3314_v3, %v7068_v37  ;;  %v3316_v60 = vpop.f32.mrb[63].mxu1  ;;  %v3398_v40 = vmax.f32 %v5105_v50, 0.0 }
 0x3c2   : > { %v3399_v7 = vmax.f32 %v5106_v59, 0.0 }
 0x3c4   : > { %v3434_v54 = vpack.c.bf16 %v3399_v7, %v3398_v40 }
 0x3c5   : > { %v3319_v44 = vpop.f32.mrb[64].mxu1 }
 0x3c6   : > { %v5107_v2 = vadd.f32 %v3319_v44, %v7081_v35  ;;  %v3321_v43 = vpop.f32.mrb[65].mxu1  ;;  %4777 = vmatprep.subr.bf16.mxu0 %v3434_v54 }
 0x3c7   : > { %v3322_v18 = vpop.f32.mrb[66].mxu1  ;;  %4778 = vmatpush3.bf16.msra.mxu0 %v7098_v53 }
 0x3c8   : > { %v5108_v27 = vadd.f32 %v3322_v18, %v7086_v38  ;;  %v3324_v55 = vpop.f32.mrb[67].mxu1  ;;  %v3400_v15 = vmax.f32 %v5107_v2, 0.0 }
 0x3ca   : > { %v3401_v12 = vmax.f32 %v5108_v27, 0.0 }
 0x3cc   : > { %v3435_v5 = vpack.c.bf16 %v3401_v12, %v3400_v15 }
 0x3cd   : > { %v3327_v22 = vpop.f32.mrb[68].mxu1 }
 0x3ce   : > { %v5109_v37 = vadd.f32 %v3327_v22, %v7096_v23  ;;  %v3329_v1 = vpop.f32.mrb[69].mxu1  ;;  %4779 = vmatprep.subr.bf16.mxu0 %v3435_v5 }
 0x3cf   : > { %v3330_v29 = vpop.f32.mrb[70].mxu1  ;;  %4780 = vmatpush3.bf16.msra.mxu0 %v7108_v46 }
 0x3d0   : > { %v5110_v35 = vadd.f32 %v3330_v29, %v7100_v24  ;;  %v3332_v51 = vpop.f32.mrb[71].mxu1  ;;  %v3402_v21 = vmax.f32 %v5109_v37, 0.0  ;;  %v5464_v24 = vld [vmem:[%s7278_s5 + $0x8] ss:$16 sps:$4 sm:$0xff]  }
 0x3d2   : > { %v3403_v17 = vmax.f32 %v5110_v35, 0.0 }
 0x3d4   : > { %v3436_v53 = vpack.c.bf16 %v3403_v17, %v3402_v21 }
 0x3d5   : > { %v3335_v41 = vpop.f32.mrb[72].mxu1 }
 0x3d6   : > { %v5111_v38 = vadd.f32 %v3335_v41, %v7113_v13  ;;  %v3337_v14 = vpop.f32.mrb[73].mxu1  ;;  %4781 = vmatprep.subr.bf16.mxu0 %v3436_v53  ;;  %v5467_v13 = vld [vmem:[%s7278_s5 + $0x2c] ss:$16 sps:$4 sm:$0xff]  }
 0x3d7   : > { %v3338_v20 = vpop.f32.mrb[74].mxu1  ;;  %4782 = vmatpush3.bf16.msra.mxu0 %v7120_v63  ;;  %v5470_v63 = vld [vmem:[%s7278_s5 + $0x4c] ss:$16 sps:$4 sm:$0xff]  }
 0x3d8   : > { %v5112_v23 = vadd.f32 %v3338_v20, %v7118_v10  ;;  %v3340_v0 = vpop.f32.mrb[75].mxu1  ;;  %v3404_v32 = vmax.f32 %v5111_v38, 0.0  ;;  %v5469_v10 = vld [vmem:[%s7278_s5 + $0x28] ss:$16 sps:$4 sm:$0xff]  }
 0x3da   : > { %v3405_v36 = vmax.f32 %v5112_v23, 0.0 }
 0x3dc   : > { %v3437_v46 = vpack.c.bf16 %v3405_v36, %v3404_v32 }
 0x3de   : > { %4783 = vmatprep.subr.bf16.mxu0 %v3437_v46  ;;  %v5488_v46 = vld [vmem:[%s7280_s7] sm:$0xff]  }
 0x3df   : > { %4784 = vmatpush3.bf16.msra.mxu0 %v7128_v19  ;;  %v5472_v19 = vld [vmem:[%s7278_s5 + $0x48] ss:$16 sps:$4 sm:$0xff]  }
 0x3e2   : > { %3856 = vmatmul.mubr.bf16.vlgmr.msra.gmra.mrb[148].mxu0 %v5464_v24 }
 0x3e3   : > { %3863 = vmatprep.mubr.bf16.mxu0 %v5467_v13  ;;  %v3489_v13 = vpop.permute.xlu0 %3488 }
 0x3ea   : > { %3864 = vmatmul.mubr.bf16.gmra.mrb[152].mxu0 %v5469_v10 }
 0x3eb   : > { %3871 = vmatprep.mubr.bf16.mxu0 %v5470_v63 }
 0x3f2   : > { %3872 = vmatmul.mubr.bf16.gmra.mrb[156].mxu0 %v5472_v19 }
 0x3f3   : > { %3879 = vmatprep.mubr.bf16.mxu0 %v5473_v49 }
 0x3fa   : > { %3880 = vmatmul.mubr.bf16.gmra.mrb[160].mxu0 %v5475_v9  ;;  %v3494_v9 = vpop.permute.xlu1 %3493 }
 0x3fb   : > { %3887 = vmatprep.mubr.bf16.mxu0 %v5476_v6 }
 0x402   : > { %3888 = vmatmul.mubr.bf16.gmra.mrb[164].mxu0 %v5478_v16 }
 0x403   : > { %3895 = vmatprep.mubr.bf16.mxu0 %v5479_v48 }
 0x40a   : > { %3896 = vmatmul.mubr.bf16.gmra.mrb[168].mxu0 %v5481_v58 }
 0x40b   : > { %3903 = vmatprep.mubr.bf16.mxu0 %v5482_v28 }
 0x412   : > { %3904 = vmatmul.mubr.bf16.gmra.mrb[172].mxu0 %v5484_v30 }
 0x413   : > { %3911 = vmatprep.mubr.bf16.mxu0 %v5485_v33 }
 0x41a   : > { %3912 = vmatmul.mubr.bf16.gmra.mrb[176].mxu0 %v5487_v34 }
 0x41b   : > { %4955 = vmatprep.mubr.bf16.mxu0 %v5488_v46 }
 0x435   : > { %v4721_v47 = vpop.f32.mrb[116].mxu0 }
 0x436   : > { %v4722_v61 = vpop.f32.mrb[117].mxu0 }
 0x437   : > { %v4723_v26 = vadd.f32 %v4722_v61, %v4721_v47  ;;  %v4724_v56 = vpop.f32.mrb[118].mxu0  ;;  %v3499_v47 = vpop.permute.xlu0 %3498 }
 0x438   : > { %v4725_v39 = vpop.f32.mrb[119].mxu0 }
 0x439   : > { %v4726_v45 = vadd.f32 %v4725_v39, %v4724_v56  ;;  %v3761_v63 = vadd.f32 %v4723_v26, %v3489_v13 }
 0x43b   : > { %v3764_v16 = vadd.f32 %v4726_v45, %v3494_v9 }
 0x43d   : > { %v4727_v31 = vpop.f32.mrb[120].mxu0 }
 0x43e   : > { %v4728_v8 = vpop.f32.mrb[121].mxu0 }
 0x43f   : > { %v4729_v52 = vadd.f32 %v4728_v8, %v4727_v31  ;;  %v4730_v25 = vpop.f32.mrb[122].mxu0 }
 0x440   : > { %v4731_v62 = vpop.f32.mrb[123].mxu0 }
 0x441   : > { %v4732_v4 = vadd.f32 %v4731_v62, %v4730_v25  ;;  %v3769_v56 = vadd.f32 %v4729_v52, %v3499_v47  ;;  %v3504_v25 = vpop.permute.xlu1 %3503 }
 0x443   : > { %v3772_v26 = vadd.f32 %v4732_v4, %v3504_v25 }
 0x445   : > { %v4733_v57 = vpop.f32.mrb[124].mxu0 }
 0x446   : > { %v4734_v11 = vpop.f32.mrb[125].mxu0 }
 0x447   : > { %v7199_v50 = vadd.f32 %v4734_v11, %v4733_v57  ;;  %v4736_v42 = vpop.f32.mrb[126].mxu0 }
 0x448   : > { %v4737_v3 = vpop.f32.mrb[127].mxu0 }
 0x449   : > { %v7201_v59 = vadd.f32 %v4737_v3, %v4736_v42 }
 0x44d   : > { %v4739_v60 = vpop.f32.mrb[128].mxu0 }
 0x44e   : > { %v4740_v40 = vpop.f32.mrb[129].mxu0 }
 0x44f   : > { %v7203_v7 = vadd.f32 %v4740_v40, %v4739_v60  ;;  %v4742_v54 = vpop.f32.mrb[130].mxu0  ;;  %v3509_v40 = vpop.permute.xlu0 %3508 }
 0x450   : > { %v4743_v44 = vpop.f32.mrb[131].mxu0 }
 0x451   : > { %v7205_v2 = vadd.f32 %v4743_v44, %v4742_v54  ;;  %v3777_v44 = vadd.f32 %v7199_v50, %v3509_v40 }
 0x455   : > { %v4745_v43 = vpop.f32.mrb[132].mxu0 }
 0x456   : > { %v4746_v18 = vpop.f32.mrb[133].mxu0 }
 0x457   : > { %v7207_v27 = vadd.f32 %v4746_v18, %v4745_v43  ;;  %v4748_v55 = vpop.f32.mrb[134].mxu0 }
 0x458   : > { %v4749_v15 = vpop.f32.mrb[135].mxu0 }
 0x459   : > { %v7209_v12 = vadd.f32 %v4749_v15, %v4748_v55  ;;  %v3514_v55 = vpop.permute.xlu1 %3513 }
 0x45d   : > { %v4751_v5 = vpop.f32.mrb[136].mxu0 }
 0x45e   : > { %v4752_v22 = vpop.f32.mrb[137].mxu0 }
 0x45f   : > { %v7211_v37 = vadd.f32 %v4752_v22, %v4751_v5  ;;  %v4754_v1 = vpop.f32.mrb[138].mxu0  ;;  %v3780_v5 = vadd.f32 %v7201_v59, %v3514_v55 }
 0x460   : > { %v4755_v29 = vpop.f32.mrb[139].mxu0 }
 0x461   : > { %v7213_v35 = vadd.f32 %v4755_v29, %v4754_v1 }
 0x465   : > { %v4757_v51 = vpop.f32.mrb[140].mxu0 }
 0x466   : > { %v4758_v21 = vpop.f32.mrb[141].mxu0 }
 0x467   : > { %v7215_v17 = vadd.f32 %v4758_v21, %v4757_v51  ;;  %v4760_v53 = vpop.f32.mrb[142].mxu0 }
 0x468   : > { %v4761_v41 = vpop.f32.mrb[143].mxu0 }
 0x469   : > { %v7217_v38 = vadd.f32 %v4761_v41, %v4760_v53  ;;  %v3519_v53 = vpop.permute.xlu0 %3518 }
 0x46d   : > { %v4763_v14 = vpop.f32.mrb[144].mxu0  ;;  %v3529_v9 = vpop.permute.xlu0 %3528 }
 0x46e   : > { %v4764_v20 = vpop.f32.mrb[145].mxu0 }
 0x46f   : > { %v7219_v23 = vadd.f32 %v4764_v20, %v4763_v14  ;;  %v4766_v0 = vpop.f32.mrb[146].mxu0  ;;  %v3785_v14 = vadd.f32 %v7203_v7, %v3519_v53 }
 0x470   : > { %v4767_v32 = vpop.f32.mrb[147].mxu0 }
 0x471   : > { %v7221_v36 = vadd.f32 %v4767_v32, %v4766_v0  ;;  %v3524_v32 = vpop.permute.xlu1 %3523 }
 0x4b5   : > { %v4785_v24 = vpop.f32.mrb[148].mxu0 }
 0x4b6   : > { %v4786_v10 = vpop.f32.mrb[149].mxu0 }
 0x4b7   : > { %v4787_v19 = vadd.f32 %v4786_v10, %v4785_v24  ;;  %v4788_v49 = vpop.f32.mrb[150].mxu0  ;;  %v3788_v24 = vadd.f32 %v7205_v2, %v3524_v32 }
 0x4b8   : > { %v4789_v6 = vpop.f32.mrb[151].mxu0 }
 0x4b9   : > { %v3858_v48 = vadd.f32 %v4787_v19, %v3761_v63  ;;  %v4790_v58 = vadd.f32 %v4789_v6, %v4788_v49 }
 0x4bb   : > { %v3861_v28 = vadd.f32 %v4790_v58, %v3764_v16  ;;  %v3920_v30 = vmax.f32 %v3858_v48, 0.0  ;;  %v3793_v16 = vadd.f32 %v7207_v27, %v3529_v9  ;;  %v5493_v9 = vld [vmem:[%s7280_s7 + $0x28] sm:$0xff]  }
 0x4bd   : > { %v3921_v33 = vmax.f32 %v3861_v28, 0.0  ;;  %v4791_v34 = vpop.f32.mrb[152].mxu0  ;;  %v3534_v28 = vpop.permute.xlu1 %3533 }
 0x4be   : > { %v4792_v61 = vpop.f32.mrb[153].mxu0 }
 0x4bf   : > { %v4793_v39 = vadd.f32 %v4792_v61, %v4791_v34  ;;  %v4794_v31 = vpop.f32.mrb[154].mxu0  ;;  %v3936_v8 = vpack.c.bf16 %v3921_v33, %v3920_v30  ;;  %v3796_v33 = vadd.f32 %v7209_v12, %v3534_v28 }
 0x4c0   : > { %v4795_v62 = vpop.f32.mrb[155].mxu0 }
 0x4c1   : > { %v3866_v57 = vadd.f32 %v4793_v39, %v3769_v56  ;;  %v4796_v11 = vadd.f32 %v4795_v62, %v4794_v31  ;;  %4939 = vmatprep.subr.bf16.mxu0 %v3936_v8  ;;  %v3539_v31 = vpop.permute.xlu0 %3538 }
 0x4c2   : > { %4940 = vmatpush3.bf16.msra.mxu0 %v3936_v8  ;;  %v3801_v25 = vadd.f32 %v7211_v37, %v3539_v31 }
 0x4c3   : > { %v3869_v45 = vadd.f32 %v4796_v11, %v3772_v26  ;;  %v3922_v42 = vmax.f32 %v3866_v57, 0.0  ;;  %v3544_v57 = vpop.permute.xlu1 %3543 }
 0x4c5   : > { %v3923_v3 = vmax.f32 %v3869_v45, 0.0  ;;  %v4797_v60 = vpop.f32.mrb[156].mxu0  ;;  %v3804_v45 = vadd.f32 %v7213_v35, %v3544_v57 }
 0x4c6   : > { %v4798_v54 = vpop.f32.mrb[157].mxu0 }
 0x4c7   : > { %v4799_v43 = vadd.f32 %v4798_v54, %v4797_v60  ;;  %v4800_v52 = vpop.f32.mrb[158].mxu0  ;;  %v3937_v18 = vpack.c.bf16 %v3923_v3, %v3922_v42 }
 0x4c8   : > { %v4801_v15 = vpop.f32.mrb[159].mxu0 }
 0x4c9   : > { %v3874_v4 = vadd.f32 %v4799_v43, %v3777_v44  ;;  %v4802_v22 = vadd.f32 %v4801_v15, %v4800_v52  ;;  %4941 = vmatprep.subr.bf16.mxu0 %v3937_v18  ;;  %v3549_v44 = vpop.permute.xlu0 %3548  ;;  %v3554_v15 = vpop.permute.xlu1 %3553 }
 0x4ca   : > { %4942 = vmatpush3.bf16.msra.mxu0 %v3937_v18  ;;  %v3809_v52 = vadd.f32 %v7215_v17, %v3549_v44 }
 0x4cb   : > { %v3877_v1 = vadd.f32 %v4802_v22, %v3780_v5  ;;  %v3924_v29 = vmax.f32 %v3874_v4, 0.0  ;;  %v3812_v4 = vadd.f32 %v7217_v38, %v3554_v15 }
 0x4cd   : > { %v3925_v51 = vmax.f32 %v3877_v1, 0.0  ;;  %v4803_v21 = vpop.f32.mrb[160].mxu0  ;;  %v3559_v53 = vpop.permute.xlu0 %3558 }
 0x4ce   : > { %v4804_v41 = vpop.f32.mrb[161].mxu0 }
 0x4cf   : > { %v4805_v50 = vadd.f32 %v4804_v41, %v4803_v21  ;;  %v4806_v20 = vpop.f32.mrb[162].mxu0  ;;  %v3938_v0 = vpack.c.bf16 %v3925_v51, %v3924_v29 }
 0x4d0   : > { %v4807_v46 = vpop.f32.mrb[163].mxu0 }
 0x4d1   : > { %v3882_v59 = vadd.f32 %v4805_v50, %v3785_v14  ;;  %v4808_v13 = vadd.f32 %v4807_v46, %v4806_v20  ;;  %4943 = vmatprep.subr.bf16.mxu0 %v3938_v0  ;;  %v3817_v14 = vadd.f32 %v7219_v23, %v3559_v53  ;;  %v5489_v23 = vld [vmem:[%s7280_s7 + $0x8] sm:$0xff]  }
 0x4d2   : > { %4944 = vmatpush3.bf16.msra.mxu0 %v3938_v0  ;;  %v3564_v0 = vpop.permute.xlu1 %3563 }
 0x4d3   : > { %v3885_v10 = vadd.f32 %v4808_v13, %v3788_v24  ;;  %v3926_v63 = vmax.f32 %v3882_v59, 0.0  ;;  %v3820_v46 = vadd.f32 %v7221_v36, %v3564_v0  ;;  %v5491_v36 = vld [vmem:[%s7280_s7 + $0x18] sm:$0xff]  }
 0x4d5   : > { %v3927_v19 = vmax.f32 %v3885_v10, 0.0  ;;  %v4809_v49 = vpop.f32.mrb[164].mxu0 }
 0x4d6   : > { %v4810_v6 = vpop.f32.mrb[165].mxu0 }
 0x4d7   : > { %v4811_v7 = vadd.f32 %v4810_v6, %v4809_v49  ;;  %v4812_v48 = vpop.f32.mrb[166].mxu0  ;;  %v3939_v58 = vpack.c.bf16 %v3927_v19, %v3926_v63  ;;  %v5490_v19 = vld [vmem:[%s7280_s7 + $0x10] sm:$0xff]   ;;  %v5492_v49 = vld [vmem:[%s7280_s7 + $0x20] sm:$0xff]  }
 0x4d8   : > { %v4813_v30 = vpop.f32.mrb[167].mxu0  ;;  %v5494_v6 = vld [vmem:[%s7280_s7 + $0x30] sm:$0xff]  }
 0x4d9   : > { %v3890_v2 = vadd.f32 %v4811_v7, %v3793_v16  ;;  %v4814_v34 = vadd.f32 %v4813_v30, %v4812_v48  ;;  %4945 = vmatprep.subr.bf16.mxu0 %v3939_v58  ;;  %v5495_v16 = vld [vmem:[%s7280_s7 + $0x38] sm:$0xff]   ;;  %v5496_v7 = vld [vmem:[%s7282_s9] sm:$0xff]   ;;  %v3979_v48 = vpop.permute.xlu0 %3978 }
 0x4da   : > { %4946 = vmatpush3.bf16.msra.mxu0 %v3939_v58  ;;  %v3984_v58 = vpop.permute.xlu1 %3983 }
 0x4db   : > { %v3893_v47 = vadd.f32 %v4814_v34, %v3796_v33  ;;  %v3928_v61 = vmax.f32 %v3890_v2, 0.0 }
 0x4dd   : > { %v3929_v56 = vmax.f32 %v3893_v47, 0.0  ;;  %v4815_v39 = vpop.f32.mrb[168].mxu0  ;;  %v3989_v28 = vpop.permute.xlu0 %3988 }
 0x4de   : > { %v4816_v8 = vpop.f32.mrb[169].mxu0  ;;  %v3994_v30 = vpop.permute.xlu1 %3993 }
 0x4df   : > { %v4817_v27 = vadd.f32 %v4816_v8, %v4815_v39  ;;  %v4818_v62 = vpop.f32.mrb[170].mxu0  ;;  %v3940_v26 = vpack.c.bf16 %v3929_v56, %v3928_v61 }
 0x4e0   : > { %v4819_v11 = vpop.f32.mrb[171].mxu0 }
 0x4e1   : > { %v3898_v12 = vadd.f32 %v4817_v27, %v3801_v25  ;;  %v4820_v42 = vadd.f32 %v4819_v11, %v4818_v62  ;;  %4947 = vmatprep.subr.bf16.mxu0 %v3940_v26  ;;  %v3999_v33 = vpop.permute.xlu0 %3998 }
 0x4e2   : > { %4948 = vmatpush3.bf16.msra.mxu0 %v3940_v26  ;;  %v4004_v2 = vpop.permute.xlu1 %4003 }
 0x4e3   : > { %v3901_v3 = vadd.f32 %v4820_v42, %v3804_v45  ;;  %v3930_v60 = vmax.f32 %v3898_v12, 0.0 }
 0x4e5   : > { %v3931_v40 = vmax.f32 %v3901_v3, 0.0  ;;  %v4821_v54 = vpop.f32.mrb[172].mxu0  ;;  %v4009_v34 = vpop.permute.xlu0 %4008 }
 0x4e6   : > { %v4822_v43 = vpop.f32.mrb[173].mxu0  ;;  %v4014_v39 = vpop.permute.xlu1 %4013 }
 0x4e7   : > { %v4823_v37 = vadd.f32 %v4822_v43, %v4821_v54  ;;  %v4824_v18 = vpop.f32.mrb[174].mxu0  ;;  %v3941_v55 = vpack.c.bf16 %v3931_v40, %v3930_v60 }
 0x4e8   : > { %v4825_v5 = vpop.f32.mrb[175].mxu0 }
 0x4e9   : > { %v3906_v35 = vadd.f32 %v4823_v37, %v3809_v52  ;;  %v4826_v22 = vadd.f32 %v4825_v5, %v4824_v18  ;;  %4949 = vmatprep.subr.bf16.mxu0 %v3941_v55  ;;  %v4019_v11 = vpop.permute.xlu0 %4018 }
 0x4ea   : > { %4950 = vmatpush3.bf16.msra.mxu0 %v3941_v55  ;;  %v4024_v3 = vpop.permute.xlu1 %4023 }
 0x4eb   : > { %v3909_v1 = vadd.f32 %v4826_v22, %v3812_v4  ;;  %v3932_v29 = vmax.f32 %v3906_v35, 0.0 }
 0x4ed   : > { %v3933_v51 = vmax.f32 %v3909_v1, 0.0  ;;  %v4827_v21 = vpop.f32.mrb[176].mxu0  ;;  %v4029_v55 = vpop.permute.xlu0 %4028 }
 0x4ee   : > { %v4828_v41 = vpop.f32.mrb[177].mxu0  ;;  %v4034_v35 = vpop.permute.xlu1 %4033 }
 0x4ef   : > { %v4829_v17 = vadd.f32 %v4828_v41, %v4827_v21  ;;  %v4830_v50 = vpop.f32.mrb[178].mxu0  ;;  %v3942_v20 = vpack.c.bf16 %v3933_v51, %v3932_v29 }
 0x4f0   : > { %v4831_v32 = vpop.f32.mrb[179].mxu0 }
 0x4f1   : > { %v3914_v38 = vadd.f32 %v4829_v17, %v3817_v14  ;;  %v4832_v24 = vadd.f32 %v4831_v32, %v4830_v50  ;;  %4951 = vmatprep.subr.bf16.mxu0 %v3942_v20  ;;  %v4039_v14 = vpop.permute.xlu0 %4038 }
 0x4f2   : > { %4952 = vmatpush3.bf16.msra.mxu0 %v3942_v20  ;;  %v4044_v32 = vpop.permute.xlu1 %4043 }
 0x4f3   : > { %v3917_v59 = vadd.f32 %v4832_v24, %v3820_v46  ;;  %v3934_v13 = vmax.f32 %v3914_v38, 0.0 }
 0x4f5   : > { %v3935_v10 = vmax.f32 %v3917_v59, 0.0 }
 0x4f7   : > { %v3943_v63 = vpack.c.bf16 %v3935_v10, %v3934_v13 }
 0x4f9   : > { %4953 = vmatprep.subr.bf16.mxu0 %v3943_v63 }
 0x4fa   : > { %4954 = vmatpush3.bf16.msra.mxu0 %v3943_v63  ;;  %v4049_v63 = vpop.permute.xlu0 %4048 }
 0x4fd   : > { %4956 = vmatmul.mubr.bf16.vlgmr.msra.gmra.mrb[180].mxu0 %v5489_v23 }
 0x4fe   : > { %4959 = vmatprep.mubr.bf16.mxu0 %v5490_v19 }
 0x505   : > { %4960 = vmatmul.mubr.bf16.gmra.mrb[184].mxu0 %v5491_v36 }
 0x506   : > { %4963 = vmatprep.mubr.bf16.mxu0 %v5492_v49 }
 0x50d   : > { %4964 = vmatmul.mubr.bf16.gmra.mrb[188].mxu0 %v5493_v9  ;;  %v4054_v9 = vpop.permute.xlu1 %4053 }
 0x50e   : > { %4967 = vmatprep.mubr.bf16.mxu0 %v5494_v6 }
 0x515   : > { %4968 = vmatmul.mubr.bf16.gmra.mrb[192].mxu0 %v5495_v16 }
 0x516   : > { %4987 = vmatprep.mubr.bf16.mxu0 %v5496_v7 }
 0x5d0   : > { %v4957_v47 = vpop.f32.mrb[180].mxu0 }
 0x5d1   : > { %v4147_v61 = vadd.f32 %v4957_v47, %v3989_v28  ;;  %v4138_v56 = vpop.f32.mrb[181].mxu0 }
 0x5d2   : > { %v4139_v31 = vadd.f32 %v4138_v56, %v3979_v48  ;;  %v4958_v8 = vpop.f32.mrb[182].mxu0  ;;  %v4236_v56 = vpop.permute.xlu0 %4235 }
 0x5d3   : > { %v4150_v25 = vadd.f32 %v4958_v8, %v3994_v30  ;;  %v4141_v27 = vpop.f32.mrb[183].mxu0  ;;  %v4203_v26 = vmax.f32 %v4147_v61, 0.0  ;;  %v5497_v61 = vld [vmem:[%s7282_s9 + $0x8] sm:$0xff]  }
 0x5d4   : > { %v4142_v62 = vadd.f32 %v4141_v27, %v3984_v58  ;;  %v4201_v45 = vmax.f32 %v4139_v31, 0.0 }
 0x5d5   : > { %v4204_v57 = vmax.f32 %v4150_v25, 0.0 }
 0x5d6   : > { %v4202_v12 = vmax.f32 %v4142_v62, 0.0  ;;  %v4246_v31 = vpop.permute.xlu0 %4245 }
 0x5d7   : > { %v4218_v42 = vpack.c.bf16 %v4204_v57, %v4203_v26 }
 0x5d8   : > { %v4217_v60 = vpack.c.bf16 %v4202_v12, %v4201_v45  ;;  %v4961_v40 = vpop.f32.mrb[184].mxu0 }
 0x5d9   : > { %v4163_v54 = vadd.f32 %v4961_v40, %v4009_v34  ;;  %v4154_v44 = vpop.f32.mrb[185].mxu0 }
 0x5da   : > { %v4155_v43 = vadd.f32 %v4154_v44, %v3999_v33  ;;  %v4962_v52 = vpop.f32.mrb[186].mxu0  ;;  %4971 = vmatprep.subr.bf16.mxu0 %v4217_v60 }
 0x5db   : > { %v4166_v37 = vadd.f32 %v4962_v52, %v4014_v39  ;;  %v4157_v18 = vpop.f32.mrb[187].mxu0  ;;  %4972 = vmatpush3.bf16.msra.mxu0 %v4217_v60  ;;  %v4207_v5 = vmax.f32 %v4163_v54, 0.0  ;;  %v4241_v39 = vpop.permute.xlu1 %4240 }
 0x5dc   : > { %v4158_v15 = vadd.f32 %v4157_v18, %v4004_v2  ;;  %4973 = vmatprep.subr.bf16.mxu0 %v4218_v42  ;;  %v4205_v22 = vmax.f32 %v4155_v43, 0.0 }
 0x5dd   : > { %v4208_v4 = vmax.f32 %v4166_v37, 0.0 }
 0x5de   : > { %v4206_v1 = vmax.f32 %v4158_v15, 0.0 }
 0x5df   : > { %v4220_v29 = vpack.c.bf16 %v4208_v4, %v4207_v5  ;;  %4974 = vmatpush3.bf16.msra.mxu0 %v4218_v42  ;;  %v4251_v8 = vpop.permute.xlu1 %4250 }
 0x5e0   : > { %v4219_v51 = vpack.c.bf16 %v4206_v1, %v4205_v22  ;;  %v4965_v21 = vpop.f32.mrb[188].mxu0 }
 0x5e1   : > { %v4179_v53 = vadd.f32 %v4965_v21, %v4029_v55  ;;  %v4170_v41 = vpop.f32.mrb[189].mxu0 }
 0x5e2   : > { %v4171_v17 = vadd.f32 %v4170_v41, %v4019_v11  ;;  %v4966_v50 = vpop.f32.mrb[190].mxu0  ;;  %4975 = vmatprep.subr.bf16.mxu0 %v4219_v51  ;;  %v4325_v11 = vpop.permute.xlu0 %4324 }
 0x5e3   : > { %v4182_v20 = vadd.f32 %v4966_v50, %v4034_v35  ;;  %v4173_v0 = vpop.f32.mrb[191].mxu0  ;;  %4976 = vmatpush3.bf16.msra.mxu0 %v4219_v51  ;;  %v4211_v38 = vmax.f32 %v4179_v53, 0.0  ;;  %v4330_v60 = vpop.permute.xlu1 %4329  ;;  %v4361_v35 = vlaneseq }
 0x5e4   : > { %v4174_v46 = vadd.f32 %v4173_v0, %v4024_v3  ;;  %4977 = vmatprep.subr.bf16.mxu0 %v4220_v29  ;;  %v4209_v59 = vmax.f32 %v4171_v17, 0.0 }
 0x5e5   : > { %v4212_v24 = vmax.f32 %v4182_v20, 0.0 }
 0x5e6   : > { %v4210_v13 = vmax.f32 %v4174_v46, 0.0  ;;  %v4335_v37 = vpop.permute.xlu0 %4334 }
 0x5e7   : > { %v4222_v10 = vpack.c.bf16 %v4212_v24, %v4211_v38  ;;  %4978 = vmatpush3.bf16.msra.mxu0 %v4220_v29  ;;  %v4340_v15 = vpop.permute.xlu1 %4339  ;;  %v4362_v29 = vshrl.u32 %v4361_v35, 7 }
 0x5e8   : > { %v4221_v23 = vpack.c.bf16 %v4210_v13, %v4209_v59  ;;  %v4969_v19 = vpop.f32.mrb[192].mxu0 }
 0x5e9   : > { %v4195_v36 = vadd.f32 %v4969_v19, %v4049_v63  ;;  %v4186_v49 = vpop.f32.mrb[193].mxu0  ;;  %v4363_v53 = vsub.s32 0, %v4362_v29 }
 0x5ea   : > { %v4187_v6 = vadd.f32 %v4186_v49, %v4039_v14  ;;  %v4970_v16 = vpop.f32.mrb[194].mxu0  ;;  %4979 = vmatprep.subr.bf16.mxu0 %v4221_v23  ;;  %v4359_v14 = vpop.permute.xlu0 %4358 }
 0x5eb   : > { %v4198_v7 = vadd.f32 %v4970_v16, %v4054_v9  ;;  %v4189_v48 = vpop.f32.mrb[195].mxu0  ;;  %4980 = vmatpush3.bf16.msra.mxu0 %v4221_v23  ;;  %v4215_v28 = vmax.f32 %v4195_v36, 0.0  ;;  %v4364_v50 = vrot.slane %v4359_v14, %v4363_v53 }
 0x5ec   : > { %v4190_v58 = vadd.f32 %v4189_v48, %v4044_v32  ;;  %4981 = vmatprep.subr.bf16.mxu0 %v4222_v10  ;;  %v4213_v33 = vmax.f32 %v4187_v6, 0.0 }
 0x5ed   : > { %v4216_v30 = vmax.f32 %v4198_v7, 0.0 }
 0x5ee   : > { %v4214_v2 = vmax.f32 %v4190_v58, 0.0 }
 0x5ef   : > { %v4224_v34 = vpack.c.bf16 %v4216_v30, %v4215_v28  ;;  %4982 = vmatpush3.bf16.msra.mxu0 %v4222_v10 }
 0x5f0   : > { %v4223_v47 = vpack.c.bf16 %v4214_v2, %v4213_v33 }
 0x5f2   : > { %4983 = vmatprep.subr.bf16.mxu0 %v4223_v47 }
 0x5f3   : > { %4984 = vmatpush3.bf16.msra.mxu0 %v4223_v47 }
 0x5f4   : > { %4985 = vmatprep.subr.bf16.mxu0 %v4224_v34 }
 0x5f7   : > { %4986 = vmatpush3.bf16.msra.mxu0 %v4224_v34 }
 0x5fa   : > { %4988 = vmatmul.mubr.bf16.vlgmr.msra.gmra.mrb[196].mxu0 %v5497_v61 }
 0x6cd   : > { %v4989_v25 = vpop.f32.mrb[196].mxu0 }
 0x6ce   : > { %v4299_v27 = vpop.f32.mrb[197].mxu0  ;;  %v4308_v62 = vadd.f32 %v4989_v25, %v4246_v31 }
 0x6cf   : > { %v4300_v26 = vadd.f32 %v4299_v27, %v4236_v56  ;;  %v4990_v57 = vpop.f32.mrb[198].mxu0 }
 0x6d0   : > { %v4302_v45 = vpop.f32.mrb[199].mxu0  ;;  %v4311_v42 = vadd.f32 %v4990_v57, %v4251_v8  ;;  %v4316_v40 = vmax.f32 %v4308_v62, 0.0 }
 0x6d1   : > { %v4314_v12 = vmax.f32 %v4300_v26, 0.0  ;;  %v4303_v3 = vadd.f32 %v4302_v45, %v4241_v39 }
 0x6d2   : > { %v4317_v43 = vmax.f32 %v4311_v42, 0.0  ;;  %v4344_v18 = vmul.f32 %v4335_v37, %v4316_v40 }
 0x6d3   : > { %v4315_v54 = vmax.f32 %v4303_v3, 0.0  ;;  %v4342_v44 = vmul.f32 %v4325_v11, %v4314_v12 }
 0x6d4   : > { %v4345_v5 = vmul.f32 %v4340_v15, %v4317_v43 }
 0x6d5   : > { %v4343_v52 = vmul.f32 %v4330_v60, %v4315_v54 }
 0x6d7   : > { %v4346_v55 = vadd.f32 %v4343_v52, %v4342_v44 }
 0x6d9   : > { %v4347_v4 = vadd.f32 %v4346_v55, %v4344_v18 }
 0x6db   : > { %v4348_v22 = vadd.f32 %v4347_v4, %v4345_v5 }
 0x6dd   : > { %v4349_v1 = vrot.slane %v4348_v22, 4 }
 0x6df   : > { %v4350_v51 = vadd.f32 %v4349_v1, %v4348_v22 }
 0x6e1   : > { %v4351_v21 = vrot.slane %v4350_v51, 2 }
 0x6e3   : > { %v4352_v41 = vadd.f32 %v4351_v21, %v4350_v51 }
 0x6e5   : > { %v4353_v17 = vrot.slane %v4352_v41, 1 }
 0x6e7   : > { %v4354_v20 = vadd.f32 %v4353_v17, %v4352_v41 }
 0x6e9   : > { %v4365_v0 = vadd.f32 %v4364_v50, %v4354_v20 }
 0x6eb   : > { %4366 = vst [vmem:[%s440_s24] sm:$0x1] %v4365_v0 }
 0x6ec PF: > { %s25_s27 = sadd.s32 1, %s5504_s27  }
 0x6ed   : > { %p22_p5 = scmp.ge.s32.totalorder %s25_s27, 5  }
 0x6ef   :  { %24 = sbr.rel (!%p22_p5) target bundleno = 3 (0x3), region = 102 }

</bundles_post_ra>
